<compile_context>
chip_gen: v7x
topology: tpu7x:2x2x1
jax: 0.10.0
libtpu: 0.0.40
codegen_flags: <defaults>
</compile_context>

<pallas_src>
import math
from functools import partial

import numpy as np
import jax
import jax.numpy as jnp
from jax.experimental import pallas as pl
from jax.experimental.pallas import tpu as pltpu  # noqa: F401  (TPU backend)

# ----------------------------- small config ---------------------------------
VOCAB     = 64
HIDDEN    = 32
HEADS     = 2
HEAD_DIM  = HIDDEN // HEADS
FFN       = 64
LAYERS    = 2
SEQ       = 8
BATCH     = 2
CHOICES   = 3
MAX_POS   = 64
SEG_TYPES = 3
LN_EPS    = 1e-6


def _full_spec(shape):
    """Whole-array block (no grid: single-shot kernel)."""
    return pl.BlockSpec(shape, lambda *_: (0,) * len(shape))


def _layernorm(z, g, b):
    mu = jnp.mean(z, axis=-1, keepdims=True)
    var = jnp.mean(jnp.square(z - mu), axis=-1, keepdims=True)
    return (z - mu) * jax.lax.rsqrt(var + LN_EPS) * g + b


def _gelu(z):
    # TODO(synk): UER uses exact erf-GELU; tanh approximation kept for robust
    # Mosaic lowering (no guaranteed erf rule).
    c = math.sqrt(2.0 / math.pi)
    return 0.5 * z * (1.0 + jnp.tanh(c * (z + 0.044715 * z * z * z)))


# --------------------------- fused forward kernel ---------------------------
def _mc_fused_kernel(
    src_ref, seg_ref, mask_ref, tgt1h_ref,
    cls_sel_ref, row_sel_ref, choice_sel_ref,
    word_emb_ref, pos_emb_ref, seg_emb_ref, emb_g_ref, emb_b_ref,
    wqkv_ref, bqkv_ref, wo_ref, bo_ref, ln1g_ref, ln1b_ref,
    w1_ref, b1_ref, w2_ref, b2_ref, ln2g_ref, ln2b_ref,
    outw_ref, outb_ref,
    logits_ref, loss_ref,
    *, heads):
    f32 = jnp.float32
    rows = src_ref.shape[0]                       # batch*choices*seq
    vocab, hidden = word_emb_ref.shape
    n_layers = wqkv_ref.shape[0]
    bc, _, seq = mask_ref.shape
    bsz, _ = logits_ref.shape
    hd = hidden // heads

    # ---- embedding: one-hot matmul (word) + 3-way select (seg) + pos add ----
    tok = src_ref[...]                                                 # (R,1) i32
    onehot = (tok == jax.lax.broadcasted_iota(jnp.int32, (rows, vocab), 1)
              ).astype(f32)
    x = jnp.dot(onehot, word_emb_ref[...], preferred_element_type=f32)  # (R,H)

    segt = seg_ref[...]                                                # (R,1) i32
    st = seg_emb_ref[...]                                              # (3,H)
    x = x + jnp.where(segt == 0, st[0:1, :],
                      jnp.where(segt == 1, st[1:2, :], st[2:3, :]))
    x = (x.reshape(bc, seq, hidden) + pos_emb_ref[...]).reshape(rows, hidden)
    x = _layernorm(x, emb_g_ref[...], emb_b_ref[...])
    # dropout == identity (inference)

    mask = mask_ref[...]                                               # (BC,1,S)

    # ---- transformer encoder (post-LN), fully unrolled in VMEM/vregs ----
    for l in range(n_layers):
        # fused QKV projection; 1/sqrt(head_dim) already folded into wq/bq
        qkv = jnp.dot(x, wqkv_ref[l], preferred_element_type=f32) + bqkv_ref[l]
        q3 = qkv[:, 0:hidden].reshape(bc, seq, hidden)
        k3 = qkv[:, hidden:2 * hidden].reshape(bc, seq, hidden)
        v3 = qkv[:, 2 * hidden:3 * hidden].reshape(bc, seq, hidden)
        wo_l = wo_ref[l]                                               # (H,H)

        attn = None
        for h in range(heads):
            sl = slice(h * hd, (h + 1) * hd)
            s = jnp.einsum('bqd,bkd->bqk', q3[:, :, sl], k3[:, :, sl],
                           preferred_element_type=f32)                 # (BC,S,S)
            s = s + mask
            s = s - jnp.max(s, axis=-1, keepdims=True)
            p = jnp.exp(s)
            p = p * pl.reciprocal(jnp.sum(p, axis=-1, keepdims=True), approx=True)
            ctx = jnp.einsum('bqk,bkd->bqd', p, v3[:, :, sl],
                             preferred_element_type=f32)               # (BC,S,hd)
            # fold head-concat into the output projection: ctx_h @ wo[h rows]
            part = jnp.dot(ctx.reshape(rows, hd), wo_l[sl, :],
                           preferred_element_type=f32)
            attn = part if attn is None else attn + part

        x = _layernorm(attn + bo_ref[l] + x, ln1g_ref[l], ln1b_ref[l])
        ff = _gelu(jnp.dot(x, w1_ref[l], preferred_element_type=f32) + b1_ref[l])
        ff = jnp.dot(ff, w2_ref[l], preferred_element_type=f32) + b2_ref[l]
        x = _layernorm(ff + x, ln2g_ref[l], ln2b_ref[l])

    # ---- Linear(H,1) first, then [CLS] select + regroup to [B, choices] ----
    w_logit = jnp.dot(x, outw_ref[...], preferred_element_type=f32)    # (R,1)
    logit_col = (jnp.dot(cls_sel_ref[...], w_logit, preferred_element_type=f32)
                 + outb_ref[...])                                      # (BC,1)
    logits = jnp.dot(row_sel_ref[...], logit_col * choice_sel_ref[...],
                     preferred_element_type=f32)                       # (B,C)
    logits_ref[...] = logits

    # ---- LogSoftmax + NLL (mean over batch) ----
    m = jnp.max(logits, axis=-1, keepdims=True)
    lse = jnp.log(jnp.sum(jnp.exp(logits - m), axis=-1, keepdims=True)) + m
    logp = logits - lse
    nll = -jnp.sum(logp * tgt1h_ref[...], axis=-1, keepdims=True)      # (B,1)
    loss_ref[...] = jnp.sum(nll, axis=0, keepdims=True) * (1.0 / bsz)


# ------------------------------- parameters ---------------------------------
def init_params(key):
    keys = iter(jax.random.split(key, 8 + LAYERS * 8))

    def dense(shape):
        return jax.random.normal(next(keys), shape, jnp.float32) * 0.02

    params = {
        "word_emb": dense((VOCAB, HIDDEN)),
        "pos_emb":  dense((MAX_POS, HIDDEN)),
        "seg_emb":  dense((SEG_TYPES, HIDDEN)),
        "emb_ln_g": jnp.ones((HIDDEN,), jnp.float32),
        "emb_ln_b": jnp.zeros((HIDDEN,), jnp.float32),
        "out_w":    dense((HIDDEN, 1)),
        "out_b":    jnp.zeros((1,), jnp.float32),
        "layers":   [],
    }
    for _ in range(LAYERS):
        params["layers"].append({
            "wq": dense((HIDDEN, HIDDEN)), "bq": jnp.zeros((HIDDEN,), jnp.float32),
            "wk": dense((HIDDEN, HIDDEN)), "bk": jnp.zeros((HIDDEN,), jnp.float32),
            "wv": dense((HIDDEN, HIDDEN)), "bv": jnp.zeros((HIDDEN,), jnp.float32),
            "wo": dense((HIDDEN, HIDDEN)), "bo": jnp.zeros((HIDDEN,), jnp.float32),
            "ln1_g": jnp.ones((HIDDEN,), jnp.float32),
            "ln1_b": jnp.zeros((HIDDEN,), jnp.float32),
            "w1": dense((HIDDEN, FFN)), "b1": jnp.zeros((FFN,), jnp.float32),
            "w2": dense((FFN, HIDDEN)), "b2": jnp.zeros((HIDDEN,), jnp.float32),
            "ln2_g": jnp.ones((HIDDEN,), jnp.float32),
            "ln2_b": jnp.zeros((HIDDEN,), jnp.float32),
        })
    return params


# -------------------------------- forward -----------------------------------
def multiple_choice_forward(params, src, tgt, seg):
    """src/seg: [batch, choices, seq] int32, tgt: [batch] int32 (or None)."""
    B, C, S = src.shape
    BC = B * C
    R = BC * S

    # ---- tiny input preprocessing (flatten + additive mask + target 1-hot) ----
    src_flat = src.reshape(R, 1).astype(jnp.int32)
    seg_flat = seg.reshape(R, 1).astype(jnp.int32)
    seg_bc = seg.reshape(BC, S)
    mask_add = jnp.where(seg_bc > 0, 0.0, -10000.0).astype(jnp.float32)
    mask_add = mask_add.reshape(BC, 1, S)
    if tgt is None:
        tgt1h = jnp.zeros((B, C), jnp.float32)
    else:
        tgt1h = jax.nn.one_hot(tgt.reshape(-1), C, dtype=jnp.float32)

    # static selection matrices (compile-time constants)
    i = np.arange(BC)
    cls_sel = np.zeros((BC, R), np.float32);   cls_sel[i, i * S] = 1.0
    row_sel = np.zeros((B, BC), np.float32);   row_sel[i // C, i] = 1.0
    choice_sel = np.zeros((BC, C), np.float32); choice_sel[i, i % C] = 1.0

    # ---- fuse / stack weights: QKV concat (with folded 1/sqrt(dh)), per-layer stacks
    scale = 1.0 / math.sqrt(HEAD_DIM)
    ls = params["layers"]
    wqkv = jnp.stack([jnp.concatenate([l["wq"] * scale, l["wk"], l["wv"]], axis=1)
                      for l in ls])
    bqkv = jnp.stack([jnp.concatenate([l["bq"] * scale, l["bk"], l["bv"]]).reshape(1, -1)
                      for l in ls])
    wo   = jnp.stack([l["wo"] for l in ls])
    bo   = jnp.stack([l["bo"].reshape(1, -1) for l in ls])
    ln1g = jnp.stack([l["ln1_g"].reshape(1, -1) for l in ls])
    ln1b = jnp.stack([l["ln1_b"].reshape(1, -1) for l in ls])
    w1   = jnp.stack([l["w1"] for l in ls])
    b1   = jnp.stack([l["b1"].reshape(1, -1) for l in ls])
    w2   = jnp.stack([l["w2"] for l in ls])
    b2   = jnp.stack([l["b2"].reshape(1, -1) for l in ls])
    ln2g = jnp.stack([l["ln2_g"].reshape(1, -1) for l in ls])
    ln2b = jnp.stack([l["ln2_b"].reshape(1, -1) for l in ls])

    operands = (
        src_flat, seg_flat, mask_add, tgt1h,
        jnp.asarray(cls_sel), jnp.asarray(row_sel), jnp.asarray(choice_sel),
        params["word_emb"], params["pos_emb"][:S], params["seg_emb"],
        params["emb_ln_g"].reshape(1, -1), params["emb_ln_b"].reshape(1, -1),
        wqkv, bqkv, wo, bo, ln1g, ln1b, w1, b1, w2, b2, ln2g, ln2b,
        params["out_w"], params["out_b"].reshape(1, 1),
    )

    logits, loss = pl.pallas_call(
        partial(_mc_fused_kernel, heads=HEADS),
        out_shape=(jax.ShapeDtypeStruct((B, C), jnp.float32),
                   jax.ShapeDtypeStruct((1, 1), jnp.float32)),
        in_specs=[_full_spec(tuple(o.shape)) for o in operands],
        out_specs=(_full_spec((B, C)), _full_spec((1, 1))),
    )(*operands)

    if tgt is None:
        return None, logits
    return loss[0, 0], logits


# --------------------------------- main --------------------------------------
if __name__ == "__main__":
    key = jax.random.PRNGKey(0)
    pkey, skey, tkey = jax.random.split(key, 3)
    params = init_params(pkey)

    src = jax.random.randint(skey, (BATCH, CHOICES, SEQ), 1, VOCAB, dtype=jnp.int32)
    seg = jnp.ones((BATCH, CHOICES, SEQ), jnp.int32)
    valid = (jnp.arange(SEQ) < SEQ - 2).astype(jnp.int32)     # last 2 tokens = pad
    src = src * valid[None, None, :]
    seg = seg * valid[None, None, :]
    seg = jnp.where((jnp.arange(SEQ)[None, None, :] >= 3) & (seg > 0), 2, seg)
    tgt = jax.random.randint(tkey, (BATCH,), 0, CHOICES, dtype=jnp.int32)

    loss, logits = jax.jit(multiple_choice_forward)(params, src, tgt, seg)
    jax.block_until_ready((loss, logits))
    assert logits.shape == (BATCH, CHOICES)
    assert bool(jnp.isfinite(loss))
    print("KERNEL_OK")
</pallas_src>

<mosaic_0001>
module attributes {stable_mosaic.version = 11 : i64} {
  func.func @_mc_fused_kernel(%arg0: memref<48x1xi32, #tpu.memory_space<vmem>>, %arg1: memref<48x1xi32, #tpu.memory_space<vmem>>, %arg2: memref<6x1x8xf32, #tpu.memory_space<vmem>>, %arg3: memref<2x3xf32, #tpu.memory_space<vmem>>, %arg4: memref<6x48xf32, #tpu.memory_space<vmem>>, %arg5: memref<2x6xf32, #tpu.memory_space<vmem>>, %arg6: memref<6x3xf32, #tpu.memory_space<vmem>>, %arg7: memref<64x32xf32, #tpu.memory_space<vmem>>, %arg8: memref<8x32xf32, #tpu.memory_space<vmem>>, %arg9: memref<3x32xf32, #tpu.memory_space<vmem>>, %arg10: memref<1x32xf32, #tpu.memory_space<vmem>>, %arg11: memref<1x32xf32, #tpu.memory_space<vmem>>, %arg12: memref<2x32x96xf32, #tpu.memory_space<vmem>>, %arg13: memref<2x1x96xf32, #tpu.memory_space<vmem>>, %arg14: memref<2x32x32xf32, #tpu.memory_space<vmem>>, %arg15: memref<2x1x32xf32, #tpu.memory_space<vmem>>, %arg16: memref<2x1x32xf32, #tpu.memory_space<vmem>>, %arg17: memref<2x1x32xf32, #tpu.memory_space<vmem>>, %arg18: memref<2x32x64xf32, #tpu.memory_space<vmem>>, %arg19: memref<2x1x64xf32, #tpu.memory_space<vmem>>, %arg20: memref<2x64x32xf32, #tpu.memory_space<vmem>>, %arg21: memref<2x1x32xf32, #tpu.memory_space<vmem>>, %arg22: memref<2x1x32xf32, #tpu.memory_space<vmem>>, %arg23: memref<2x1x32xf32, #tpu.memory_space<vmem>>, %arg24: memref<32x1xf32, #tpu.memory_space<vmem>>, %arg25: memref<1x1xf32, #tpu.memory_space<vmem>>, %arg26: memref<2x3xf32, #tpu.memory_space<vmem>>, %arg27: memref<1x1xf32, #tpu.memory_space<vmem>>) attributes {dimension_semantics = [], scalar_prefetch = 0 : i64, scratch_operands = 0 : i64, tpu.core_type = #tpu.core_type<tc>} {
    %c0 = arith.constant 0 : index
    %c0_0 = arith.constant 0 : index
    %0 = vector.load %arg0[%c0, %c0_0] : memref<48x1xi32, #tpu.memory_space<vmem>>, vector<48x1xi32>
    %1 = tpu.iota {dimensions = array<i32: 1>} : vector<48x64xi32>
    %2 = vector.broadcast %0 : vector<48x1xi32> to vector<48x64xi32>
    %3 = arith.cmpi eq, %2, %1 : vector<48x64xi32>
    %4 = arith.extui %3 : vector<48x64xi1> to vector<48x64xi32>
    %5 = arith.sitofp %4 : vector<48x64xi32> to vector<48x64xf32>
    %c0_1 = arith.constant 0 : index
    %c0_2 = arith.constant 0 : index
    %6 = vector.load %arg7[%c0_1, %c0_2] : memref<64x32xf32, #tpu.memory_space<vmem>>, vector<64x32xf32>
    %cst = arith.constant dense<0.000000e+00> : vector<48x32xf32>
    %7 = tpu.matmul %5, %6, %cst {dimension_numbers = #tpu.dot_dimension_numbers<[1], [0], [0], [1], [0, 0, 1, 1], [], []>} : vector<48x64xf32>, vector<64x32xf32>, vector<48x32xf32> -> vector<48x32xf32>
    %c0_3 = arith.constant 0 : index
    %c0_4 = arith.constant 0 : index
    %8 = vector.load %arg1[%c0_3, %c0_4] : memref<48x1xi32, #tpu.memory_space<vmem>>, vector<48x1xi32>
    %c0_5 = arith.constant 0 : index
    %c0_6 = arith.constant 0 : index
    %9 = vector.load %arg9[%c0_5, %c0_6] : memref<3x32xf32, #tpu.memory_space<vmem>>, vector<3x32xf32>
    %c0_i32 = arith.constant 0 : i32
    %10 = vector.broadcast %c0_i32 : i32 to vector<48x1xi32>
    %11 = arith.cmpi eq, %8, %10 : vector<48x1xi32>
    %12 = vector.extract_strided_slice %9 {offsets = [0, 0], sizes = [1, 32], strides = [1, 1]} : vector<3x32xf32> to vector<1x32xf32>
    %c1_i32 = arith.constant 1 : i32
    %13 = vector.broadcast %c1_i32 : i32 to vector<48x1xi32>
    %14 = arith.cmpi eq, %8, %13 : vector<48x1xi32>
    %15 = vector.extract_strided_slice %9 {offsets = [1, 0], sizes = [1, 32], strides = [1, 1]} : vector<3x32xf32> to vector<1x32xf32>
    %16 = vector.extract_strided_slice %9 {offsets = [2, 0], sizes = [1, 32], strides = [1, 1]} : vector<3x32xf32> to vector<1x32xf32>
    %17 = vector.shape_cast %14 : vector<48x1xi1> to vector<48x1xi1>
    %18 = vector.broadcast %17 : vector<48x1xi1> to vector<48x32xi1>
    %19 = vector.shape_cast %15 : vector<1x32xf32> to vector<1x32xf32>
    %20 = vector.broadcast %19 : vector<1x32xf32> to vector<48x32xf32>
    %21 = vector.shape_cast %16 : vector<1x32xf32> to vector<1x32xf32>
    %22 = vector.broadcast %21 : vector<1x32xf32> to vector<48x32xf32>
    %23 = arith.select %18, %20, %22 : vector<48x32xi1>, vector<48x32xf32>
    %24 = vector.shape_cast %11 : vector<48x1xi1> to vector<48x1xi1>
    %25 = vector.broadcast %24 : vector<48x1xi1> to vector<48x32xi1>
    %26 = vector.shape_cast %12 : vector<1x32xf32> to vector<1x32xf32>
    %27 = vector.broadcast %26 : vector<1x32xf32> to vector<48x32xf32>
    %28 = arith.select %25, %27, %23 : vector<48x32xi1>, vector<48x32xf32>
    %29 = arith.addf %7, %28 : vector<48x32xf32>
    %30 = vector.shape_cast %29 : vector<48x32xf32> to vector<6x8x32xf32>
    %c0_7 = arith.constant 0 : index
    %c0_8 = arith.constant 0 : index
    %31 = vector.load %arg8[%c0_7, %c0_8] : memref<8x32xf32, #tpu.memory_space<vmem>>, vector<8x32xf32>
    %32 = vector.shape_cast %31 : vector<8x32xf32> to vector<1x8x32xf32>
    %33 = vector.broadcast %32 : vector<1x8x32xf32> to vector<6x8x32xf32>
    %34 = arith.addf %30, %33 : vector<6x8x32xf32>
    %35 = vector.shape_cast %34 : vector<6x8x32xf32> to vector<48x32xf32>
    %c0_9 = arith.constant 0 : index
    %c0_10 = arith.constant 0 : index
    %36 = vector.load %arg10[%c0_9, %c0_10] : memref<1x32xf32, #tpu.memory_space<vmem>>, vector<1x32xf32>
    %c0_11 = arith.constant 0 : index
    %c0_12 = arith.constant 0 : index
    %37 = vector.load %arg11[%c0_11, %c0_12] : memref<1x32xf32, #tpu.memory_space<vmem>>, vector<1x32xf32>
    %cst_13 = arith.constant dense<0.000000e+00> : vector<48xf32>
    %38 = vector.multi_reduction <add>, %35, %cst_13 [1] : vector<48x32xf32> to vector<48xf32>
    %39 = vector.shape_cast %38 : vector<48xf32> to vector<48x1xf32>
    %cst_14 = arith.constant 3.200000e+01 : f32
    %40 = vector.broadcast %cst_14 : f32 to vector<48x1xf32>
    %41 = arith.divf %39, %40 : vector<48x1xf32>
    %42 = vector.broadcast %41 : vector<48x1xf32> to vector<48x32xf32>
    %43 = arith.subf %35, %42 : vector<48x32xf32>
    %44 = arith.mulf %43, %43 : vector<48x32xf32>
    %cst_15 = arith.constant dense<0.000000e+00> : vector<48xf32>
    %45 = vector.multi_reduction <add>, %44, %cst_15 [1] : vector<48x32xf32> to vector<48xf32>
    %46 = vector.shape_cast %45 : vector<48xf32> to vector<48x1xf32>
    %cst_16 = arith.constant 3.200000e+01 : f32
    %47 = vector.broadcast %cst_16 : f32 to vector<48x1xf32>
    %48 = arith.divf %46, %47 : vector<48x1xf32>
    %49 = vector.broadcast %41 : vector<48x1xf32> to vector<48x32xf32>
    %50 = arith.subf %35, %49 : vector<48x32xf32>
    %cst_17 = arith.constant 9.99999997E-7 : f32
    %51 = vector.broadcast %cst_17 : f32 to vector<48x1xf32>
    %52 = arith.addf %48, %51 : vector<48x1xf32>
    %53 = math.rsqrt %52 : vector<48x1xf32>
    %54 = vector.broadcast %53 : vector<48x1xf32> to vector<48x32xf32>
    %55 = arith.mulf %50, %54 : vector<48x32xf32>
    %56 = vector.broadcast %36 : vector<1x32xf32> to vector<48x32xf32>
    %57 = arith.mulf %55, %56 : vector<48x32xf32>
    %58 = vector.broadcast %37 : vector<1x32xf32> to vector<48x32xf32>
    %59 = arith.addf %57, %58 : vector<48x32xf32>
    %c0_18 = arith.constant 0 : index
    %c0_19 = arith.constant 0 : index
    %c0_20 = arith.constant 0 : index
    %60 = vector.load %arg2[%c0_18, %c0_19, %c0_20] : memref<6x1x8xf32, #tpu.memory_space<vmem>>, vector<6x1x8xf32>
    %c0_21 = arith.constant 0 : index
    %c0_22 = arith.constant 0 : index
    %c0_23 = arith.constant 0 : index
    %61 = vector.load %arg12[%c0_21, %c0_22, %c0_23] : memref<2x32x96xf32, #tpu.memory_space<vmem>>, vector<1x32x96xf32>
    %62 = vector.shape_cast %61 : vector<1x32x96xf32> to vector<32x96xf32>
    %cst_24 = arith.constant dense<0.000000e+00> : vector<48x96xf32>
    %63 = tpu.matmul %59, %62, %cst_24 {dimension_numbers = #tpu.dot_dimension_numbers<[1], [0], [0], [1], [0, 0, 1, 1], [], []>} : vector<48x32xf32>, vector<32x96xf32>, vector<48x96xf32> -> vector<48x96xf32>
    %c0_25 = arith.constant 0 : index
    %c0_26 = arith.constant 0 : index
    %c0_27 = arith.constant 0 : index
    %64 = vector.load %arg13[%c0_25, %c0_26, %c0_27] : memref<2x1x96xf32, #tpu.memory_space<vmem>>, vector<1x1x96xf32>
    %65 = vector.shape_cast %64 : vector<1x1x96xf32> to vector<1x96xf32>
    %66 = vector.broadcast %65 : vector<1x96xf32> to vector<48x96xf32>
    %67 = arith.addf %63, %66 : vector<48x96xf32>
    %68 = vector.extract_strided_slice %67 {offsets = [0, 0], sizes = [48, 32], strides = [1, 1]} : vector<48x96xf32> to vector<48x32xf32>
    %69 = vector.shape_cast %68 : vector<48x32xf32> to vector<6x8x32xf32>
    %70 = vector.extract_strided_slice %67 {offsets = [0, 32], sizes = [48, 32], strides = [1, 1]} : vector<48x96xf32> to vector<48x32xf32>
    %71 = vector.shape_cast %70 : vector<48x32xf32> to vector<6x8x32xf32>
    %72 = vector.extract_strided_slice %67 {offsets = [0, 64], sizes = [48, 32], strides = [1, 1]} : vector<48x96xf32> to vector<48x32xf32>
    %73 = vector.shape_cast %72 : vector<48x32xf32> to vector<6x8x32xf32>
    %c0_28 = arith.constant 0 : index
    %c0_29 = arith.constant 0 : index
    %c0_30 = arith.constant 0 : index
    %74 = vector.load %arg14[%c0_28, %c0_29, %c0_30] : memref<2x32x32xf32, #tpu.memory_space<vmem>>, vector<1x32x32xf32>
    %75 = vector.shape_cast %74 : vector<1x32x32xf32> to vector<32x32xf32>
    %76 = vector.extract_strided_slice %69 {offsets = [0, 0, 0], sizes = [6, 8, 16], strides = [1, 1, 1]} : vector<6x8x32xf32> to vector<6x8x16xf32>
    %77 = vector.extract_strided_slice %71 {offsets = [0, 0, 0], sizes = [6, 8, 16], strides = [1, 1, 1]} : vector<6x8x32xf32> to vector<6x8x16xf32>
    "tpu.trace_start"() <{level = 10 : i32, message = "bqd,bkd->bqk"}> : () -> ()
    %cst_31 = arith.constant dense<0.000000e+00> : vector<6x8x8xf32>
    %78 = tpu.matmul %76, %77, %cst_31 {dimension_numbers = #tpu.dot_dimension_numbers<[2], [2], [1], [1], [0, 0, 0, 1, 1, 1], [0], [0]>} : vector<6x8x16xf32>, vector<6x8x16xf32>, vector<6x8x8xf32> -> vector<6x8x8xf32>
    "tpu.trace_stop"() : () -> ()
    %79 = vector.broadcast %60 : vector<6x1x8xf32> to vector<6x8x8xf32>
    %80 = arith.addf %78, %79 : vector<6x8x8xf32>
    %cst_32 = arith.constant dense<0xFF800000> : vector<6x8xf32>
    %81 = vector.multi_reduction <maximumf>, %80, %cst_32 [2] : vector<6x8x8xf32> to vector<6x8xf32>
    %82 = vector.shape_cast %81 : vector<6x8xf32> to vector<6x8x1xf32>
    %83 = vector.broadcast %82 : vector<6x8x1xf32> to vector<6x8x8xf32>
    %84 = arith.subf %80, %83 : vector<6x8x8xf32>
    %85 = math.exp %84 : vector<6x8x8xf32>
    %cst_33 = arith.constant dense<0.000000e+00> : vector<6x8xf32>
    %86 = vector.multi_reduction <add>, %85, %cst_33 [2] : vector<6x8x8xf32> to vector<6x8xf32>
    %87 = vector.shape_cast %86 : vector<6x8xf32> to vector<6x8x1xf32>
    %88 = tpu.reciprocal %87 {approx = true} : vector<6x8x1xf32> -> vector<6x8x1xf32>
    %89 = vector.broadcast %88 : vector<6x8x1xf32> to vector<6x8x8xf32>
    %90 = arith.mulf %85, %89 : vector<6x8x8xf32>
    %91 = vector.extract_strided_slice %73 {offsets = [0, 0, 0], sizes = [6, 8, 16], strides = [1, 1, 1]} : vector<6x8x32xf32> to vector<6x8x16xf32>
    "tpu.trace_start"() <{level = 10 : i32, message = "bqk,bkd->bqd"}> : () -> ()
    %cst_34 = arith.constant dense<0.000000e+00> : vector<6x8x16xf32>
    %92 = tpu.matmul %90, %91, %cst_34 {dimension_numbers = #tpu.dot_dimension_numbers<[2], [1], [1], [2], [0, 0, 0, 1, 1, 2], [0], [0]>} : vector<6x8x8xf32>, vector<6x8x16xf32>, vector<6x8x16xf32> -> vector<6x8x16xf32>
    "tpu.trace_stop"() : () -> ()
    %93 = vector.shape_cast %92 : vector<6x8x16xf32> to vector<48x16xf32>
    %94 = vector.extract_strided_slice %75 {offsets = [0, 0], sizes = [16, 32], strides = [1, 1]} : vector<32x32xf32> to vector<16x32xf32>
    %cst_35 = arith.constant dense<0.000000e+00> : vector<48x32xf32>
    %95 = tpu.matmul %93, %94, %cst_35 {dimension_numbers = #tpu.dot_dimension_numbers<[1], [0], [0], [1], [0, 0, 1, 1], [], []>} : vector<48x16xf32>, vector<16x32xf32>, vector<48x32xf32> -> vector<48x32xf32>
    %96 = vector.extract_strided_slice %69 {offsets = [0, 0, 16], sizes = [6, 8, 16], strides = [1, 1, 1]} : vector<6x8x32xf32> to vector<6x8x16xf32>
    %97 = vector.extract_strided_slice %71 {offsets = [0, 0, 16], sizes = [6, 8, 16], strides = [1, 1, 1]} : vector<6x8x32xf32> to vector<6x8x16xf32>
    "tpu.trace_start"() <{level = 10 : i32, message = "bqd,bkd->bqk"}> : () -> ()
    %cst_36 = arith.constant dense<0.000000e+00> : vector<6x8x8xf32>
    %98 = tpu.matmul %96, %97, %cst_36 {dimension_numbers = #tpu.dot_dimension_numbers<[2], [2], [1], [1], [0, 0, 0, 1, 1, 1], [0], [0]>} : vector<6x8x16xf32>, vector<6x8x16xf32>, vector<6x8x8xf32> -> vector<6x8x8xf32>
    "tpu.trace_stop"() : () -> ()
    %99 = vector.broadcast %60 : vector<6x1x8xf32> to vector<6x8x8xf32>
    %100 = arith.addf %98, %99 : vector<6x8x8xf32>
    %cst_37 = arith.constant dense<0xFF800000> : vector<6x8xf32>
    %101 = vector.multi_reduction <maximumf>, %100, %cst_37 [2] : vector<6x8x8xf32> to vector<6x8xf32>
    %102 = vector.shape_cast %101 : vector<6x8xf32> to vector<6x8x1xf32>
    %103 = vector.broadcast %102 : vector<6x8x1xf32> to vector<6x8x8xf32>
    %104 = arith.subf %100, %103 : vector<6x8x8xf32>
    %105 = math.exp %104 : vector<6x8x8xf32>
    %cst_38 = arith.constant dense<0.000000e+00> : vector<6x8xf32>
    %106 = vector.multi_reduction <add>, %105, %cst_38 [2] : vector<6x8x8xf32> to vector<6x8xf32>
    %107 = vector.shape_cast %106 : vector<6x8xf32> to vector<6x8x1xf32>
    %108 = tpu.reciprocal %107 {approx = true} : vector<6x8x1xf32> -> vector<6x8x1xf32>
    %109 = vector.broadcast %108 : vector<6x8x1xf32> to vector<6x8x8xf32>
    %110 = arith.mulf %105, %109 : vector<6x8x8xf32>
    %111 = vector.extract_strided_slice %73 {offsets = [0, 0, 16], sizes = [6, 8, 16], strides = [1, 1, 1]} : vector<6x8x32xf32> to vector<6x8x16xf32>
    "tpu.trace_start"() <{level = 10 : i32, message = "bqk,bkd->bqd"}> : () -> ()
    %cst_39 = arith.constant dense<0.000000e+00> : vector<6x8x16xf32>
    %112 = tpu.matmul %110, %111, %cst_39 {dimension_numbers = #tpu.dot_dimension_numbers<[2], [1], [1], [2], [0, 0, 0, 1, 1, 2], [0], [0]>} : vector<6x8x8xf32>, vector<6x8x16xf32>, vector<6x8x16xf32> -> vector<6x8x16xf32>
    "tpu.trace_stop"() : () -> ()
    %113 = vector.shape_cast %112 : vector<6x8x16xf32> to vector<48x16xf32>
    %114 = vector.extract_strided_slice %75 {offsets = [16, 0], sizes = [16, 32], strides = [1, 1]} : vector<32x32xf32> to vector<16x32xf32>
    %cst_40 = arith.constant dense<0.000000e+00> : vector<48x32xf32>
    %115 = tpu.matmul %113, %114, %cst_40 {dimension_numbers = #tpu.dot_dimension_numbers<[1], [0], [0], [1], [0, 0, 1, 1], [], []>} : vector<48x16xf32>, vector<16x32xf32>, vector<48x32xf32> -> vector<48x32xf32>
    %116 = arith.addf %95, %115 : vector<48x32xf32>
    %c0_41 = arith.constant 0 : index
    %c0_42 = arith.constant 0 : index
    %c0_43 = arith.constant 0 : index
    %117 = vector.load %arg15[%c0_41, %c0_42, %c0_43] : memref<2x1x32xf32, #tpu.memory_space<vmem>>, vector<1x1x32xf32>
    %118 = vector.shape_cast %117 : vector<1x1x32xf32> to vector<1x32xf32>
    %119 = vector.broadcast %118 : vector<1x32xf32> to vector<48x32xf32>
    %120 = arith.addf %116, %119 : vector<48x32xf32>
    %121 = arith.addf %120, %59 : vector<48x32xf32>
    %c0_44 = arith.constant 0 : index
    %c0_45 = arith.constant 0 : index
    %c0_46 = arith.constant 0 : index
    %122 = vector.load %arg16[%c0_44, %c0_45, %c0_46] : memref<2x1x32xf32, #tpu.memory_space<vmem>>, vector<1x1x32xf32>
    %123 = vector.shape_cast %122 : vector<1x1x32xf32> to vector<1x32xf32>
    %c0_47 = arith.constant 0 : index
    %c0_48 = arith.constant 0 : index
    %c0_49 = arith.constant 0 : index
    %124 = vector.load %arg17[%c0_47, %c0_48, %c0_49] : memref<2x1x32xf32, #tpu.memory_space<vmem>>, vector<1x1x32xf32>
    %125 = vector.shape_cast %124 : vector<1x1x32xf32> to vector<1x32xf32>
    %cst_50 = arith.constant dense<0.000000e+00> : vector<48xf32>
    %126 = vector.multi_reduction <add>, %121, %cst_50 [1] : vector<48x32xf32> to vector<48xf32>
    %127 = vector.shape_cast %126 : vector<48xf32> to vector<48x1xf32>
    %cst_51 = arith.constant 3.200000e+01 : f32
    %128 = vector.broadcast %cst_51 : f32 to vector<48x1xf32>
    %129 = arith.divf %127, %128 : vector<48x1xf32>
    %130 = vector.broadcast %129 : vector<48x1xf32> to vector<48x32xf32>
    %131 = arith.subf %121, %130 : vector<48x32xf32>
    %132 = arith.mulf %131, %131 : vector<48x32xf32>
    %cst_52 = arith.constant dense<0.000000e+00> : vector<48xf32>
    %133 = vector.multi_reduction <add>, %132, %cst_52 [1] : vector<48x32xf32> to vector<48xf32>
    %134 = vector.shape_cast %133 : vector<48xf32> to vector<48x1xf32>
    %cst_53 = arith.constant 3.200000e+01 : f32
    %135 = vector.broadcast %cst_53 : f32 to vector<48x1xf32>
    %136 = arith.divf %134, %135 : vector<48x1xf32>
    %137 = vector.broadcast %129 : vector<48x1xf32> to vector<48x32xf32>
    %138 = arith.subf %121, %137 : vector<48x32xf32>
    %cst_54 = arith.constant 9.99999997E-7 : f32
    %139 = vector.broadcast %cst_54 : f32 to vector<48x1xf32>
    %140 = arith.addf %136, %139 : vector<48x1xf32>
    %141 = math.rsqrt %140 : vector<48x1xf32>
    %142 = vector.broadcast %141 : vector<48x1xf32> to vector<48x32xf32>
    %143 = arith.mulf %138, %142 : vector<48x32xf32>
    %144 = vector.broadcast %123 : vector<1x32xf32> to vector<48x32xf32>
    %145 = arith.mulf %143, %144 : vector<48x32xf32>
    %146 = vector.broadcast %125 : vector<1x32xf32> to vector<48x32xf32>
    %147 = arith.addf %145, %146 : vector<48x32xf32>
    %c0_55 = arith.constant 0 : index
    %c0_56 = arith.constant 0 : index
    %c0_57 = arith.constant 0 : index
    %148 = vector.load %arg18[%c0_55, %c0_56, %c0_57] : memref<2x32x64xf32, #tpu.memory_space<vmem>>, vector<1x32x64xf32>
    %149 = vector.shape_cast %148 : vector<1x32x64xf32> to vector<32x64xf32>
    %cst_58 = arith.constant dense<0.000000e+00> : vector<48x64xf32>
    %150 = tpu.matmul %147, %149, %cst_58 {dimension_numbers = #tpu.dot_dimension_numbers<[1], [0], [0], [1], [0, 0, 1, 1], [], []>} : vector<48x32xf32>, vector<32x64xf32>, vector<48x64xf32> -> vector<48x64xf32>
    %c0_59 = arith.constant 0 : index
    %c0_60 = arith.constant 0 : index
    %c0_61 = arith.constant 0 : index
    %151 = vector.load %arg19[%c0_59, %c0_60, %c0_61] : memref<2x1x64xf32, #tpu.memory_space<vmem>>, vector<1x1x64xf32>
    %152 = vector.shape_cast %151 : vector<1x1x64xf32> to vector<1x64xf32>
    %153 = vector.broadcast %152 : vector<1x64xf32> to vector<48x64xf32>
    %154 = arith.addf %150, %153 : vector<48x64xf32>
    %cst_62 = arith.constant 5.000000e-01 : f32
    %155 = vector.broadcast %cst_62 : f32 to vector<48x64xf32>
    %156 = arith.mulf %155, %154 : vector<48x64xf32>
    %cst_63 = arith.constant 4.471500e-02 : f32
    %157 = vector.broadcast %cst_63 : f32 to vector<48x64xf32>
    %158 = arith.mulf %157, %154 : vector<48x64xf32>
    %159 = arith.mulf %158, %154 : vector<48x64xf32>
    %160 = arith.mulf %159, %154 : vector<48x64xf32>
    %161 = arith.addf %154, %160 : vector<48x64xf32>
    %cst_64 = arith.constant 0.797884583 : f32
    %162 = vector.broadcast %cst_64 : f32 to vector<48x64xf32>
    %163 = arith.mulf %162, %161 : vector<48x64xf32>
    %164 = math.tanh %163 : vector<48x64xf32>
    %cst_65 = arith.constant 1.000000e+00 : f32
    %165 = vector.broadcast %cst_65 : f32 to vector<48x64xf32>
    %166 = arith.addf %165, %164 : vector<48x64xf32>
    %167 = arith.mulf %156, %166 : vector<48x64xf32>
    %c0_66 = arith.constant 0 : index
    %c0_67 = arith.constant 0 : index
    %c0_68 = arith.constant 0 : index
    %168 = vector.load %arg20[%c0_66, %c0_67, %c0_68] : memref<2x64x32xf32, #tpu.memory_space<vmem>>, vector<1x64x32xf32>
    %169 = vector.shape_cast %168 : vector<1x64x32xf32> to vector<64x32xf32>
    %cst_69 = arith.constant dense<0.000000e+00> : vector<48x32xf32>
    %170 = tpu.matmul %167, %169, %cst_69 {dimension_numbers = #tpu.dot_dimension_numbers<[1], [0], [0], [1], [0, 0, 1, 1], [], []>} : vector<48x64xf32>, vector<64x32xf32>, vector<48x32xf32> -> vector<48x32xf32>
    %c0_70 = arith.constant 0 : index
    %c0_71 = arith.constant 0 : index
    %c0_72 = arith.constant 0 : index
    %171 = vector.load %arg21[%c0_70, %c0_71, %c0_72] : memref<2x1x32xf32, #tpu.memory_space<vmem>>, vector<1x1x32xf32>
    %172 = vector.shape_cast %171 : vector<1x1x32xf32> to vector<1x32xf32>
    %173 = vector.broadcast %172 : vector<1x32xf32> to vector<48x32xf32>
    %174 = arith.addf %170, %173 : vector<48x32xf32>
    %175 = arith.addf %174, %147 : vector<48x32xf32>
    %c0_73 = arith.constant 0 : index
    %c0_74 = arith.constant 0 : index
    %c0_75 = arith.constant 0 : index
    %176 = vector.load %arg22[%c0_73, %c0_74, %c0_75] : memref<2x1x32xf32, #tpu.memory_space<vmem>>, vector<1x1x32xf32>
    %177 = vector.shape_cast %176 : vector<1x1x32xf32> to vector<1x32xf32>
    %c0_76 = arith.constant 0 : index
    %c0_77 = arith.constant 0 : index
    %c0_78 = arith.constant 0 : index
    %178 = vector.load %arg23[%c0_76, %c0_77, %c0_78] : memref<2x1x32xf32, #tpu.memory_space<vmem>>, vector<1x1x32xf32>
    %179 = vector.shape_cast %178 : vector<1x1x32xf32> to vector<1x32xf32>
    %cst_79 = arith.constant dense<0.000000e+00> : vector<48xf32>
    %180 = vector.multi_reduction <add>, %175, %cst_79 [1] : vector<48x32xf32> to vector<48xf32>
    %181 = vector.shape_cast %180 : vector<48xf32> to vector<48x1xf32>
    %cst_80 = arith.constant 3.200000e+01 : f32
    %182 = vector.broadcast %cst_80 : f32 to vector<48x1xf32>
    %183 = arith.divf %181, %182 : vector<48x1xf32>
    %184 = vector.broadcast %183 : vector<48x1xf32> to vector<48x32xf32>
    %185 = arith.subf %175, %184 : vector<48x32xf32>
    %186 = arith.mulf %185, %185 : vector<48x32xf32>
    %cst_81 = arith.constant dense<0.000000e+00> : vector<48xf32>
    %187 = vector.multi_reduction <add>, %186, %cst_81 [1] : vector<48x32xf32> to vector<48xf32>
    %188 = vector.shape_cast %187 : vector<48xf32> to vector<48x1xf32>
    %cst_82 = arith.constant 3.200000e+01 : f32
    %189 = vector.broadcast %cst_82 : f32 to vector<48x1xf32>
    %190 = arith.divf %188, %189 : vector<48x1xf32>
    %191 = vector.broadcast %183 : vector<48x1xf32> to vector<48x32xf32>
    %192 = arith.subf %175, %191 : vector<48x32xf32>
    %cst_83 = arith.constant 9.99999997E-7 : f32
    %193 = vector.broadcast %cst_83 : f32 to vector<48x1xf32>
    %194 = arith.addf %190, %193 : vector<48x1xf32>
    %195 = math.rsqrt %194 : vector<48x1xf32>
    %196 = vector.broadcast %195 : vector<48x1xf32> to vector<48x32xf32>
    %197 = arith.mulf %192, %196 : vector<48x32xf32>
    %198 = vector.broadcast %177 : vector<1x32xf32> to vector<48x32xf32>
    %199 = arith.mulf %197, %198 : vector<48x32xf32>
    %200 = vector.broadcast %179 : vector<1x32xf32> to vector<48x32xf32>
    %201 = arith.addf %199, %200 : vector<48x32xf32>
    %c1 = arith.constant 1 : index
    %c0_84 = arith.constant 0 : index
    %c0_85 = arith.constant 0 : index
    %202 = vector.load %arg12[%c1, %c0_84, %c0_85] : memref<2x32x96xf32, #tpu.memory_space<vmem>>, vector<1x32x96xf32>
    %203 = vector.shape_cast %202 : vector<1x32x96xf32> to vector<32x96xf32>
    %cst_86 = arith.constant dense<0.000000e+00> : vector<48x96xf32>
    %204 = tpu.matmul %201, %203, %cst_86 {dimension_numbers = #tpu.dot_dimension_numbers<[1], [0], [0], [1], [0, 0, 1, 1], [], []>} : vector<48x32xf32>, vector<32x96xf32>, vector<48x96xf32> -> vector<48x96xf32>
    %c1_87 = arith.constant 1 : index
    %c0_88 = arith.constant 0 : index
    %c0_89 = arith.constant 0 : index
    %205 = vector.load %arg13[%c1_87, %c0_88, %c0_89] : memref<2x1x96xf32, #tpu.memory_space<vmem>>, vector<1x1x96xf32>
    %206 = vector.shape_cast %205 : vector<1x1x96xf32> to vector<1x96xf32>
    %207 = vector.broadcast %206 : vector<1x96xf32> to vector<48x96xf32>
    %208 = arith.addf %204, %207 : vector<48x96xf32>
    %209 = vector.extract_strided_slice %208 {offsets = [0, 0], sizes = [48, 32], strides = [1, 1]} : vector<48x96xf32> to vector<48x32xf32>
    %210 = vector.shape_cast %209 : vector<48x32xf32> to vector<6x8x32xf32>
    %211 = vector.extract_strided_slice %208 {offsets = [0, 32], sizes = [48, 32], strides = [1, 1]} : vector<48x96xf32> to vector<48x32xf32>
    %212 = vector.shape_cast %211 : vector<48x32xf32> to vector<6x8x32xf32>
    %213 = vector.extract_strided_slice %208 {offsets = [0, 64], sizes = [48, 32], strides = [1, 1]} : vector<48x96xf32> to vector<48x32xf32>
    %214 = vector.shape_cast %213 : vector<48x32xf32> to vector<6x8x32xf32>
    %c1_90 = arith.constant 1 : index
    %c0_91 = arith.constant 0 : index
    %c0_92 = arith.constant 0 : index
    %215 = vector.load %arg14[%c1_90, %c0_91, %c0_92] : memref<2x32x32xf32, #tpu.memory_space<vmem>>, vector<1x32x32xf32>
    %216 = vector.shape_cast %215 : vector<1x32x32xf32> to vector<32x32xf32>
    %217 = vector.extract_strided_slice %210 {offsets = [0, 0, 0], sizes = [6, 8, 16], strides = [1, 1, 1]} : vector<6x8x32xf32> to vector<6x8x16xf32>
    %218 = vector.extract_strided_slice %212 {offsets = [0, 0, 0], sizes = [6, 8, 16], strides = [1, 1, 1]} : vector<6x8x32xf32> to vector<6x8x16xf32>
    "tpu.trace_start"() <{level = 10 : i32, message = "bqd,bkd->bqk"}> : () -> ()
    %cst_93 = arith.constant dense<0.000000e+00> : vector<6x8x8xf32>
    %219 = tpu.matmul %217, %218, %cst_93 {dimension_numbers = #tpu.dot_dimension_numbers<[2], [2], [1], [1], [0, 0, 0, 1, 1, 1], [0], [0]>} : vector<6x8x16xf32>, vector<6x8x16xf32>, vector<6x8x8xf32> -> vector<6x8x8xf32>
    "tpu.trace_stop"() : () -> ()
    %220 = vector.broadcast %60 : vector<6x1x8xf32> to vector<6x8x8xf32>
    %221 = arith.addf %219, %220 : vector<6x8x8xf32>
    %cst_94 = arith.constant dense<0xFF800000> : vector<6x8xf32>
    %222 = vector.multi_reduction <maximumf>, %221, %cst_94 [2] : vector<6x8x8xf32> to vector<6x8xf32>
    %223 = vector.shape_cast %222 : vector<6x8xf32> to vector<6x8x1xf32>
    %224 = vector.broadcast %223 : vector<6x8x1xf32> to vector<6x8x8xf32>
    %225 = arith.subf %221, %224 : vector<6x8x8xf32>
    %226 = math.exp %225 : vector<6x8x8xf32>
    %cst_95 = arith.constant dense<0.000000e+00> : vector<6x8xf32>
    %227 = vector.multi_reduction <add>, %226, %cst_95 [2] : vector<6x8x8xf32> to vector<6x8xf32>
    %228 = vector.shape_cast %227 : vector<6x8xf32> to vector<6x8x1xf32>
    %229 = tpu.reciprocal %228 {approx = true} : vector<6x8x1xf32> -> vector<6x8x1xf32>
    %230 = vector.broadcast %229 : vector<6x8x1xf32> to vector<6x8x8xf32>
    %231 = arith.mulf %226, %230 : vector<6x8x8xf32>
    %232 = vector.extract_strided_slice %214 {offsets = [0, 0, 0], sizes = [6, 8, 16], strides = [1, 1, 1]} : vector<6x8x32xf32> to vector<6x8x16xf32>
    "tpu.trace_start"() <{level = 10 : i32, message = "bqk,bkd->bqd"}> : () -> ()
    %cst_96 = arith.constant dense<0.000000e+00> : vector<6x8x16xf32>
    %233 = tpu.matmul %231, %232, %cst_96 {dimension_numbers = #tpu.dot_dimension_numbers<[2], [1], [1], [2], [0, 0, 0, 1, 1, 2], [0], [0]>} : vector<6x8x8xf32>, vector<6x8x16xf32>, vector<6x8x16xf32> -> vector<6x8x16xf32>
    "tpu.trace_stop"() : () -> ()
    %234 = vector.shape_cast %233 : vector<6x8x16xf32> to vector<48x16xf32>
    %235 = vector.extract_strided_slice %216 {offsets = [0, 0], sizes = [16, 32], strides = [1, 1]} : vector<32x32xf32> to vector<16x32xf32>
    %cst_97 = arith.constant dense<0.000000e+00> : vector<48x32xf32>
    %236 = tpu.matmul %234, %235, %cst_97 {dimension_numbers = #tpu.dot_dimension_numbers<[1], [0], [0], [1], [0, 0, 1, 1], [], []>} : vector<48x16xf32>, vector<16x32xf32>, vector<48x32xf32> -> vector<48x32xf32>
    %237 = vector.extract_strided_slice %210 {offsets = [0, 0, 16], sizes = [6, 8, 16], strides = [1, 1, 1]} : vector<6x8x32xf32> to vector<6x8x16xf32>
    %238 = vector.extract_strided_slice %212 {offsets = [0, 0, 16], sizes = [6, 8, 16], strides = [1, 1, 1]} : vector<6x8x32xf32> to vector<6x8x16xf32>
    "tpu.trace_start"() <{level = 10 : i32, message = "bqd,bkd->bqk"}> : () -> ()
    %cst_98 = arith.constant dense<0.000000e+00> : vector<6x8x8xf32>
    %239 = tpu.matmul %237, %238, %cst_98 {dimension_numbers = #tpu.dot_dimension_numbers<[2], [2], [1], [1], [0, 0, 0, 1, 1, 1], [0], [0]>} : vector<6x8x16xf32>, vector<6x8x16xf32>, vector<6x8x8xf32> -> vector<6x8x8xf32>
    "tpu.trace_stop"() : () -> ()
    %240 = vector.broadcast %60 : vector<6x1x8xf32> to vector<6x8x8xf32>
    %241 = arith.addf %239, %240 : vector<6x8x8xf32>
    %cst_99 = arith.constant dense<0xFF800000> : vector<6x8xf32>
    %242 = vector.multi_reduction <maximumf>, %241, %cst_99 [2] : vector<6x8x8xf32> to vector<6x8xf32>
    %243 = vector.shape_cast %242 : vector<6x8xf32> to vector<6x8x1xf32>
    %244 = vector.broadcast %243 : vector<6x8x1xf32> to vector<6x8x8xf32>
    %245 = arith.subf %241, %244 : vector<6x8x8xf32>
    %246 = math.exp %245 : vector<6x8x8xf32>
    %cst_100 = arith.constant dense<0.000000e+00> : vector<6x8xf32>
    %247 = vector.multi_reduction <add>, %246, %cst_100 [2] : vector<6x8x8xf32> to vector<6x8xf32>
    %248 = vector.shape_cast %247 : vector<6x8xf32> to vector<6x8x1xf32>
    %249 = tpu.reciprocal %248 {approx = true} : vector<6x8x1xf32> -> vector<6x8x1xf32>
    %250 = vector.broadcast %249 : vector<6x8x1xf32> to vector<6x8x8xf32>
    %251 = arith.mulf %246, %250 : vector<6x8x8xf32>
    %252 = vector.extract_strided_slice %214 {offsets = [0, 0, 16], sizes = [6, 8, 16], strides = [1, 1, 1]} : vector<6x8x32xf32> to vector<6x8x16xf32>
    "tpu.trace_start"() <{level = 10 : i32, message = "bqk,bkd->bqd"}> : () -> ()
    %cst_101 = arith.constant dense<0.000000e+00> : vector<6x8x16xf32>
    %253 = tpu.matmul %251, %252, %cst_101 {dimension_numbers = #tpu.dot_dimension_numbers<[2], [1], [1], [2], [0, 0, 0, 1, 1, 2], [0], [0]>} : vector<6x8x8xf32>, vector<6x8x16xf32>, vector<6x8x16xf32> -> vector<6x8x16xf32>
    "tpu.trace_stop"() : () -> ()
    %254 = vector.shape_cast %253 : vector<6x8x16xf32> to vector<48x16xf32>
    %255 = vector.extract_strided_slice %216 {offsets = [16, 0], sizes = [16, 32], strides = [1, 1]} : vector<32x32xf32> to vector<16x32xf32>
    %cst_102 = arith.constant dense<0.000000e+00> : vector<48x32xf32>
    %256 = tpu.matmul %254, %255, %cst_102 {dimension_numbers = #tpu.dot_dimension_numbers<[1], [0], [0], [1], [0, 0, 1, 1], [], []>} : vector<48x16xf32>, vector<16x32xf32>, vector<48x32xf32> -> vector<48x32xf32>
    %257 = arith.addf %236, %256 : vector<48x32xf32>
    %c1_103 = arith.constant 1 : index
    %c0_104 = arith.constant 0 : index
    %c0_105 = arith.constant 0 : index
    %258 = vector.load %arg15[%c1_103, %c0_104, %c0_105] : memref<2x1x32xf32, #tpu.memory_space<vmem>>, vector<1x1x32xf32>
    %259 = vector.shape_cast %258 : vector<1x1x32xf32> to vector<1x32xf32>
    %260 = vector.broadcast %259 : vector<1x32xf32> to vector<48x32xf32>
    %261 = arith.addf %257, %260 : vector<48x32xf32>
    %262 = arith.addf %261, %201 : vector<48x32xf32>
    %c1_106 = arith.constant 1 : index
    %c0_107 = arith.constant 0 : index
    %c0_108 = arith.constant 0 : index
    %263 = vector.load %arg16[%c1_106, %c0_107, %c0_108] : memref<2x1x32xf32, #tpu.memory_space<vmem>>, vector<1x1x32xf32>
    %264 = vector.shape_cast %263 : vector<1x1x32xf32> to vector<1x32xf32>
    %c1_109 = arith.constant 1 : index
    %c0_110 = arith.constant 0 : index
    %c0_111 = arith.constant 0 : index
    %265 = vector.load %arg17[%c1_109, %c0_110, %c0_111] : memref<2x1x32xf32, #tpu.memory_space<vmem>>, vector<1x1x32xf32>
    %266 = vector.shape_cast %265 : vector<1x1x32xf32> to vector<1x32xf32>
    %cst_112 = arith.constant dense<0.000000e+00> : vector<48xf32>
    %267 = vector.multi_reduction <add>, %262, %cst_112 [1] : vector<48x32xf32> to vector<48xf32>
    %268 = vector.shape_cast %267 : vector<48xf32> to vector<48x1xf32>
    %cst_113 = arith.constant 3.200000e+01 : f32
    %269 = vector.broadcast %cst_113 : f32 to vector<48x1xf32>
    %270 = arith.divf %268, %269 : vector<48x1xf32>
    %271 = vector.broadcast %270 : vector<48x1xf32> to vector<48x32xf32>
    %272 = arith.subf %262, %271 : vector<48x32xf32>
    %273 = arith.mulf %272, %272 : vector<48x32xf32>
    %cst_114 = arith.constant dense<0.000000e+00> : vector<48xf32>
    %274 = vector.multi_reduction <add>, %273, %cst_114 [1] : vector<48x32xf32> to vector<48xf32>
    %275 = vector.shape_cast %274 : vector<48xf32> to vector<48x1xf32>
    %cst_115 = arith.constant 3.200000e+01 : f32
    %276 = vector.broadcast %cst_115 : f32 to vector<48x1xf32>
    %277 = arith.divf %275, %276 : vector<48x1xf32>
    %278 = vector.broadcast %270 : vector<48x1xf32> to vector<48x32xf32>
    %279 = arith.subf %262, %278 : vector<48x32xf32>
    %cst_116 = arith.constant 9.99999997E-7 : f32
    %280 = vector.broadcast %cst_116 : f32 to vector<48x1xf32>
    %281 = arith.addf %277, %280 : vector<48x1xf32>
    %282 = math.rsqrt %281 : vector<48x1xf32>
    %283 = vector.broadcast %282 : vector<48x1xf32> to vector<48x32xf32>
    %284 = arith.mulf %279, %283 : vector<48x32xf32>
    %285 = vector.broadcast %264 : vector<1x32xf32> to vector<48x32xf32>
    %286 = arith.mulf %284, %285 : vector<48x32xf32>
    %287 = vector.broadcast %266 : vector<1x32xf32> to vector<48x32xf32>
    %288 = arith.addf %286, %287 : vector<48x32xf32>
    %c1_117 = arith.constant 1 : index
    %c0_118 = arith.constant 0 : index
    %c0_119 = arith.constant 0 : index
    %289 = vector.load %arg18[%c1_117, %c0_118, %c0_119] : memref<2x32x64xf32, #tpu.memory_space<vmem>>, vector<1x32x64xf32>
    %290 = vector.shape_cast %289 : vector<1x32x64xf32> to vector<32x64xf32>
    %cst_120 = arith.constant dense<0.000000e+00> : vector<48x64xf32>
    %291 = tpu.matmul %288, %290, %cst_120 {dimension_numbers = #tpu.dot_dimension_numbers<[1], [0], [0], [1], [0, 0, 1, 1], [], []>} : vector<48x32xf32>, vector<32x64xf32>, vector<48x64xf32> -> vector<48x64xf32>
    %c1_121 = arith.constant 1 : index
    %c0_122 = arith.constant 0 : index
    %c0_123 = arith.constant 0 : index
    %292 = vector.load %arg19[%c1_121, %c0_122, %c0_123] : memref<2x1x64xf32, #tpu.memory_space<vmem>>, vector<1x1x64xf32>
    %293 = vector.shape_cast %292 : vector<1x1x64xf32> to vector<1x64xf32>
    %294 = vector.broadcast %293 : vector<1x64xf32> to vector<48x64xf32>
    %295 = arith.addf %291, %294 : vector<48x64xf32>
    %cst_124 = arith.constant 5.000000e-01 : f32
    %296 = vector.broadcast %cst_124 : f32 to vector<48x64xf32>
    %297 = arith.mulf %296, %295 : vector<48x64xf32>
    %cst_125 = arith.constant 4.471500e-02 : f32
    %298 = vector.broadcast %cst_125 : f32 to vector<48x64xf32>
    %299 = arith.mulf %298, %295 : vector<48x64xf32>
    %300 = arith.mulf %299, %295 : vector<48x64xf32>
    %301 = arith.mulf %300, %295 : vector<48x64xf32>
    %302 = arith.addf %295, %301 : vector<48x64xf32>
    %cst_126 = arith.constant 0.797884583 : f32
    %303 = vector.broadcast %cst_126 : f32 to vector<48x64xf32>
    %304 = arith.mulf %303, %302 : vector<48x64xf32>
    %305 = math.tanh %304 : vector<48x64xf32>
    %cst_127 = arith.constant 1.000000e+00 : f32
    %306 = vector.broadcast %cst_127 : f32 to vector<48x64xf32>
    %307 = arith.addf %306, %305 : vector<48x64xf32>
    %308 = arith.mulf %297, %307 : vector<48x64xf32>
    %c1_128 = arith.constant 1 : index
    %c0_129 = arith.constant 0 : index
    %c0_130 = arith.constant 0 : index
    %309 = vector.load %arg20[%c1_128, %c0_129, %c0_130] : memref<2x64x32xf32, #tpu.memory_space<vmem>>, vector<1x64x32xf32>
    %310 = vector.shape_cast %309 : vector<1x64x32xf32> to vector<64x32xf32>
    %cst_131 = arith.constant dense<0.000000e+00> : vector<48x32xf32>
    %311 = tpu.matmul %308, %310, %cst_131 {dimension_numbers = #tpu.dot_dimension_numbers<[1], [0], [0], [1], [0, 0, 1, 1], [], []>} : vector<48x64xf32>, vector<64x32xf32>, vector<48x32xf32> -> vector<48x32xf32>
    %c1_132 = arith.constant 1 : index
    %c0_133 = arith.constant 0 : index
    %c0_134 = arith.constant 0 : index
    %312 = vector.load %arg21[%c1_132, %c0_133, %c0_134] : memref<2x1x32xf32, #tpu.memory_space<vmem>>, vector<1x1x32xf32>
    %313 = vector.shape_cast %312 : vector<1x1x32xf32> to vector<1x32xf32>
    %314 = vector.broadcast %313 : vector<1x32xf32> to vector<48x32xf32>
    %315 = arith.addf %311, %314 : vector<48x32xf32>
    %316 = arith.addf %315, %288 : vector<48x32xf32>
    %c1_135 = arith.constant 1 : index
    %c0_136 = arith.constant 0 : index
    %c0_137 = arith.constant 0 : index
    %317 = vector.load %arg22[%c1_135, %c0_136, %c0_137] : memref<2x1x32xf32, #tpu.memory_space<vmem>>, vector<1x1x32xf32>
    %318 = vector.shape_cast %317 : vector<1x1x32xf32> to vector<1x32xf32>
    %c1_138 = arith.constant 1 : index
    %c0_139 = arith.constant 0 : index
    %c0_140 = arith.constant 0 : index
    %319 = vector.load %arg23[%c1_138, %c0_139, %c0_140] : memref<2x1x32xf32, #tpu.memory_space<vmem>>, vector<1x1x32xf32>
    %320 = vector.shape_cast %319 : vector<1x1x32xf32> to vector<1x32xf32>
    %cst_141 = arith.constant dense<0.000000e+00> : vector<48xf32>
    %321 = vector.multi_reduction <add>, %316, %cst_141 [1] : vector<48x32xf32> to vector<48xf32>
    %322 = vector.shape_cast %321 : vector<48xf32> to vector<48x1xf32>
    %cst_142 = arith.constant 3.200000e+01 : f32
    %323 = vector.broadcast %cst_142 : f32 to vector<48x1xf32>
    %324 = arith.divf %322, %323 : vector<48x1xf32>
    %325 = vector.broadcast %324 : vector<48x1xf32> to vector<48x32xf32>
    %326 = arith.subf %316, %325 : vector<48x32xf32>
    %327 = arith.mulf %326, %326 : vector<48x32xf32>
    %cst_143 = arith.constant dense<0.000000e+00> : vector<48xf32>
    %328 = vector.multi_reduction <add>, %327, %cst_143 [1] : vector<48x32xf32> to vector<48xf32>
    %329 = vector.shape_cast %328 : vector<48xf32> to vector<48x1xf32>
    %cst_144 = arith.constant 3.200000e+01 : f32
    %330 = vector.broadcast %cst_144 : f32 to vector<48x1xf32>
    %331 = arith.divf %329, %330 : vector<48x1xf32>
    %332 = vector.broadcast %324 : vector<48x1xf32> to vector<48x32xf32>
    %333 = arith.subf %316, %332 : vector<48x32xf32>
    %cst_145 = arith.constant 9.99999997E-7 : f32
    %334 = vector.broadcast %cst_145 : f32 to vector<48x1xf32>
    %335 = arith.addf %331, %334 : vector<48x1xf32>
    %336 = math.rsqrt %335 : vector<48x1xf32>
    %337 = vector.broadcast %336 : vector<48x1xf32> to vector<48x32xf32>
    %338 = arith.mulf %333, %337 : vector<48x32xf32>
    %339 = vector.broadcast %318 : vector<1x32xf32> to vector<48x32xf32>
    %340 = arith.mulf %338, %339 : vector<48x32xf32>
    %341 = vector.broadcast %320 : vector<1x32xf32> to vector<48x32xf32>
    %342 = arith.addf %340, %341 : vector<48x32xf32>
    %c0_146 = arith.constant 0 : index
    %c0_147 = arith.constant 0 : index
    %343 = vector.load %arg24[%c0_146, %c0_147] : memref<32x1xf32, #tpu.memory_space<vmem>>, vector<32x1xf32>
    %cst_148 = arith.constant dense<0.000000e+00> : vector<48x1xf32>
    %344 = tpu.matmul %342, %343, %cst_148 {dimension_numbers = #tpu.dot_dimension_numbers<[1], [0], [0], [1], [0, 0, 1, 1], [], []>} : vector<48x32xf32>, vector<32x1xf32>, vector<48x1xf32> -> vector<48x1xf32>
    %c0_149 = arith.constant 0 : index
    %c0_150 = arith.constant 0 : index
    %345 = vector.load %arg4[%c0_149, %c0_150] : memref<6x48xf32, #tpu.memory_space<vmem>>, vector<6x48xf32>
    %cst_151 = arith.constant dense<0.000000e+00> : vector<6x1xf32>
    %346 = tpu.matmul %345, %344, %cst_151 {dimension_numbers = #tpu.dot_dimension_numbers<[1], [0], [0], [1], [0, 0, 1, 1], [], []>} : vector<6x48xf32>, vector<48x1xf32>, vector<6x1xf32> -> vector<6x1xf32>
    %c0_152 = arith.constant 0 : index
    %c0_153 = arith.constant 0 : index
    %347 = vector.load %arg25[%c0_152, %c0_153] : memref<1x1xf32, #tpu.memory_space<vmem>>, vector<1x1xf32>
    %348 = vector.broadcast %347 : vector<1x1xf32> to vector<6x1xf32>
    %349 = arith.addf %346, %348 : vector<6x1xf32>
    %c0_154 = arith.constant 0 : index
    %c0_155 = arith.constant 0 : index
    %350 = vector.load %arg5[%c0_154, %c0_155] : memref<2x6xf32, #tpu.memory_space<vmem>>, vector<2x6xf32>
    %c0_156 = arith.constant 0 : index
    %c0_157 = arith.constant 0 : index
    %351 = vector.load %arg6[%c0_156, %c0_157] : memref<6x3xf32, #tpu.memory_space<vmem>>, vector<6x3xf32>
    %352 = vector.broadcast %349 : vector<6x1xf32> to vector<6x3xf32>
    %353 = arith.mulf %352, %351 : vector<6x3xf32>
    %cst_158 = arith.constant dense<0.000000e+00> : vector<2x3xf32>
    %354 = tpu.matmul %350, %353, %cst_158 {dimension_numbers = #tpu.dot_dimension_numbers<[1], [0], [0], [1], [0, 0, 1, 1], [], []>} : vector<2x6xf32>, vector<6x3xf32>, vector<2x3xf32> -> vector<2x3xf32>
    %c0_159 = arith.constant 0 : index
    %c0_160 = arith.constant 0 : index
    %355 = vector.load %arg26[%c0_159, %c0_160] : memref<2x3xf32, #tpu.memory_space<vmem>>, vector<2x3xf32>
    tpu.vector_store %arg26[%c0_159, %c0_160], %354 {strides = array<i32>} : memref<2x3xf32, #tpu.memory_space<vmem>>, vector<2x3xf32>,
    %cst_161 = arith.constant dense<0xFF800000> : vector<2xf32>
    %356 = vector.multi_reduction <maximumf>, %354, %cst_161 [1] : vector<2x3xf32> to vector<2xf32>
    %357 = vector.shape_cast %356 : vector<2xf32> to vector<2x1xf32>
    %358 = vector.broadcast %357 : vector<2x1xf32> to vector<2x3xf32>
    %359 = arith.subf %354, %358 : vector<2x3xf32>
    %360 = math.exp %359 : vector<2x3xf32>
    %cst_162 = arith.constant dense<0.000000e+00> : vector<2xf32>
    %361 = vector.multi_reduction <add>, %360, %cst_162 [1] : vector<2x3xf32> to vector<2xf32>
    %362 = vector.shape_cast %361 : vector<2xf32> to vector<2x1xf32>
    %363 = math.log %362 : vector<2x1xf32>
    %364 = arith.addf %363, %357 : vector<2x1xf32>
    %365 = vector.broadcast %364 : vector<2x1xf32> to vector<2x3xf32>
    %366 = arith.subf %354, %365 : vector<2x3xf32>
    %c0_163 = arith.constant 0 : index
    %c0_164 = arith.constant 0 : index
    %367 = vector.load %arg3[%c0_163, %c0_164] : memref<2x3xf32, #tpu.memory_space<vmem>>, vector<2x3xf32>
    %368 = arith.mulf %366, %367 : vector<2x3xf32>
    %cst_165 = arith.constant dense<0.000000e+00> : vector<2xf32>
    %369 = vector.multi_reduction <add>, %368, %cst_165 [1] : vector<2x3xf32> to vector<2xf32>
    %370 = vector.shape_cast %369 : vector<2xf32> to vector<2x1xf32>
    %cst_166 = arith.constant 0.000000e+00 : f32
    %371 = vector.broadcast %cst_166 : f32 to vector<2x1xf32>
    %372 = arith.subf %371, %370 : vector<2x1xf32>
    %cst_167 = arith.constant dense<0.000000e+00> : vector<1xf32>
    %373 = vector.multi_reduction <add>, %372, %cst_167 [0] : vector<2x1xf32> to vector<1xf32>
    %374 = vector.shape_cast %373 : vector<1xf32> to vector<1x1xf32>
    %cst_168 = arith.constant 5.000000e-01 : f32
    %375 = vector.broadcast %cst_168 : f32 to vector<1x1xf32>
    %376 = arith.mulf %374, %375 : vector<1x1xf32>
    %c0_169 = arith.constant 0 : index
    %c0_170 = arith.constant 0 : index
    %377 = vector.load %arg27[%c0_169, %c0_170] : memref<1x1xf32, #tpu.memory_space<vmem>>, vector<1x1xf32>
    tpu.vector_store %arg27[%c0_169, %c0_170], %376 {strides = array<i32>} : memref<1x1xf32, #tpu.memory_space<vmem>>, vector<1x1xf32>,
    return
  }
}

</mosaic_0001>

<bundles_post_ra>
// kernel: multiple_choice_forward.1
= control target key start
LH: loop header
LB: loop body
LE: loop exit
PB: predicated region body
PF: predicated region fallthrough
CT: control target
= control target key end

     0   :  { %s9321_s0 = inlined_call_operand.vmem [shape: s32[48,1], index: 0, kind: input, shape index: {}]   ;;  %s9322_s1 = inlined_call_operand.vmem [shape: s32[48,1], index: 1, kind: input, shape index: {}]   ;;  %s9323_s2 = inlined_call_operand.vmem [shape: f32[6,1,8], index: 2, kind: input, shape index: {}]   ;;  %s9324_s3 = inlined_call_operand.vmem [shape: f32[2,3], index: 3, kind: input, shape index: {}]   ;;  %s9325_s4 = inlined_call_operand.vmem [shape: f32[6,48], index: 4, kind: input, shape index: {}]   ;;  %s9326_s5 = inlined_call_operand.vmem [shape: f32[2,6], index: 5, kind: input, shape index: {}]   ;;  %s9327_s6 = inlined_call_operand.vmem [shape: f32[6,3], index: 6, kind: input, shape index: {}]   ;;  %s9328_s7 = inlined_call_operand.vmem [shape: f32[64,32], index: 7, kind: input, shape index: {}]   ;;  %s9329_s8 = inlined_call_operand.vmem [shape: f32[8,32], index: 8, kind: input, shape index: {}]   ;;  %s9330_s9 = inlined_call_operand.vmem [shape: f32[3,32], index: 9, kind: input, shape index: {}]   ;;  %s9331_s10 = inlined_call_operand.vmem [shape: f32[1,32], index: 10, kind: input, shape index: {}]   ;;  %s9332_s11 = inlined_call_operand.vmem [shape: f32[1,32], index: 11, kind: input, shape index: {}]   ;;  %s9333_s12 = inlined_call_operand.vmem [shape: f32[2,32,96], index: 12, kind: input, shape index: {}]   ;;  %s9334_s13 = inlined_call_operand.vmem [shape: f32[2,1,96], index: 13, kind: input, shape index: {}]   ;;  %s9335_s14 = inlined_call_operand.vmem [shape: f32[2,32,32], index: 14, kind: input, shape index: {}]   ;;  %s9336_s15 = inlined_call_operand.vmem [shape: f32[2,1,32], index: 15, kind: input, shape index: {}]   ;;  %s9337_s16 = inlined_call_operand.vmem [shape: f32[2,1,32], index: 16, kind: input, shape index: {}]   ;;  %s9338_s17 = inlined_call_operand.vmem [shape: f32[2,1,32], index: 17, kind: input, shape index: {}]   ;;  %s9339_s18 = inlined_call_operand.vmem [shape: f32[2,32,64], index: 18, kind: input, shape index: {}]   ;;  %s9340_s19 = inlined_call_operand.vmem [shape: f32[2,1,64], index: 19, kind: input, shape index: {}]   ;;  %s9341_s20 = inlined_call_operand.vmem [shape: f32[2,64,32], index: 20, kind: input, shape index: {}]   ;;  %s9342_s21 = inlined_call_operand.vmem [shape: f32[2,1,32], index: 21, kind: input, shape index: {}]   ;;  %s9343_s22 = inlined_call_operand.vmem [shape: f32[2,1,32], index: 22, kind: input, shape index: {}]   ;;  %s9344_s23 = inlined_call_operand.vmem [shape: f32[2,1,32], index: 23, kind: input, shape index: {}]   ;;  %s9345_s24 = inlined_call_operand.vmem [shape: f32[32,1], index: 24, kind: input, shape index: {}]   ;;  %s9346_s25 = inlined_call_operand.<no memory space> [shape: f32[1,1], index: 25, kind: input, shape index: {}]   ;;  %s9347_s26 = inlined_call_operand.hbm [shape: f32[2,3], index: 26, kind: output, shape index: {0}]   ;;  %s9348_s27 = inlined_call_operand.hbm [shape: f32[1,1], index: 27, kind: output, shape index: {1}]  }
   0x1   :  { %9353 = sst [smem:[#allocation9_spill]] %s9321_s0  ;;  %v33_v0 = vstv %s9346_s25 }
   0x2   :  { %9354 = sst [smem:[#allocation10_spill]] %s9322_s1  ;;  %34 = vst [vmem:[#allocation2] sm:$0x1] %v33_v0 }
   0x3   :  { %9355 = sst [smem:[#allocation11_spill]] %s9323_s2 }
   0x4   :  { %9356 = sst [smem:[#allocation12_spill]] %s9324_s3 }
   0x5   :  { %9357 = sst [smem:[#allocation13_spill]] %s9325_s4 }
   0x6   :  { %9358 = sst [smem:[#allocation14_spill]] %s9326_s5 }
   0x7   :  { %9359 = sst [smem:[#allocation15_spill]] %s9327_s6 }
   0x8   :  { %9360 = sst [smem:[#allocation16_spill]] %s9328_s7 }
   0x9   :  { %9361 = sst [smem:[#allocation17_spill]] %s9329_s8 }
   0xa   :  { %9362 = sst [smem:[#allocation18_spill]] %s9330_s9 }
   0xb   :  { %9363 = sst [smem:[#allocation19_spill]] %s9331_s10 }
   0xc   :  { %9364 = sst [smem:[#allocation20_spill]] %s9332_s11 }
   0xd   :  { %35 = vsyncpa [#allocation4], 0  ;;  %s9365_s9 = sld [smem:[#allocation9_spill]]  ;;  %v7889_v3 = vmov 0   ;;  %s9366_s11 = sld [smem:[#allocation10_spill]] }
   0xe   :  { %7650 = vset.pattern.permute.xlu1 %v7889_v3  ;;  %7649 = vset.pattern.permute.xlu0 %v7889_v3  ;;  %s9367_s8 = sld [smem:[#allocation16_spill]] }
  0x13   :  { %v91_v1 = vld [vmem:[%s9365_s9 + $0x10] sm:$0xff]  ;;  %v89_v2 = vld [vmem:[%s9365_s9] sm:$0xff]  ;;  %v92_v4 = vld [vmem:[%s9365_s9 + $0x18] sm:$0xff] }
  0x14   :  { %104 = vperm.xlu1 %7650, %v91_v1   ;;  %98 = vperm.xlu0 %7649, %v89_v2   ;;  %v90_v5 = vld [vmem:[%s9365_s9 + $0x8] sm:$0xff]  ;;  %v141_v7 = vld [vmem:[%s9366_s11] sm:$0xff]  ;;  %v135_v10 = vld [vmem:[%s9367_s8 + $0x10] sm:$0xff] }
  0x15   :  { %v142_v6 = vld [vmem:[%s9366_s11 + $0x8] sm:$0xff]  ;;  %v133_v8 = vld [vmem:[%s9367_s8] sm:$0xff]  ;;  %v136_v11 = vld [vmem:[%s9367_s8 + $0x18] sm:$0xff]  ;;  %vm154_vm1 = vcmp.eq.s32.totalorder %v141_v7, 1 }
  0x16   :  { %v134_v9 = vld [vmem:[%s9367_s8 + $0x8] sm:$0xff]  ;;  %v93_v13 = vld [vmem:[%s9365_s9 + $0x20] sm:$0xff]  ;;  %vm155_vm0 = vcmp.eq.s32.totalorder %v142_v6, 1  ;;  %v7517_v15 = vpack.c.bf16 %v136_v11, %v135_v10 }
  0x17   :  { %v94_v12 = vld [vmem:[%s9365_s9 + $0x28] sm:$0xff]  ;;  %v7513_v14 = vpack.c.bf16 %v134_v9, %v133_v8 }
  0x18   :  { %107 = vperm.xlu1 %7650, %v92_v4   ;;  %101 = vperm.xlu0 %7649, %v90_v5  }
  0x19   :  { %36 = vsyncpa [#allocation6], 0  ;;  %v137_v16 = vld [vmem:[%s9367_s8 + $0x20] sm:$0xff]  ;;  %v138_v17 = vld [vmem:[%s9367_s8 + $0x28] sm:$0xff]  ;;  %v161_v18 = vsel %vm155_vm0, 1, %v7889_v3  ;;  %v160_v19 = vsel %vm154_vm1, 1, %v7889_v3  ;;  %7514 = vmatprep.subr.bf16.mxu0 %v7513_v14  ;;  %v95_v39 = vlaneseq }
  0x1a   :  { %vm149_vm2 = vcmp.eq.s32.totalorder %v142_v6, 0  ;;  %vm148_vm3 = vcmp.eq.s32.totalorder %v141_v7, 0  ;;  %7516 = vmatpush3.bf16.msra.mxu0 %v7513_v14  ;;  %v144_v20 = vld [vmem:[%s9366_s11 + $0x18] sm:$0xff]  ;;  %v143_v21 = vld [vmem:[%s9366_s11 + $0x10] sm:$0xff]  ;;  %v7521_v22 = vpack.c.bf16 %v138_v17, %v137_v16  ;;  %v146_v30 = vld [vmem:[%s9366_s11 + $0x28] sm:$0xff]  ;;  %v7890_v34 = vmov 0.0  }
  0x1b   :  { %7518 = vmatprep.subr.bf16.mxu0 %v7517_v15  ;;  %v139_v23 = vld [vmem:[%s9367_s8 + $0x30] sm:$0xff]  ;;  %v140_v24 = vld [vmem:[%s9367_s8 + $0x38] sm:$0xff]  ;;  %v205_v25 = vsel %vm149_vm2, 1, %v7889_v3  ;;  %v204_v26 = vsel %vm148_vm3, 1, %v7889_v3  ;;  %vm157_vm4 = vcmp.eq.s32.totalorder %v144_v20, 1  ;;  %vm156_vm5 = vcmp.eq.s32.totalorder %v143_v21, 1 }
  0x1c   :  { %113 = vperm.xlu1 %7650, %v94_v12   ;;  %110 = vperm.xlu0 %7649, %v93_v13   ;;  %v7525_v27 = vpack.c.bf16 %v140_v24, %v139_v23  ;;  %v163_v28 = vsel %vm157_vm4, 1, %v7889_v3  ;;  %v162_v29 = vsel %vm156_vm5, 1, %v7889_v3  ;;  %vm151_vm6 = vcmp.eq.s32.totalorder %v144_v20, 0  ;;  %v145_v31 = vld [vmem:[%s9366_s11 + $0x20] sm:$0xff]  ;;  %s9368_s4 = sld [smem:[#allocation18_spill]]  ;;  %s9369_s5 = sld [smem:[#allocation17_spill]] }
  0x1d   :  { %vm150_vm7 = vcmp.eq.s32.totalorder %v143_v21, 0  ;;  %v207_v32 = vsel %vm151_vm6, 1, %v7889_v3  ;;  %vm159_vm8 = vcmp.eq.s32.totalorder %v146_v30, 1  ;;  %vm158_vm9 = vcmp.eq.s32.totalorder %v145_v31, 1  ;;  %s9370_s11 = sld [smem:[#allocation19_spill]]  ;;  %s9371_s30 = sld [smem:[#allocation20_spill]] }
  0x1e   :  { %7520 = vmatpush3.bf16.msra.mxu0 %v7517_v15  ;;  %v206_v33 = vsel %vm150_vm7, 1, %v7889_v3  ;;  %v165_v35 = vsel %vm159_vm8, 1, %v7889_v3  ;;  %v164_v36 = vsel %vm158_vm9, 1, %v7889_v3  ;;  %vm153_vm10 = vcmp.eq.s32.totalorder %v146_v30, 0  ;;  %s7892_s28 = smov 96   ;;  %s7893_s0 = smov 64  }
  0x1f   :  { %7522 = vmatprep.subr.bf16.mxu0 %v7521_v22  ;;  %vm152_vm11 = vcmp.eq.s32.totalorder %v145_v31, 0  ;;  %v209_v37 = vsel %vm153_vm10, 1, %v7889_v3  ;;  %v96_v40 = vand.u32 127, %v95_v39  ;;  %vm244_vm12 = vcmask 523264   ;;  %s7894_s10 = smov 80   ;;  %s9372_s1 = sld [smem:[#allocation11_spill]] }
  0x20   :  { %170 = vperm.xlu1 %7650, %v161_v18   ;;  %167 = vperm.xlu0 %7649, %v160_v19   ;;  %v208_v38 = vsel %vm152_vm11, 1, %v7889_v3  ;;  %v191_v59 = vshrl.u32 %v95_v39, 7  ;;  %vm367_vm11 = vcmask 261120   ;;  %s7895_s25 = smov 112   ;;  %s7896_s29 = smov 48  }
  0x21   :  { %s9373_s3 = sld [smem:[#allocation13_spill]]  ;;  %s7898_s9 = smov [#allocation3]  }
  0x22   :  { %7524 = vmatpush3.bf16.msra.mxu0 %v7521_v22  ;;  %v192_v62 = vsub.s32 1, %v191_v59  ;;  %v196_v63 = vsub.s32 2, %v191_v59  ;;  %v147_v0 = vld [vmem:[%s9368_s4] sm:$0x7]  ;;  %v236_v1 = vsub.s32 0, %v191_v59 }
  0x23   :  { %7526 = vmatprep.subr.bf16.mxu0 %v7525_v27  ;;  %v358_v11 = vld [vmem:[%s9369_s5] sm:$0xff]  ;;  %s6584_s5 = sshll.u32 %s7898_s9, 4  ;;  %s6585_s5 = int_to_ptr.vmem [resolvable:$true] %s6584_s5 }
  0x24   :  { %214 = vperm.xlu1 %7650, %v205_v25   ;;  %211 = vperm.xlu0 %7649, %v204_v26   ;;  %v193_v2 = vrot.slane %v147_v0, %v192_v62  ;;  %v197_v3 = vrot.slane %v147_v0, %v196_v63  ;;  %v237_v5 = vrot.slane %v147_v0, %v236_v1  ;;  %p7846_p1 = scmp.lt.s32.totalorder %s6585_s5, %s6585_s5 }
  0x26   :  { %7528 = vmatpush3.bf16.msra.mxu0 %v7525_v27 }
  0x27   :  { %7093 = vmatprep.subr.mxu0 %v7890_v34 }
  0x28   :  { %176 = vperm.xlu1 %7650, %v163_v28   ;;  %173 = vperm.xlu0 %7649, %v162_v29  }
  0x2c   :  { %220 = vperm.xlu1 %7650, %v207_v32   ;;  %217 = vperm.xlu0 %7649, %v206_v33  }
  0x30   :  { %182 = vperm.xlu1 %7650, %v165_v35   ;;  %179 = vperm.xlu0 %7649, %v164_v36  }
  0x34   :  { %226 = vperm.xlu1 %7650, %v209_v37   ;;  %223 = vperm.xlu0 %7649, %v208_v38  }
  0x93   :  { %v105_v41 = vpop.permute.xlu1 %104  ;;  %v99_v42 = vpop.permute.xlu0 %98 }
  0x94   :  { %vm115_vm13 = vcmp.eq.s32.totalorder %v99_v42, %v96_v40  ;;  %vm117_vm14 = vcmp.eq.s32.totalorder %v105_v41, %v96_v40 }
  0x95   :  { %v6606_v43 = vsel %vm115_vm13, 1.0, %v7890_v34  ;;  %v6608_v46 = vsel %vm117_vm14, 1.0, %v7890_v34 }
  0x96   :  { %7057 = vmatprep.mubr.msk.f32.mxu0 %vm244_vm12, %v6606_v43 }
  0x97   :  { %v108_v44 = vpop.permute.xlu1 %107  ;;  %v102_v45 = vpop.permute.xlu0 %101 }
  0x98   :  { %vm116_vm15 = vcmp.eq.s32.totalorder %v102_v45, %v96_v40  ;;  %vm118_vm0 = vcmp.eq.s32.totalorder %v108_v44, %v96_v40 }
  0x99   :  { %v6607_v47 = vsel %vm116_vm15, 1.0, %v7890_v34  ;;  %v6609_v50 = vsel %vm118_vm0, 1.0, %v7890_v34 }
  0x9a   :  { %7058 = vmatmul.mubr.msk.f32.vlgmr.msra.gmra.mrb[0].mxu0 %vm244_vm12, %v6607_v47 }
  0x9b   :  { %v114_v48 = vpop.permute.xlu1 %113  ;;  %7060 = vmatprep.mubr.msk.f32.mxu0 %vm244_vm12, %v6608_v46  ;;  %v111_v49 = vpop.permute.xlu0 %110 }
  0x9c   :  { %vm119_vm1 = vcmp.eq.s32.totalorder %v111_v49, %v96_v40  ;;  %vm120_vm2 = vcmp.eq.s32.totalorder %v114_v48, %v96_v40 }
  0x9d   :  { %v6610_v51 = vsel %vm119_vm1, 1.0, %v7890_v34  ;;  %v6611_v52 = vsel %vm120_vm2, 1.0, %v7890_v34  ;;  %vm7891_vm1 = vmmov 0   ;;  %vm644_vm2 = vcmask 130048  }
  0x9e   :  { %7061 = vmatmul.mubr.msk.f32.gmra.mrb[2].mxu0 %vm244_vm12, %v6609_v50 }
  0x9f   :  { %7063 = vmatprep.mubr.msk.f32.mxu0 %vm244_vm12, %v6610_v51  ;;  %v171_v53 = vpop.permute.xlu1 %170  ;;  %v168_v54 = vpop.permute.xlu0 %167 }
  0xa0   :  { %vm185_vm3 = vcmp.eq.s32.totalorder %v171_v53, 1  ;;  %vm184_vm4 = vcmp.eq.s32.totalorder %v168_v54, 1 }
  0xa1   :  { %v199_v7 = vsel %vm185_vm3, %v193_v2, %v197_v3  ;;  %v198_v10 = vsel %vm184_vm4, %v193_v2, %v197_v3  ;;  %vm1104_vm3 = vcmask 64512   ;;  %vm6472_vm4 = vcmask 1045504  }
  0xa2   :  { %7064 = vmatmul.mubr.msk.f32.gmra.mrb[4].mxu0 %vm244_vm12, %v6611_v52 }
  0xa3   :  { %v215_v55 = vpop.permute.xlu1 %214  ;;  %v212_v56 = vpop.permute.xlu0 %211  ;;  %7095 = vmatprep.mubr.msk.f32.mxu0 %vm7891_vm1, %v7890_v34 }
  0xa4   :  { %vm229_vm5 = vcmp.eq.s32.totalorder %v215_v55, 1  ;;  %vm228_vm6 = vcmp.eq.s32.totalorder %v212_v56, 1 }
  0xa5   :  { %v239_v8 = vsel %vm229_vm5, %v237_v5, %v199_v7  ;;  %v238_v13 = vsel %vm228_vm6, %v237_v5, %v198_v10  ;;  %vm6468_vm5 = vcmask 48128   ;;  %vm6546_vm6 = vcmask 17408  }
  0xa7   :  { %v177_v57 = vpop.permute.xlu1 %176  ;;  %v174_v58 = vpop.permute.xlu0 %173 }
  0xa8   :  { %vm187_vm7 = vcmp.eq.s32.totalorder %v177_v57, 1  ;;  %vm186_vm8 = vcmp.eq.s32.totalorder %v174_v58, 1 }
  0xa9   :  { %v201_v18 = vsel %vm187_vm7, %v193_v2, %v197_v3  ;;  %v200_v19 = vsel %vm186_vm8, %v193_v2, %v197_v3 }
  0xab   :  { %v221_v60 = vpop.permute.xlu1 %220  ;;  %v218_v61 = vpop.permute.xlu0 %217 }
  0xac   :  { %vm231_vm9 = vcmp.eq.s32.totalorder %v221_v60, 1  ;;  %vm230_vm10 = vcmp.eq.s32.totalorder %v218_v61, 1 }
  0xad   :  { %v241_v21 = vsel %vm231_vm9, %v237_v5, %v201_v18  ;;  %v240_v23 = vsel %vm230_vm10, %v237_v5, %v200_v19 }
  0xaf   :  { %v183_v4 = vpop.permute.xlu1 %182  ;;  %v180_v6 = vpop.permute.xlu0 %179 }
  0xb0   :  { %vm189_vm13 = vcmp.eq.s32.totalorder %v183_v4, 1  ;;  %vm188_vm14 = vcmp.eq.s32.totalorder %v180_v6, 1 }
  0xb1   :  { %v203_v30 = vsel %vm189_vm13, %v193_v2, %v197_v3  ;;  %v202_v33 = vsel %vm188_vm14, %v193_v2, %v197_v3 }
  0xb3   :  { %v227_v15 = vpop.permute.xlu1 %226  ;;  %v224_v17 = vpop.permute.xlu0 %223 }
  0xb4   :  { %vm233_vm15 = vcmp.eq.s32.totalorder %v227_v15, 1  ;;  %vm232_vm0 = vcmp.eq.s32.totalorder %v224_v17, 1  ;;  %v480_v17 = vld [vmem:[%s9333_s12 + $0x18] sm:$0xff] }
  0xb5   :  { %v243_v31 = vsel %vm233_vm15, %v237_v5, %v203_v30  ;;  %v242_v37 = vsel %vm232_vm0, %v237_v5, %v202_v33 }
 0x16d   :  { %v7059_v9 = vpop.f32.mrb[0].mxu0 }
 0x16e   :  { %v335_v12 = vadd.f32 %v7059_v9, %v239_v8  ;;  %v329_v14 = vpop.f32.mrb[1].mxu0 }
 0x16f   :  { %v330_v16 = vadd.f32 %v329_v14, %v238_v13  ;;  %v477_v13 = vld [vmem:[%s9333_s12] sm:$0xff]  ;;  %v478_v14 = vld [vmem:[%s9333_s12 + $0x8] sm:$0xff] }
 0x170   :  { %v360_v20 = vadd.f32 %v358_v11, %v335_v12  ;;  %v7529_v15 = vpack.c.bf16 %v478_v14, %v477_v13 }
 0x171   :  { %v7062_v22 = vpop.f32.mrb[2].mxu0  ;;  %v359_v24 = vadd.f32 %v358_v11, %v330_v16  ;;  %v479_v16 = vld [vmem:[%s9333_s12 + $0x10] sm:$0xff] }
 0x172   :  { %v345_v25 = vadd.f32 %v7062_v22, %v241_v21  ;;  %v339_v26 = vpop.f32.mrb[3].mxu0  ;;  %v371_v27 = vsel %vm367_vm11, %v360_v20, 0.0  ;;  %7530 = vmatprep.subr.bf16.mxu1 %v7529_v15  ;;  %v7533_v18 = vpack.c.bf16 %v480_v17, %v479_v16 }
 0x173   :  { %v340_v28 = vadd.f32 %v339_v26, %v240_v23  ;;  %372 = vadd.xlane.f32.xlu1 %v371_v27  ;;  %v368_v29 = vsel %vm367_vm11, %v359_v24, 0.0  ;;  %7532 = vmatpush3.bf16.msra.mxu1 %v7529_v15 }
 0x174   :  { %369 = vadd.xlane.f32.xlu0 %v368_v29  ;;  %v362_v41 = vadd.f32 %v358_v11, %v345_v25  ;;  %7534 = vmatprep.subr.bf16.mxu1 %v7533_v18 }
 0x175   :  { %v7065_v32 = vpop.f32.mrb[4].mxu0  ;;  %v361_v35 = vadd.f32 %v358_v11, %v340_v28 }
 0x176   :  { %v355_v36 = vadd.f32 %v7065_v32, %v243_v31  ;;  %v349_v38 = vpop.f32.mrb[5].mxu0  ;;  %v377_v43 = vsel %vm367_vm11, %v362_v41, 0.0 }
 0x177   :  { %v350_v39 = vadd.f32 %v349_v38, %v242_v37  ;;  %v374_v40 = vsel %vm367_vm11, %v361_v35, 0.0  ;;  %7536 = vmatpush3.bf16.msra.mxu1 %v7533_v18  ;;  %v6618_v38 = vld [vmem:[%s9370_s11] ss:$0 sm:$0xff] }
 0x178   :  { %375 = vadd.xlane.f32.xlu0 %v374_v40  ;;  %v364_v45 = vadd.f32 %v358_v11, %v355_v36  ;;  %7083 = vmatprep.subr.mxu1 %v7890_v34 }
 0x179   :  { %v363_v42 = vadd.f32 %v358_v11, %v350_v39 }
 0x17a   :  { %v383_v46 = vsel %vm367_vm11, %v364_v45, 0.0 }
 0x17b   :  { %v380_v44 = vsel %vm367_vm11, %v363_v42, 0.0 }
 0x17c   :  { %378 = vadd.xlane.f32.xlu0 %v377_v43  ;;  %381 = vadd.xlane.f32.xlu1 %v380_v44  ;;  %v6619_v43 = vld [vmem:[%s9371_s30] ss:$0 sm:$0xff]  ;;  %s9376_s30 = sld [smem:[#allocation12_spill]] }
 0x180   :  { %384 = vadd.xlane.f32.xlu0 %v383_v46 }
 0x200   :  { %v373_v47 = vpop.xlane.xlu1 %372 }
 0x201   :  { %v388_v48 = vmul.f32 0.03125, %v373_v47  ;;  %v370_v49 = vpop.xlane.xlu0 %369 }
 0x202   :  { %v387_v50 = vmul.f32 0.03125, %v370_v49 }
 0x203   :  { %v8142_v51 = vsub.f32 %v360_v20, %v388_v48 }
 0x204   :  { %v8144_v52 = vsub.f32 %v359_v24, %v387_v50 }
 0x205   :  { %v376_v53 = vpop.xlane.xlu0 %375  ;;  %v400_v54 = vmul.f32 %v8142_v51, %v8142_v51 }
 0x206   :  { %v389_v55 = vmul.f32 0.03125, %v376_v53  ;;  %v399_v56 = vmul.f32 %v8144_v52, %v8144_v52 }
 0x207   :  { %v408_v57 = vsel %vm367_vm11, %v400_v54, 0.0 }
 0x208   :  { %v8151_v58 = vsub.f32 %v361_v35, %v389_v55  ;;  %409 = vadd.xlane.f32.xlu0 %v408_v57  ;;  %v405_v59 = vsel %vm367_vm11, %v399_v56, 0.0 }
 0x209   :  { %v382_v60 = vpop.xlane.xlu1 %381  ;;  %406 = vadd.xlane.f32.xlu1 %v405_v59  ;;  %v379_v61 = vpop.xlane.xlu0 %378 }
 0x20a   :  { %v391_v62 = vmul.f32 0.03125, %v382_v60  ;;  %v390_v63 = vmul.f32 0.03125, %v379_v61  ;;  %v401_v0 = vmul.f32 %v8151_v58, %v8151_v58 }
 0x20c   :  { %v8156_v1 = vsub.f32 %v363_v42, %v391_v62  ;;  %v8158_v2 = vsub.f32 %v362_v41, %v390_v63  ;;  %v411_v3 = vsel %vm367_vm11, %v401_v0, 0.0  ;;  %v6620_v0 = vld [vmem:[%s9334_s13] ss:$0 sm:$0xff] }
 0x20d   :  { %412 = vadd.xlane.f32.xlu1 %v411_v3  ;;  %v385_v4 = vpop.xlane.xlu0 %384 }
 0x20e   :  { %v392_v5 = vmul.f32 0.03125, %v385_v4  ;;  %v403_v6 = vmul.f32 %v8156_v1, %v8156_v1  ;;  %v402_v7 = vmul.f32 %v8158_v2, %v8158_v2 }
 0x210   :  { %v8165_v8 = vsub.f32 %v364_v45, %v392_v5  ;;  %v417_v9 = vsel %vm367_vm11, %v403_v6, 0.0  ;;  %v414_v10 = vsel %vm367_vm11, %v402_v7, 0.0 }
 0x211   :  { %418 = vadd.xlane.f32.xlu1 %v417_v9  ;;  %415 = vadd.xlane.f32.xlu0 %v414_v10 }
 0x212   :  { %v404_v11 = vmul.f32 %v8165_v8, %v8165_v8 }
 0x214   :  { %v420_v12 = vsel %vm367_vm11, %v404_v11, 0.0 }
 0x215   :  { %421 = vadd.xlane.f32.xlu0 %v420_v12 }
 0x295   :  { %v410_v19 = vpop.xlane.xlu0 %409 }
 0x296   :  { %v424_v20 = vmul.f32 0.03125, %v410_v19  ;;  %v407_v21 = vpop.xlane.xlu1 %406 }
 0x297   :  { %v423_v22 = vmul.f32 0.03125, %v407_v21  ;;  %v8309_v21 = vld [vmem:[%s9372_s1] ss:$0 sm:$0xff] }
 0x298   :  { %v430_v23 = vadd.f32 1e-06, %v424_v20 }
 0x299   :  { %v429_v24 = vadd.f32 1e-06, %v423_v22 }
 0x29a   :  { %7651 = vrsqrt.f32 %v430_v23  ;;  %v413_v25 = vpop.xlane.xlu1 %412 }
 0x29b   :  { %7653 = vrsqrt.f32 %v429_v24  ;;  %v425_v26 = vmul.f32 0.03125, %v413_v25  ;;  %v8315_v25 = vld [vmem:[%s9372_s1 + $0x1] ss:$0 sm:$0xff] }
 0x29d   :  { %v431_v27 = vadd.f32 1e-06, %v425_v26 }
 0x29e   :  { %v419_v28 = vpop.xlane.xlu1 %418  ;;  %v416_v29 = vpop.xlane.xlu0 %415 }
 0x29f   :  { %7655 = vrsqrt.f32 %v431_v27  ;;  %v427_v30 = vmul.f32 0.03125, %v419_v28  ;;  %v426_v31 = vmul.f32 0.03125, %v416_v29 }
 0x2a1   :  { %v433_v32 = vadd.f32 1e-06, %v427_v30  ;;  %v432_v33 = vadd.f32 1e-06, %v426_v31  ;;  %v8322_v30 = vld [vmem:[%s9372_s1 + $0x2] ss:$0 sm:$0xff] }
 0x2a2   :  { %v422_v35 = vpop.xlane.xlu0 %421 }
 0x2a3   :  { %7657 = vrsqrt.f32 %v433_v32  ;;  %v428_v36 = vmul.f32 0.03125, %v422_v35 }
 0x2a4   :  { %v7652_v37 = vpop.eup %7651  ;;  %7659 = vrsqrt.f32 %v432_v33 }
 0x2a5   :  { %v7654_v39 = vpop.eup %7653  ;;  %v434_v40 = vadd.f32 1e-06, %v428_v36  ;;  %v442_v41 = vmul.f32 %v7652_v37, %v8142_v51  ;;  %v8329_v36 = vld [vmem:[%s9372_s1 + $0x3] ss:$0 sm:$0xff]  ;;  %v8334_v37 = vld [vmem:[%s9372_s1 + $0x4] ss:$0 sm:$0xff] }
 0x2a6   :  { %v441_v42 = vmul.f32 %v7654_v39, %v8144_v52 }
 0x2a7   :  { %7661 = vrsqrt.f32 %v434_v40  ;;  %v454_v44 = vmul.f32 %v6618_v38, %v442_v41 }
 0x2a8   :  { %v453_v45 = vmul.f32 %v6618_v38, %v441_v42 }
 0x2a9   :  { %v7656_v46 = vpop.eup %7655  ;;  %v8196_v49 = vadd.f32 %v6619_v43, %v454_v44 }
 0x2aa   :  { %v8193_v47 = vadd.f32 %v6619_v43, %v453_v45  ;;  %v443_v48 = vmul.f32 %v7656_v46, %v8151_v58  ;;  %v8342_v45 = vld [vmem:[%s9372_s1 + $0x5] ss:$0 sm:$0xff] }
 0x2ac   :  { %7074 = vmatprep.mubr.msk.f32.mxu1 %vm367_vm11, %v8193_v47  ;;  %v455_v50 = vmul.f32 %v6618_v38, %v443_v48 }
 0x2ad   :  { %v7658_v51 = vpop.eup %7657  ;;  %7075 = vmatmul.mubr.msk.f32.vlgmr.msra.gmra.mrb[0].mxu1 %vm367_vm11, %v8196_v49 }
 0x2ae   :  { %v7660_v52 = vpop.eup %7659  ;;  %v8202_v53 = vadd.f32 %v6619_v43, %v455_v50  ;;  %v445_v54 = vmul.f32 %v7658_v51, %v8156_v1 }
 0x2af   :  { %v444_v55 = vmul.f32 %v7660_v52, %v8158_v2 }
 0x2b0   :  { %7077 = vmatprep.mubr.msk.f32.mxu1 %vm367_vm11, %v8202_v53  ;;  %v457_v56 = vmul.f32 %v6618_v38, %v445_v54 }
 0x2b1   :  { %v7662_v57 = vpop.eup %7661  ;;  %v456_v58 = vmul.f32 %v6618_v38, %v444_v55 }
 0x2b2   :  { %v8208_v59 = vadd.f32 %v6619_v43, %v457_v56  ;;  %v446_v60 = vmul.f32 %v7662_v57, %v8165_v8 }
 0x2b3   :  { %v8211_v61 = vadd.f32 %v6619_v43, %v456_v58 }
 0x2b4   :  { %v458_v62 = vmul.f32 %v6618_v38, %v446_v60 }
 0x2b5   :  { %7078 = vmatmul.mubr.msk.f32.gmra.mrb[2].mxu1 %vm367_vm11, %v8211_v61 }
 0x2b6   :  { %7080 = vmatprep.mubr.msk.f32.mxu1 %vm367_vm11, %v8208_v59  ;;  %v8217_v63 = vadd.f32 %v6619_v43, %v458_v62 }
 0x2b9   :  { %7081 = vmatmul.mubr.msk.f32.gmra.mrb[4].mxu1 %vm367_vm11, %v8217_v63 }
 0x2ba   :  { %7085 = vmatprep.mubr.msk.f32.mxu1 %vm7891_vm1, %v7890_v34 }
 0x380   :  { %v7076_v1 = vpop.f32.mrb[0].mxu1 }
 0x381   :  { %v8228_v2 = vadd.f32 %v7076_v1, %v6620_v0  ;;  %v572_v3 = vpop.f32.mrb[1].mxu1 }
 0x382   :  { %v8230_v4 = vadd.f32 %v6620_v0, %v572_v3 }
 0x383   :  { %720 = vrot.lane.b32.xlu0 %v8228_v2, %s7892_s28 }
 0x384   :  { %642 = vrot.lane.b32.xlu1 %v8230_v4, %s7892_s28 }
 0x388   :  { %v7079_v5 = vpop.f32.mrb[2].mxu1 }
 0x389   :  { %v582_v6 = vpop.f32.mrb[3].mxu1  ;;  %v8240_v10 = vadd.f32 %v7079_v5, %v6620_v0 }
 0x38a   :  { %v8236_v7 = vadd.f32 %v6620_v0, %v582_v6 }
 0x38c   :  { %797 = vrot.lane.b32.xlu1 %v8236_v7, %s7892_s28  ;;  %v7082_v8 = vpop.f32.mrb[4].mxu1 }
 0x38d   :  { %v592_v9 = vpop.f32.mrb[5].mxu1  ;;  %v8248_v12 = vadd.f32 %v7082_v8, %v6620_v0 }
 0x38e   :  { %v8242_v11 = vadd.f32 %v6620_v0, %v592_v9 }
 0x390   :  { %874 = vrot.lane.b32.xlu1 %v8240_v10, %s7892_s28  ;;  %951 = vrot.lane.b32.xlu0 %v8242_v11, %s7892_s28 }
 0x394   :  { %1028 = vrot.lane.b32.xlu1 %v8248_v12, %s7892_s28  ;;  %1247 = vrot.lane.b32.xlu0 %v8228_v2, %s7893_s0 }
 0x398   :  { %1171 = vrot.lane.b32.xlu1 %v8230_v4, %s7893_s0  ;;  %1629 = vrot.lane.b32.xlu0 %v8230_v4, %s7894_s10 }
 0x39c   :  { %1323 = vrot.lane.b32.xlu1 %v8236_v7, %s7893_s0  ;;  %1475 = vrot.lane.b32.xlu0 %v8242_v11, %s7893_s0 }
 0x3a0   :  { %1399 = vrot.lane.b32.xlu1 %v8240_v10, %s7893_s0 }
 0x3a4   :  { %1551 = vrot.lane.b32.xlu1 %v8248_v12, %s7893_s0 }
 0x3a8   :  { %1707 = vrot.lane.b32.xlu1 %v8228_v2, %s7894_s10 }
 0x3f5   :  { %v721_v14 = vpop.permute.xlu0 %720 }
 0x3f6   :  { %v643_v13 = vpop.permute.xlu1 %642 }
 0x3f7   :  { %7084 = vmatpush3.xpose.msk.msra.mxu1 %vm644_vm2, %v643_v13 }
 0x3f8   :  { %7088 = vmatprep.subr.mxu1 %v7890_v34 }
 0x3fa   :  { %7086 = vmatmul.mubr.msk.f32.vlgmr.msra.gmra.mrb[6].mxu1 %vm644_vm2, %v8230_v4 }
 0x3fb   :  { %7089 = vmatpush3.xpose.msk.msra.mxu1 %vm644_vm2, %v721_v14  ;;  %7090 = vmatprep.mubr.msk.f32.mxu1 %vm7891_vm1, %v7890_v34 }
 0x3fc   :  { %7098 = vmatprep.subr.mxu1 %v7890_v34 }
 0x3fe   :  { %v798_v15 = vpop.permute.xlu1 %797  ;;  %7091 = vmatmul.mubr.msk.f32.vlgmr.msra.gmra.mrb[8].mxu1 %vm644_vm2, %v8228_v2 }
 0x3ff   :  { %7094 = vmatpush3.xpose.msk.msra.mxu0 %vm644_vm2, %v798_v15  ;;  %7100 = vmatprep.mubr.msk.f32.mxu1 %vm7891_vm1, %v7890_v34 }
 0x400   :  { %7103 = vmatprep.subr.mxu0 %v7890_v34 }
 0x402   :  { %7096 = vmatmul.mubr.msk.f32.vlgmr.msra.gmra.mrb[6].mxu0 %vm644_vm2, %v8236_v7  ;;  %v875_v16 = vpop.permute.xlu1 %874  ;;  %v952_v17 = vpop.permute.xlu0 %951 }
 0x403   :  { %7099 = vmatpush3.xpose.msk.msra.mxu1 %vm644_vm2, %v875_v16  ;;  %7104 = vmatpush3.xpose.msk.msra.mxu0 %vm644_vm2, %v952_v17 }
 0x404   :  { %7105 = vmatprep.mubr.msk.f32.mxu0 %vm7891_vm1, %v7890_v34  ;;  %7108 = vmatprep.subr.mxu1 %v7890_v34 }
 0x405   :  { %7113 = vmatprep.subr.mxu0 %v7890_v34 }
 0x406   :  { %v1029_v18 = vpop.permute.xlu1 %1028  ;;  %7101 = vmatmul.mubr.msk.f32.vlgmr.msra.gmra.mrb[10].mxu1 %vm644_vm2, %v8240_v10  ;;  %7106 = vmatmul.mubr.msk.f32.vlgmr.msra.gmra.mrb[8].mxu0 %vm644_vm2, %v8242_v11  ;;  %v1248_v19 = vpop.permute.xlu0 %1247 }
 0x407   :  { %7109 = vmatpush3.xpose.msk.msra.mxu1 %vm644_vm2, %v1029_v18  ;;  %7110 = vmatprep.mubr.msk.f32.mxu1 %vm7891_vm1, %v7890_v34 }
 0x408   :  { %7118 = vmatprep.subr.mxu1 %v7890_v34  ;;  %7115 = vmatprep.mubr.msk.f32.mxu0 %vm7891_vm1, %v7890_v34 }
 0x40a   :  { %v1172_v20 = vpop.permute.xlu1 %1171  ;;  %7111 = vmatmul.mubr.msk.f32.vlgmr.msra.gmra.mrb[12].mxu1 %vm644_vm2, %v8248_v12  ;;  %v8356_v57 = vpop.permute.xlu0 %1629 }
 0x40b   :  { %7114 = vmatpush3.msra.mxu0 %v1172_v20  ;;  %7119 = vmatpush3.msra.mxu1 %v1248_v19 }
 0x40c   :  { %7123 = vmatprep.subr.mxu0 %v7890_v34  ;;  %7120 = vmatprep.mubr.msk.f32.mxu1 %vm7891_vm1, %v7890_v34 }
 0x40d   :  { %7128 = vmatprep.subr.mxu1 %v7890_v34 }
 0x40e   :  { %v8352_v55 = vpop.permute.xlu1 %1323  ;;  %v8360_v60 = vpop.permute.xlu0 %1475 }
 0x412   :  { %v8354_v56 = vpop.permute.xlu1 %1399 }
 0x416   :  { %v8358_v58 = vpop.permute.xlu1 %1551 }
 0x41a   :  { %v8362_v62 = vpop.permute.xlu1 %1707 }
 0x4cd   :  { %v715_v22 = vpop.f32.mrb[6].mxu1 }
 0x4ce   :  { %v716_v23 = vadd.f32 %v8309_v21, %v715_v22  ;;  %v7087_v24 = vpop.f32.mrb[7].mxu1 }
 0x4d0   :  { %v1105_v26 = vsel %vm1104_vm3, %v716_v23, -inf }
 0x4d1   :  { %1106 = vmax.xlane.f32.xlu0 %v1105_v26  ;;  %v792_v27 = vpop.f32.mrb[8].mxu1 }
 0x4d2   :  { %v793_v28 = vadd.f32 %v8315_v25, %v792_v27  ;;  %v7092_v29 = vpop.f32.mrb[9].mxu1 }
 0x4d4   :  { %v1108_v31 = vsel %vm1104_vm3, %v793_v28, -inf }
 0x4d5   :  { %v869_v32 = vpop.f32.mrb[6].mxu0  ;;  %1109 = vmax.xlane.f32.xlu1 %v1108_v31 }
 0x4d6   :  { %v870_v33 = vadd.f32 %v8322_v30, %v869_v32  ;;  %v7097_v35 = vpop.f32.mrb[7].mxu0 }
 0x4d8   :  { %v1111_v38 = vsel %vm1104_vm3, %v870_v33, -inf }
 0x4d9   :  { %1112 = vmax.xlane.f32.xlu0 %v1111_v38  ;;  %v946_v39 = vpop.f32.mrb[10].mxu1  ;;  %v1023_v40 = vpop.f32.mrb[8].mxu0 }
 0x4da   :  { %v947_v41 = vadd.f32 %v8329_v36, %v946_v39  ;;  %v1024_v42 = vadd.f32 %v8334_v37, %v1023_v40  ;;  %v7102_v43 = vpop.f32.mrb[11].mxu1  ;;  %v7107_v44 = vpop.f32.mrb[9].mxu0 }
 0x4dc   :  { %v1114_v46 = vsel %vm1104_vm3, %v947_v41, -inf  ;;  %v1117_v48 = vsel %vm1104_vm3, %v1024_v42, -inf }
 0x4dd   :  { %1115 = vmax.xlane.f32.xlu0 %v1114_v46  ;;  %v1100_v50 = vpop.f32.mrb[12].mxu1  ;;  %1118 = vmax.xlane.f32.xlu1 %v1117_v48 }
 0x4de   :  { %v1101_v51 = vadd.f32 %v8342_v45, %v1100_v50  ;;  %v7112_v52 = vpop.f32.mrb[13].mxu1 }
 0x4e0   :  { %v1120_v54 = vsel %vm1104_vm3, %v1101_v51, -inf }
 0x4e1   :  { %1121 = vmax.xlane.f32.xlu0 %v1120_v54 }
 0x4ee   :  { %1705 = vrot.lane.b32.xlu1 %v8228_v2, %s7895_s25 }
 0x4f7   :  { %1627 = vrot.lane.b32.xlu0 %v8230_v4, %s7895_s25 }
 0x55e   :  { %v1107_v0 = vpop.xlane.xlu0 %1106 }
 0x55f   :  { %v1123_v1 = vsub.f32 %v716_v23, %v1107_v0 }
 0x561   :  { %v1129_v3 = vmul.f32 1.442695, %v1123_v1 }
 0x562   :  { %v1110_v5 = vpop.xlane.xlu1 %1109 }
 0x563   :  { %7663 = vpow2.f32 %v1129_v3  ;;  %v1124_v6 = vsub.f32 %v793_v28, %v1110_v5 }
 0x565   :  { %v1131_v8 = vmul.f32 1.442695, %v1124_v6 }
 0x566   :  { %v1113_v9 = vpop.xlane.xlu0 %1112 }
 0x567   :  { %7665 = vpow2.f32 %v1131_v8  ;;  %v1125_v13 = vsub.f32 %v870_v33, %v1113_v9 }
 0x569   :  { %v1133_v14 = vmul.f32 1.442695, %v1125_v13 }
 0x56a   :  { %v1116_v15 = vpop.xlane.xlu0 %1115  ;;  %v1119_v28 = vpop.xlane.xlu1 %1118 }
 0x56b   :  { %7667 = vpow2.f32 %v1133_v14  ;;  %v1126_v16 = vsub.f32 %v947_v41, %v1116_v15  ;;  %v1127_v29 = vsub.f32 %v1024_v42, %v1119_v28 }
 0x56d   :  { %v7664_v17 = vpop.eup %7663  ;;  %v1135_v18 = vmul.f32 1.442695, %v1126_v16  ;;  %v1137_v32 = vmul.f32 1.442695, %v1127_v29 }
 0x56e   :  { %v1141_v19 = vsel %vm1104_vm3, %v7664_v17, 0.0  ;;  %v1122_v31 = vpop.xlane.xlu0 %1121  ;;  %v1706_v42 = vpop.permute.xlu1 %1705 }
 0x56f   :  { %1142 = vadd.xlane.f32.xlu1 %v1141_v19  ;;  %7669 = vpow2.f32 %v1135_v18  ;;  %v1128_v33 = vsub.f32 %v1101_v51, %v1122_v31 }
 0x570   :  { %7671 = vpow2.f32 %v1137_v32 }
 0x571   :  { %v7666_v20 = vpop.eup %7665  ;;  %v1139_v35 = vmul.f32 1.442695, %v1128_v33 }
 0x572   :  { %v1144_v22 = vsel %vm1104_vm3, %v7666_v20, 0.0  ;;  %v1628_v43 = vpop.permute.xlu0 %1627 }
 0x573   :  { %1145 = vadd.xlane.f32.xlu0 %v1144_v22  ;;  %7673 = vpow2.f32 %v1139_v35 }
 0x575   :  { %v7668_v23 = vpop.eup %7667 }
 0x576   :  { %v1147_v24 = vsel %vm1104_vm3, %v7668_v23, 0.0 }
 0x577   :  { %1148 = vadd.xlane.f32.xlu1 %v1147_v24 }
 0x579   :  { %v7670_v26 = vpop.eup %7669 }
 0x57a   :  { %v1150_v27 = vsel %vm1104_vm3, %v7670_v26, 0.0  ;;  %v7672_v38 = vpop.eup %7671 }
 0x57b   :  { %1151 = vadd.xlane.f32.xlu0 %v1150_v27  ;;  %v1153_v39 = vsel %vm1104_vm3, %v7672_v38, 0.0 }
 0x57d   :  { %v7674_v40 = vpop.eup %7673 }
 0x57e   :  { %v1156_v41 = vsel %vm1104_vm3, %v7674_v40, 0.0 }
 0x588   :  { %1863 = vrot.lane.b32.xlu1 %v8240_v10, %s7894_s10 }
 0x591   :  { %1785 = vrot.lane.b32.xlu0 %v8236_v7, %s7894_s10 }
 0x5ac   :  { %1154 = vadd.xlane.f32.xlu1 %v1153_v39 }
 0x5b0   :  { %1157 = vadd.xlane.f32.xlu0 %v1156_v41 }
 0x5bd   :  { %1861 = vrot.lane.b32.xlu1 %v8240_v10, %s7895_s25 }
 0x5c1   :  { %2019 = vrot.lane.b32.xlu1 %v8248_v12, %s7894_s10 }
 0x5c5   :  { %2017 = vrot.lane.b32.xlu1 %v8248_v12, %s7895_s25 }
 0x5c6   :  { %1783 = vrot.lane.b32.xlu0 %v8236_v7, %s7895_s25 }
 0x5ca   :  { %1941 = vrot.lane.b32.xlu0 %v8242_v11, %s7894_s10 }
 0x5ce   :  { %1939 = vrot.lane.b32.xlu0 %v8242_v11, %s7895_s25 }
 0x5fc   :  { %v1143_v44 = vpop.xlane.xlu1 %1142 }
 0x5fd   :  { %7675 = vrcp.f32 %v1143_v44 }
 0x600   :  { %v1146_v46 = vpop.xlane.xlu0 %1145 }
 0x601   :  { %7677 = vrcp.f32 %v1146_v46 }
 0x604   :  { %v1149_v48 = vpop.xlane.xlu1 %1148 }
 0x605   :  { %7679 = vrcp.f32 %v1149_v48 }
 0x607   :  { %v7676_v50 = vpop.eup %7675 }
 0x608   :  { %v1165_v51 = vmul.f32 %v7676_v50, %v7664_v17  ;;  %v1152_v52 = vpop.xlane.xlu0 %1151 }
 0x609   :  { %7681 = vrcp.f32 %v1152_v52 }
 0x60a   :  { %7116 = vmatmul.mubr.msk.f32.vlgmr.msra.gmra.mrb[10].mxu0 %vm1104_vm3, %v1165_v51 }
 0x60b   :  { %v7678_v54 = vpop.eup %7677  ;;  %7124 = vmatpush3.msra.mxu0 %v8352_v55  ;;  %7125 = vmatprep.mubr.msk.f32.mxu0 %vm7891_vm1, %v7890_v34 }
 0x60c   :  { %v1166_v0 = vmul.f32 %v7678_v54, %v7666_v20  ;;  %7133 = vmatprep.subr.mxu0 %v7890_v34  ;;  %v1786_v8 = vpop.permute.xlu0 %1785 }
 0x60e   :  { %7121 = vmatmul.mubr.msk.f32.vlgmr.msra.gmra.mrb[14].mxu1 %vm1104_vm3, %v1166_v0 }
 0x60f   :  { %v7680_v1 = vpop.eup %7679  ;;  %7129 = vmatpush3.msra.mxu1 %v8354_v56  ;;  %7130 = vmatprep.mubr.msk.f32.mxu1 %vm7891_vm1, %v7890_v34  ;;  %v1864_v56 = vpop.permute.xlu1 %1863 }
 0x610   :  { %v1167_v3 = vmul.f32 %v7680_v1, %v7668_v23  ;;  %7138 = vmatprep.subr.mxu1 %v7890_v34 }
 0x612   :  { %7126 = vmatmul.mubr.msk.f32.vlgmr.msra.gmra.mrb[12].mxu0 %vm1104_vm3, %v1167_v3 }
 0x613   :  { %7134 = vmatpush3.msra.mxu0 %v8360_v60  ;;  %7135 = vmatprep.mubr.msk.f32.mxu0 %vm7891_vm1, %v7890_v34  ;;  %v7682_v55 = vpop.eup %7681 }
 0x614   :  { %7143 = vmatprep.subr.mxu0 %v7890_v34  ;;  %v1168_v5 = vmul.f32 %v7682_v55, %v7670_v26 }
 0x616   :  { %7131 = vmatmul.mubr.msk.f32.vlgmr.msra.gmra.mrb[16].mxu1 %vm1104_vm3, %v1168_v5 }
 0x617   :  { %7139 = vmatpush3.msra.mxu1 %v8358_v58  ;;  %7140 = vmatprep.mubr.msk.f32.mxu1 %vm7891_vm1, %v7890_v34 }
 0x618   :  { %7148 = vmatprep.subr.mxu1 %v7890_v34 }
 0x639   :  { %v1155_v6 = vpop.xlane.xlu1 %1154 }
 0x63a   :  { %7683 = vrcp.f32 %v1155_v6 }
 0x63d   :  { %v1158_v60 = vpop.xlane.xlu0 %1157  ;;  %v1862_v16 = vpop.permute.xlu1 %1861 }
 0x63e   :  { %7685 = vrcp.f32 %v1158_v60 }
 0x641   :  { %v1784_v14 = vpop.permute.xlu0 %1783 }
 0x644   :  { %v7684_v9 = vpop.eup %7683 }
 0x645   :  { %v1169_v13 = vmul.f32 %v7684_v9, %v7672_v38  ;;  %v1942_v17 = vpop.permute.xlu0 %1941 }
 0x647   :  { %7136 = vmatmul.mubr.msk.f32.vlgmr.msra.gmra.mrb[14].mxu0 %vm1104_vm3, %v1169_v13 }
 0x648   :  { %7144 = vmatpush3.xpose.msk.msra.mxu0 %vm644_vm2, %v8356_v57  ;;  %7145 = vmatprep.mubr.msk.f32.mxu0 %vm7891_vm1, %v7890_v34  ;;  %v7686_v58 = vpop.eup %7685  ;;  %v2020_v57 = vpop.permute.xlu1 %2019 }
 0x649   :  { %7153 = vmatprep.subr.mxu0 %v7890_v34  ;;  %v1170_v15 = vmul.f32 %v7686_v58, %v7674_v40 }
 0x64b   :  { %7146 = vmatmul.mubr.msk.f32.vlgmr.msra.gmra.mrb[16].mxu0 %vm644_vm2, %v1628_v43  ;;  %7141 = vmatmul.mubr.msk.f32.vlgmr.msra.gmra.mrb[18].mxu1 %vm1104_vm3, %v1170_v15 }
 0x64c   :  { %7154 = vmatpush3.xpose.msk.msra.mxu0 %vm644_vm2, %v1786_v8  ;;  %7149 = vmatpush3.xpose.msk.msra.mxu1 %vm644_vm2, %v8362_v62  ;;  %v1940_v62 = vpop.permute.xlu0 %1939  ;;  %v2018_v18 = vpop.permute.xlu1 %2017 }
 0x64d   :  { %7150 = vmatprep.mubr.msk.f32.mxu1 %vm7891_vm1, %v7890_v34  ;;  %7155 = vmatprep.mubr.msk.f32.mxu0 %vm7891_vm1, %v7890_v34 }
 0x64e   :  { %7158 = vmatprep.subr.mxu1 %v7890_v34  ;;  %7163 = vmatprep.subr.mxu0 %v7890_v34 }
 0x64f   :  { %7156 = vmatmul.mubr.msk.f32.vlgmr.msra.gmra.mrb[18].mxu0 %vm644_vm2, %v1784_v14  ;;  %7151 = vmatmul.mubr.msk.f32.vlgmr.msra.gmra.mrb[20].mxu1 %vm644_vm2, %v1706_v42 }
 0x650   :  { %7164 = vmatpush3.xpose.msk.msra.mxu0 %vm644_vm2, %v1942_v17  ;;  %7159 = vmatpush3.xpose.msk.msra.mxu1 %vm644_vm2, %v1864_v56 }
 0x651   :  { %7160 = vmatprep.mubr.msk.f32.mxu1 %vm7891_vm1, %v7890_v34  ;;  %7165 = vmatprep.mubr.msk.f32.mxu0 %vm7891_vm1, %v7890_v34 }
 0x652   :  { %7168 = vmatprep.subr.mxu1 %v7890_v34  ;;  %7173 = vmatprep.subr.mxu0 %v7890_v34 }
 0x653   :  { %7166 = vmatmul.mubr.msk.f32.vlgmr.msra.gmra.mrb[20].mxu0 %vm644_vm2, %v1940_v62  ;;  %7161 = vmatmul.mubr.msk.f32.vlgmr.msra.gmra.mrb[22].mxu1 %vm644_vm2, %v1862_v16 }
 0x654   :  { %7175 = vmatprep.mubr.msk.f32.mxu0 %vm7891_vm1, %v7890_v34  ;;  %7169 = vmatpush3.xpose.msk.msra.mxu1 %vm644_vm2, %v2020_v57 }
 0x655   :  { %7170 = vmatprep.mubr.msk.f32.mxu1 %vm7891_vm1, %v7890_v34  ;;  %7178 = vmatprep.subr.mxu1 %v7890_v34 }
 0x657   :  { %7171 = vmatmul.mubr.msk.f32.vlgmr.msra.gmra.mrb[24].mxu1 %vm644_vm2, %v2018_v18 }
 0x658   :  { %7180 = vmatprep.mubr.msk.f32.mxu1 %vm7891_vm1, %v7890_v34 }
 0x6dd   :  { %v8444_v19 = vpop.f32.mrb[10].mxu0 }
 0x6de   :  { %v7117_v20 = vpop.f32.mrb[11].mxu0 }
 0x6e1   :  { %v8446_v22 = vpop.f32.mrb[14].mxu1 }
 0x6e2   :  { %v7122_v23 = vpop.f32.mrb[15].mxu1 }
 0x6e5   :  { %v8448_v24 = vpop.f32.mrb[12].mxu0 }
 0x6e6   :  { %v7127_v26 = vpop.f32.mrb[13].mxu0 }
 0x6e9   :  { %v8450_v27 = vpop.f32.mrb[16].mxu1 }
 0x6ea   :  { %v7132_v28 = vpop.f32.mrb[17].mxu1 }
 0x71a   :  { %v8452_v29 = vpop.f32.mrb[14].mxu0 }
 0x71b   :  { %v7137_v31 = vpop.f32.mrb[15].mxu0 }
 0x71e   :  { %v1701_v32 = vpop.f32.mrb[16].mxu0  ;;  %v8454_v33 = vpop.f32.mrb[18].mxu1 }
 0x71f   :  { %v1702_v35 = vadd.f32 %v8309_v21, %v1701_v32  ;;  %v7147_v38 = vpop.f32.mrb[17].mxu0  ;;  %v7142_v39 = vpop.f32.mrb[19].mxu1 }
 0x721   :  { %v2095_v40 = vsel %vm1104_vm3, %v1702_v35, -inf }
 0x722   :  { %2096 = vmax.xlane.f32.xlu0 %v2095_v40  ;;  %v1857_v41 = vpop.f32.mrb[18].mxu0  ;;  %v1779_v42 = vpop.f32.mrb[20].mxu1 }
 0x723   :  { %v1858_v43 = vadd.f32 %v8322_v30, %v1857_v41  ;;  %v7157_v44 = vpop.f32.mrb[19].mxu0  ;;  %v1780_v46 = vadd.f32 %v8315_v25, %v1779_v42  ;;  %v7152_v48 = vpop.f32.mrb[21].mxu1 }
 0x725   :  { %v2101_v50 = vsel %vm1104_vm3, %v1858_v43, -inf  ;;  %v2098_v51 = vsel %vm1104_vm3, %v1780_v46, -inf }
 0x726   :  { %2102 = vmax.xlane.f32.xlu0 %v2101_v50  ;;  %v2013_v52 = vpop.f32.mrb[20].mxu0  ;;  %2099 = vmax.xlane.f32.xlu1 %v2098_v51  ;;  %v1935_v21 = vpop.f32.mrb[22].mxu1 }
 0x727   :  { %v2014_v54 = vadd.f32 %v8334_v37, %v2013_v52  ;;  %v7167_v0 = vpop.f32.mrb[21].mxu0  ;;  %v1936_v1 = vadd.f32 %v8329_v36, %v1935_v21  ;;  %v7162_v3 = vpop.f32.mrb[23].mxu1 }
 0x729   :  { %v2107_v30 = vsel %vm1104_vm3, %v2014_v54, -inf  ;;  %v2104_v55 = vsel %vm1104_vm3, %v1936_v1, -inf }
 0x72a   :  { %v2091_v25 = vpop.f32.mrb[24].mxu1  ;;  %2105 = vmax.xlane.f32.xlu0 %v2104_v55  ;;  %2108 = vmax.xlane.f32.xlu1 %v2107_v30 }
 0x72b   :  { %v2092_v5 = vadd.f32 %v8342_v45, %v2091_v25  ;;  %v7172_v56 = vpop.f32.mrb[25].mxu1 }
 0x72d   :  { %v2110_v6 = vsel %vm1104_vm3, %v2092_v5, -inf }
 0x72e   :  { %2111 = vmax.xlane.f32.xlu0 %v2110_v6 }
 0x73b   :  { %2161 = vrot.lane.b32.xlu1 %v8230_v4, %s7896_s29 }
 0x73f   :  { %2313 = vrot.lane.b32.xlu1 %v8236_v7, %s7896_s29 }
 0x743   :  { %2389 = vrot.lane.b32.xlu1 %v8240_v10, %s7896_s29 }
 0x744   :  { %2237 = vrot.lane.b32.xlu0 %v8228_v2, %s7896_s29 }
 0x7af   :  { %v2097_v36 = vpop.xlane.xlu0 %2096 }
 0x7b0   :  { %v2113_v37 = vsub.f32 %v1702_v35, %v2097_v36 }
 0x7b2   :  { %v2119_v45 = vmul.f32 1.442695, %v2113_v37 }
 0x7b3   :  { %v2103_v8 = vpop.xlane.xlu0 %2102  ;;  %v2100_v60 = vpop.xlane.xlu1 %2099 }
 0x7b4   :  { %7687 = vpow2.f32 %v2119_v45  ;;  %v2115_v9 = vsub.f32 %v1858_v43, %v2103_v8  ;;  %v2114_v13 = vsub.f32 %v1780_v46, %v2100_v60  ;;  %v603_v8 = vld [vmem:[%s9335_s14 + $0x10] sm:$0xff]  ;;  %v604_v60 = vld [vmem:[%s9335_s14 + $0x18] sm:$0xff] }
 0x7b6   :  { %v2123_v14 = vmul.f32 1.442695, %v2115_v9  ;;  %v2121_v58 = vmul.f32 1.442695, %v2114_v13  ;;  %v7537_v9 = vpack.c.bf16 %v604_v60, %v603_v8  ;;  %v601_v13 = vld [vmem:[%s9335_s14] sm:$0xff] }
 0x7b7   :  { %v2109_v4 = vpop.xlane.xlu1 %2108  ;;  %v2106_v15 = vpop.xlane.xlu0 %2105 }
 0x7b8   :  { %7689 = vpow2.f32 %v2123_v14  ;;  %v2117_v7 = vsub.f32 %v2014_v54, %v2109_v4  ;;  %v2116_v16 = vsub.f32 %v1936_v1, %v2106_v15  ;;  %v602_v14 = vld [vmem:[%s9335_s14 + $0x8] sm:$0xff] }
 0x7b9   :  { %7691 = vpow2.f32 %v2121_v58  ;;  %v7541_v58 = vpack.c.bf16 %v602_v14, %v601_v13 }
 0x7ba   :  { %v2127_v10 = vmul.f32 1.442695, %v2117_v7  ;;  %v2125_v17 = vmul.f32 1.442695, %v2116_v16 }
 0x7bb   :  { %v2162_v57 = vpop.permute.xlu1 %2161  ;;  %v2112_v2 = vpop.xlane.xlu0 %2111 }
 0x7bc   :  { %7693 = vpow2.f32 %v2127_v10  ;;  %v2118_v62 = vsub.f32 %v2092_v5, %v2112_v2  ;;  %7174 = vmatpush3.msra.mxu0 %v2162_v57 }
 0x7bd   :  { %7695 = vpow2.f32 %v2125_v17  ;;  %7183 = vmatprep.subr.mxu0 %v7890_v34 }
 0x7be   :  { %v7688_v18 = vpop.eup %7687  ;;  %v2129_v20 = vmul.f32 1.442695, %v2118_v62 }
 0x7bf   :  { %v2131_v23 = vsel %vm1104_vm3, %v7688_v18, 0.0  ;;  %v2238_v26 = vpop.permute.xlu0 %2237  ;;  %v2314_v44 = vpop.permute.xlu1 %2313 }
 0x7c0   :  { %2132 = vadd.xlane.f32.xlu1 %v2131_v23  ;;  %7697 = vpow2.f32 %v2129_v20  ;;  %7179 = vmatpush3.msra.mxu1 %v2238_v26  ;;  %v6681_v26 = vld [vmem:[%s9336_s15] ss:$0 sm:$0xff] }
 0x7c1   :  { %7188 = vmatprep.subr.mxu1 %v7890_v34 }
 0x7c2   :  { %v7690_v28 = vpop.eup %7689 }
 0x7c3   :  { %v7692_v31 = vpop.eup %7691  ;;  %v2137_v32 = vsel %vm1104_vm3, %v7690_v28, 0.0  ;;  %v2390_v46 = vpop.permute.xlu1 %2389 }
 0x7c4   :  { %v2134_v35 = vsel %vm1104_vm3, %v7692_v31, 0.0  ;;  %2138 = vadd.xlane.f32.xlu1 %v2137_v32 }
 0x7c5   :  { %2135 = vadd.xlane.f32.xlu0 %v2134_v35 }
 0x7c6   :  { %v7694_v38 = vpop.eup %7693 }
 0x7c7   :  { %v7696_v39 = vpop.eup %7695  ;;  %v2143_v40 = vsel %vm1104_vm3, %v7694_v38, 0.0 }
 0x7c8   :  { %2144 = vadd.xlane.f32.xlu1 %v2143_v40  ;;  %v2140_v41 = vsel %vm1104_vm3, %v7696_v39, 0.0 }
 0x7c9   :  { %2141 = vadd.xlane.f32.xlu0 %v2140_v41 }
 0x7ca   :  { %v7698_v42 = vpop.eup %7697 }
 0x7cb   :  { %v2146_v43 = vsel %vm1104_vm3, %v7698_v42, 0.0 }
 0x7cd   :  { %2147 = vadd.xlane.f32.xlu0 %v2146_v43 }
 0x7d9   :  { %2541 = vrot.lane.b32.xlu1 %v8248_v12, %s7896_s29 }
 0x7e3   :  { %2465 = vrot.lane.b32.xlu0 %v8242_v11, %s7896_s29 }
 0x84d   :  { %v2133_v48 = vpop.xlane.xlu1 %2132 }
 0x84e   :  { %7699 = vrcp.f32 %v2133_v48 }
 0x851   :  { %v2139_v50 = vpop.xlane.xlu1 %2138 }
 0x852   :  { %7701 = vrcp.f32 %v2139_v50  ;;  %v2136_v51 = vpop.xlane.xlu0 %2135 }
 0x853   :  { %7703 = vrcp.f32 %v2136_v51 }
 0x855   :  { %v2145_v52 = vpop.xlane.xlu1 %2144 }
 0x856   :  { %7705 = vrcp.f32 %v2145_v52  ;;  %v2142_v21 = vpop.xlane.xlu0 %2141 }
 0x857   :  { %7707 = vrcp.f32 %v2142_v21 }
 0x858   :  { %v7700_v54 = vpop.eup %7699 }
 0x859   :  { %v2155_v0 = vmul.f32 %v7700_v54, %v7688_v18  ;;  %v2542_v36 = vpop.permute.xlu1 %2541 }
 0x85a   :  { %v2148_v1 = vpop.xlane.xlu0 %2147 }
 0x85b   :  { %7176 = vmatmul.mubr.msk.f32.vlgmr.msra.gmra.mrb[22].mxu0 %vm1104_vm3, %v2155_v0  ;;  %7709 = vrcp.f32 %v2148_v1 }
 0x85c   :  { %v7702_v12 = vpop.eup %7701  ;;  %7184 = vmatpush3.msra.mxu0 %v2314_v44  ;;  %7185 = vmatprep.mubr.msk.f32.mxu0 %vm7891_vm1, %v7890_v34 }
 0x85d   :  { %v7704_v11 = vpop.eup %7703  ;;  %7193 = vmatprep.subr.mxu0 %v7890_v34  ;;  %v2157_v3 = vmul.f32 %v7702_v12, %v7690_v28 }
 0x85e   :  { %v2156_v30 = vmul.f32 %v7704_v11, %v7692_v31  ;;  %v2466_v55 = vpop.permute.xlu0 %2465 }
 0x85f   :  { %7186 = vmatmul.mubr.msk.f32.vlgmr.msra.gmra.mrb[24].mxu0 %vm1104_vm3, %v2157_v3 }
 0x860   :  { %7181 = vmatmul.mubr.msk.f32.vlgmr.msra.gmra.mrb[26].mxu1 %vm1104_vm3, %v2156_v30  ;;  %7194 = vmatpush3.msra.mxu0 %v2466_v55  ;;  %v7706_v25 = vpop.eup %7705 }
 0x861   :  { %7189 = vmatpush3.msra.mxu1 %v2390_v46  ;;  %7190 = vmatprep.mubr.msk.f32.mxu1 %vm7891_vm1, %v7890_v34  ;;  %v7708_v5 = vpop.eup %7707  ;;  %v2159_v56 = vmul.f32 %v7706_v25, %v7694_v38 }
 0x862   :  { %7195 = vmatprep.mubr.msk.f32.mxu0 %vm7891_vm1, %v7890_v34  ;;  %7198 = vmatprep.subr.mxu1 %v7890_v34  ;;  %v2158_v6 = vmul.f32 %v7708_v5, %v7696_v39 }
 0x863   :  { %7196 = vmatmul.mubr.msk.f32.vlgmr.msra.gmra.mrb[26].mxu0 %vm1104_vm3, %v2159_v56  ;;  %7538 = vmatprep.subr.bf16.mxu0 %v7537_v9 }
 0x864   :  { %7191 = vmatmul.mubr.msk.f32.vlgmr.msra.gmra.mrb[28].mxu1 %vm1104_vm3, %v2158_v6  ;;  %7540 = vmatpush3.bf16.msra.mxu0 %v7537_v9 }
 0x865   :  { %v7710_v37 = vpop.eup %7709  ;;  %7199 = vmatpush3.msra.mxu1 %v2542_v36  ;;  %7200 = vmatprep.mubr.msk.f32.mxu1 %vm7891_vm1, %v7890_v34 }
 0x866   :  { %v2160_v45 = vmul.f32 %v7710_v37, %v7698_v42  ;;  %7542 = vmatprep.subr.bf16.mxu0 %v7541_v58 }
 0x868   :  { %7201 = vmatmul.mubr.msk.f32.vlgmr.msra.gmra.mrb[30].mxu1 %vm1104_vm3, %v2160_v45 }
 0x92e   :  { %v2233_v4 = vpop.f32.mrb[22].mxu0 }
 0x92f   :  { %v7177_v15 = vpop.f32.mrb[23].mxu0  ;;  %7207 = vmatprep.mubr.msk.f32.mxu0 %vm644_vm2, %v2233_v4 }
 0x932   :  { %v2385_v7 = vpop.f32.mrb[24].mxu0 }
 0x933   :  { %v2309_v16 = vpop.f32.mrb[26].mxu1  ;;  %v7187_v10 = vpop.f32.mrb[25].mxu0 }
 0x934   :  { %v7182_v17 = vpop.f32.mrb[27].mxu1  ;;  %7208 = vmatmul.mubr.msk.f32.vlgmr.msra.gmra.mrb[28].mxu0 %vm644_vm2, %v2309_v16  ;;  %v2966_v10 = vld [vmem:[%s9339_s18] sm:$0xff] }
 0x935   :  { %7210 = vmatprep.mubr.msk.f32.mxu0 %vm644_vm2, %v2385_v7  ;;  %7544 = vmatpush3.bf16.msra.mxu0 %v7541_v58  ;;  %v2967_v17 = vld [vmem:[%s9339_s18 + $0x8] sm:$0xff] }
 0x936   :  { %v2537_v57 = vpop.f32.mrb[26].mxu0 }
 0x937   :  { %v2461_v2 = vpop.f32.mrb[28].mxu1  ;;  %v7197_v62 = vpop.f32.mrb[27].mxu0 }
 0x938   :  { %v7192_v18 = vpop.f32.mrb[29].mxu1  ;;  %7211 = vmatmul.mubr.msk.f32.gmra.mrb[30].mxu0 %vm644_vm2, %v2461_v2  ;;  %v2968_v2 = vld [vmem:[%s9339_s18 + $0x10] sm:$0xff]  ;;  %v2969_v62 = vld [vmem:[%s9339_s18 + $0x18] sm:$0xff] }
 0x939   :  { %7213 = vmatprep.mubr.msk.f32.mxu0 %vm644_vm2, %v2537_v57  ;;  %v7545_v57 = vpack.c.bf16 %v2967_v17, %v2966_v10  ;;  %v7549_v18 = vpack.c.bf16 %v2969_v62, %v2968_v2 }
 0x93b   :  { %v2613_v20 = vpop.f32.mrb[30].mxu1  ;;  %7546 = vmatprep.subr.bf16.mxu1 %v7545_v57 }
 0x93c   :  { %v7202_v23 = vpop.f32.mrb[31].mxu1  ;;  %7214 = vmatmul.mubr.msk.f32.gmra.mrb[32].mxu0 %vm644_vm2, %v2613_v20  ;;  %7548 = vmatpush3.bf16.msra.mxu1 %v7545_v57 }
 0x93d   :  { %7220 = vmatprep.mubr.msk.f32.mxu0 %vm644_vm2, %v8444_v19  ;;  %7550 = vmatprep.subr.bf16.mxu1 %v7549_v18 }
 0x940   :  { %7221 = vmatmul.mubr.msk.f32.vlgmr.msra.gmra.mrb[28].mxu0 %vm644_vm2, %v8446_v22  ;;  %7552 = vmatpush3.bf16.msra.mxu1 %v7549_v18 }
 0x941   :  { %7223 = vmatprep.mubr.msk.f32.mxu0 %vm644_vm2, %v8448_v24 }
 0x944   :  { %7224 = vmatmul.mubr.msk.f32.gmra.mrb[30].mxu0 %vm644_vm2, %v8450_v27 }
 0x945   :  { %7226 = vmatprep.mubr.msk.f32.mxu0 %vm644_vm2, %v8452_v29 }
 0x948   :  { %7227 = vmatmul.mubr.msk.f32.gmra.mrb[32].mxu0 %vm644_vm2, %v8454_v33 }
 0xa13   :  { %v7222_v19 = vpop.f32.mrb[28].mxu0 }
 0xa14   :  { %v2851_v28 = vadd.f32 %v7222_v19, %v6681_v26  ;;  %v2814_v31 = vpop.f32.mrb[29].mxu0 }
 0xa15   :  { %v2850_v22 = vadd.f32 %v6681_v26, %v2814_v31 }
 0xa16   :  { %v2857_v32 = vadd.f32 %v2851_v28, %v8196_v49 }
 0xa17   :  { %v7225_v24 = vpop.f32.mrb[30].mxu0  ;;  %v2856_v35 = vadd.f32 %v2850_v22, %v8193_v47 }
 0xa18   :  { %v2824_v27 = vpop.f32.mrb[31].mxu0  ;;  %v2867_v38 = vsel %vm367_vm11, %v2857_v32, 0.0  ;;  %v2853_v29 = vadd.f32 %v7225_v24, %v6681_v26 }
 0xa19   :  { %v2852_v39 = vadd.f32 %v6681_v26, %v2824_v27  ;;  %2868 = vadd.xlane.f32.xlu1 %v2867_v38  ;;  %v2864_v33 = vsel %vm367_vm11, %v2856_v35, 0.0 }
 0xa1a   :  { %2865 = vadd.xlane.f32.xlu0 %v2864_v33  ;;  %v2859_v46 = vadd.f32 %v2853_v29, %v8211_v61 }
 0xa1b   :  { %v7228_v40 = vpop.f32.mrb[32].mxu0  ;;  %v2858_v41 = vadd.f32 %v2852_v39, %v8202_v53 }
 0xa1c   :  { %v2834_v42 = vpop.f32.mrb[33].mxu0  ;;  %v2855_v43 = vadd.f32 %v7228_v40, %v6681_v26  ;;  %v2873_v48 = vsel %vm367_vm11, %v2859_v46, 0.0 }
 0xa1d   :  { %v2854_v44 = vadd.f32 %v6681_v26, %v2834_v42  ;;  %v2870_v49 = vsel %vm367_vm11, %v2858_v41, 0.0 }
 0xa1e   :  { %2871 = vadd.xlane.f32.xlu0 %v2870_v49  ;;  %v2861_v51 = vadd.f32 %v2855_v43, %v8217_v63  ;;  %v6682_v43 = vld [vmem:[%s9337_s16] ss:$0 sm:$0xff] }
 0xa1f   :  { %v2860_v47 = vadd.f32 %v2854_v44, %v8208_v59 }
 0xa20   :  { %v2879_v53 = vsel %vm367_vm11, %v2861_v51, 0.0 }
 0xa21   :  { %v2876_v50 = vsel %vm367_vm11, %v2860_v47, 0.0 }
 0xa22   :  { %2874 = vadd.xlane.f32.xlu0 %v2873_v48  ;;  %2877 = vadd.xlane.f32.xlu1 %v2876_v50  ;;  %v6683_v48 = vld [vmem:[%s9338_s17] ss:$0 sm:$0xff] }
 0xa26   :  { %2880 = vadd.xlane.f32.xlu0 %v2879_v53 }
 0xaa6   :  { %v2869_v52 = vpop.xlane.xlu1 %2868 }
 0xaa7   :  { %v2883_v21 = vmul.f32 0.03125, %v2869_v52  ;;  %v2866_v54 = vpop.xlane.xlu0 %2865 }
 0xaa8   :  { %v2882_v0 = vmul.f32 0.03125, %v2866_v54 }
 0xaa9   :  { %v8549_v1 = vsub.f32 %v2857_v32, %v2883_v21 }
 0xaaa   :  { %v8551_v61 = vsub.f32 %v2856_v35, %v2882_v0 }
 0xaab   :  { %v2872_v59 = vpop.xlane.xlu0 %2871  ;;  %v2895_v12 = vmul.f32 %v8549_v1, %v8549_v1 }
 0xaac   :  { %v2884_v11 = vmul.f32 0.03125, %v2872_v59  ;;  %v2894_v63 = vmul.f32 %v8551_v61, %v8551_v61 }
 0xaad   :  { %v2903_v3 = vsel %vm367_vm11, %v2895_v12, 0.0 }
 0xaae   :  { %v8558_v30 = vsub.f32 %v2858_v41, %v2884_v11  ;;  %2904 = vadd.xlane.f32.xlu0 %v2903_v3  ;;  %v2900_v55 = vsel %vm367_vm11, %v2894_v63, 0.0 }
 0xaaf   :  { %v2875_v25 = vpop.xlane.xlu0 %2874  ;;  %2901 = vadd.xlane.f32.xlu1 %v2900_v55  ;;  %v2878_v5 = vpop.xlane.xlu1 %2877 }
 0xab0   :  { %v2885_v56 = vmul.f32 0.03125, %v2875_v25  ;;  %v2886_v6 = vmul.f32 0.03125, %v2878_v5  ;;  %v2896_v36 = vmul.f32 %v8558_v30, %v8558_v30 }
 0xab2   :  { %v8563_v37 = vsub.f32 %v2859_v46, %v2885_v56  ;;  %v8565_v45 = vsub.f32 %v2860_v47, %v2886_v6  ;;  %v2906_v8 = vsel %vm367_vm11, %v2896_v36, 0.0  ;;  %v3144_v36 = vld [vmem:[%s9341_s20] sm:$0xff] }
 0xab3   :  { %v2881_v60 = vpop.xlane.xlu0 %2880  ;;  %2907 = vadd.xlane.f32.xlu1 %v2906_v8  ;;  %v3146_v8 = vld [vmem:[%s9341_s20 + $0x10] sm:$0xff] }
 0xab4   :  { %v2887_v9 = vmul.f32 0.03125, %v2881_v60  ;;  %v2897_v13 = vmul.f32 %v8563_v37, %v8563_v37  ;;  %v2898_v14 = vmul.f32 %v8565_v45, %v8565_v45  ;;  %v3147_v60 = vld [vmem:[%s9341_s20 + $0x18] sm:$0xff] }
 0xab6   :  { %v8572_v58 = vsub.f32 %v2861_v51, %v2887_v9  ;;  %v2909_v4 = vsel %vm367_vm11, %v2897_v13, 0.0  ;;  %v2912_v15 = vsel %vm367_vm11, %v2898_v14, 0.0  ;;  %v7557_v9 = vpack.c.bf16 %v3147_v60, %v3146_v8  ;;  %v3148_v13 = vld [vmem:[%s9341_s20 + $0x20] sm:$0xff]  ;;  %v3149_v14 = vld [vmem:[%s9341_s20 + $0x28] sm:$0xff] }
 0xab7   :  { %2910 = vadd.xlane.f32.xlu0 %v2909_v4  ;;  %2913 = vadd.xlane.f32.xlu1 %v2912_v15  ;;  %v3150_v4 = vld [vmem:[%s9341_s20 + $0x30] sm:$0xff]  ;;  %v3151_v15 = vld [vmem:[%s9341_s20 + $0x38] sm:$0xff] }
 0xab8   :  { %v2899_v7 = vmul.f32 %v8572_v58, %v8572_v58 }
 0xaba   :  { %v2915_v16 = vsel %vm367_vm11, %v2899_v7, 0.0  ;;  %v7565_v7 = vpack.c.bf16 %v3151_v15, %v3150_v4 }
 0xabb   :  { %2916 = vadd.xlane.f32.xlu0 %v2915_v16  ;;  %v6684_v16 = vld [vmem:[%s9340_s19] ss:$0 sm:$0xff] }
 0xb3b   :  { %v2905_v20 = vpop.xlane.xlu0 %2904 }
 0xb3c   :  { %v2919_v23 = vmul.f32 0.03125, %v2905_v20  ;;  %v2902_v26 = vpop.xlane.xlu1 %2901 }
 0xb3d   :  { %v2918_v19 = vmul.f32 0.03125, %v2902_v26 }
 0xb3e   :  { %v2925_v28 = vadd.f32 1e-06, %v2919_v23 }
 0xb3f   :  { %v2924_v31 = vadd.f32 1e-06, %v2918_v19 }
 0xb40   :  { %7711 = vrsqrt.f32 %v2925_v28  ;;  %v2908_v22 = vpop.xlane.xlu1 %2907 }
 0xb41   :  { %7713 = vrsqrt.f32 %v2924_v31  ;;  %v2920_v32 = vmul.f32 0.03125, %v2908_v22 }
 0xb43   :  { %v2926_v24 = vadd.f32 1e-06, %v2920_v32 }
 0xb44   :  { %v2911_v35 = vpop.xlane.xlu0 %2910  ;;  %v2914_v27 = vpop.xlane.xlu1 %2913 }
 0xb45   :  { %7715 = vrsqrt.f32 %v2926_v24  ;;  %v2921_v38 = vmul.f32 0.03125, %v2911_v35  ;;  %v2922_v29 = vmul.f32 0.03125, %v2914_v27 }
 0xb47   :  { %v2927_v39 = vadd.f32 1e-06, %v2921_v38  ;;  %v2928_v33 = vadd.f32 1e-06, %v2922_v29 }
 0xb48   :  { %v2917_v40 = vpop.xlane.xlu0 %2916 }
 0xb49   :  { %7717 = vrsqrt.f32 %v2927_v39  ;;  %v2923_v41 = vmul.f32 0.03125, %v2917_v40 }
 0xb4a   :  { %v7712_v42 = vpop.eup %7711  ;;  %7719 = vrsqrt.f32 %v2928_v33 }
 0xb4b   :  { %v7714_v44 = vpop.eup %7713  ;;  %v2937_v49 = vmul.f32 %v7712_v42, %v8549_v1  ;;  %v2929_v46 = vadd.f32 1e-06, %v2923_v41 }
 0xb4c   :  { %v2936_v47 = vmul.f32 %v7714_v44, %v8551_v61 }
 0xb4d   :  { %7721 = vrsqrt.f32 %v2929_v46  ;;  %v2949_v50 = vmul.f32 %v6682_v43, %v2937_v49 }
 0xb4e   :  { %v2948_v51 = vmul.f32 %v6682_v43, %v2936_v47 }
 0xb4f   :  { %v7716_v53 = vpop.eup %7715  ;;  %v8602_v54 = vadd.f32 %v6683_v48, %v2949_v50 }
 0xb50   :  { %v8599_v52 = vadd.f32 %v6683_v48, %v2948_v51  ;;  %v2938_v21 = vmul.f32 %v7716_v53, %v8558_v30 }
 0xb52   :  { %7237 = vmatprep.mubr.msk.f32.mxu1 %vm367_vm11, %v8599_v52  ;;  %v2950_v0 = vmul.f32 %v6682_v43, %v2938_v21 }
 0xb53   :  { %v7718_v1 = vpop.eup %7717  ;;  %7238 = vmatmul.mubr.msk.f32.vlgmr.msra.gmra.mrb[32].mxu1 %vm367_vm11, %v8602_v54 }
 0xb54   :  { %v7720_v61 = vpop.eup %7719  ;;  %v8608_v59 = vadd.f32 %v6683_v48, %v2950_v0  ;;  %v2939_v12 = vmul.f32 %v7718_v1, %v8563_v37  ;;  %v3145_v37 = vld [vmem:[%s9341_s20 + $0x8] sm:$0xff] }
 0xb55   :  { %v2940_v11 = vmul.f32 %v7720_v61, %v8565_v45  ;;  %v7553_v45 = vpack.c.bf16 %v3145_v37, %v3144_v36 }
 0xb56   :  { %7240 = vmatprep.mubr.msk.f32.mxu1 %vm367_vm11, %v8608_v59  ;;  %v2951_v63 = vmul.f32 %v6682_v43, %v2939_v12 }
 0xb57   :  { %v7722_v3 = vpop.eup %7721  ;;  %v2952_v30 = vmul.f32 %v6682_v43, %v2940_v11  ;;  %7554 = vmatprep.subr.bf16.mxu1 %v7553_v45 }
 0xb58   :  { %v8614_v55 = vadd.f32 %v6683_v48, %v2951_v63  ;;  %v2941_v25 = vmul.f32 %v7722_v3, %v8572_v58  ;;  %7556 = vmatpush3.bf16.msra.mxu1 %v7553_v45  ;;  %v7561_v58 = vpack.c.bf16 %v3149_v14, %v3148_v13 }
 0xb59   :  { %v8617_v5 = vadd.f32 %v6683_v48, %v2952_v30  ;;  %7558 = vmatprep.subr.bf16.mxu1 %v7557_v9 }
 0xb5a   :  { %7241 = vmatmul.mubr.msk.f32.gmra.mrb[34].mxu1 %vm367_vm11, %v8614_v55  ;;  %v2953_v56 = vmul.f32 %v6682_v43, %v2941_v25 }
 0xb5b   :  { %7243 = vmatprep.mubr.msk.f32.mxu1 %vm367_vm11, %v8617_v5 }
 0xb5c   :  { %v8623_v6 = vadd.f32 %v6683_v48, %v2953_v56  ;;  %7560 = vmatpush3.bf16.msra.mxu1 %v7557_v9 }
 0xb5d   :  { %7562 = vmatprep.subr.bf16.mxu1 %v7561_v58 }
 0xb5e   :  { %7244 = vmatmul.mubr.msk.f32.gmra.mrb[36].mxu1 %vm367_vm11, %v8623_v6 }
 0xb60   :  { %7564 = vmatpush3.bf16.msra.mxu1 %v7561_v58 }
 0xb61   :  { %7566 = vmatprep.subr.bf16.mxu1 %v7565_v7 }
 0xb64   :  { %7568 = vmatpush3.bf16.msra.mxu1 %v7565_v7 }
 0xb65   :  { %7288 = vmatprep.subr.mxu1 %v7890_v34 }
 0xc26   :  { %v7239_v10 = vpop.f32.mrb[32].mxu1 }
 0xc27   :  { %v3067_v17 = vadd.f32 %v7239_v10, %v6684_v16  ;;  %v3061_v57 = vpop.f32.mrb[33].mxu1 }
 0xc28   :  { %v3062_v2 = vadd.f32 %v6684_v16, %v3061_v57 }
 0xc29   :  { %v3097_v62 = vmul.f32 0.044715, %v3067_v17  ;;  %v3091_v8 = vmul.f32 0.5, %v3067_v17 }
 0xc2a   :  { %v3096_v18 = vmul.f32 0.044715, %v3062_v2  ;;  %v3090_v37 = vmul.f32 0.5, %v3062_v2 }
 0xc2b   :  { %v3103_v20 = vmul.f32 %v3097_v62, %v3067_v17 }
 0xc2c   :  { %v3102_v23 = vmul.f32 %v3096_v18, %v3062_v2 }
 0xc2d   :  { %v3109_v26 = vmul.f32 %v3103_v20, %v3067_v17  ;;  %v7242_v19 = vpop.f32.mrb[34].mxu1 }
 0xc2e   :  { %v3108_v28 = vmul.f32 %v3102_v23, %v3062_v2  ;;  %v3077_v31 = vadd.f32 %v7242_v19, %v6684_v16  ;;  %v3071_v22 = vpop.f32.mrb[35].mxu1  ;;  %v6691_v19 = vld [vmem:[%s9342_s21] ss:$0 sm:$0xff] }
 0xc2f   :  { %v3115_v32 = vadd.f32 %v3109_v26, %v3067_v17  ;;  %v3072_v24 = vadd.f32 %v6684_v16, %v3071_v22 }
 0xc30   :  { %v3114_v35 = vadd.f32 %v3108_v28, %v3062_v2  ;;  %v3099_v27 = vmul.f32 0.044715, %v3077_v31  ;;  %v3093_v7 = vmul.f32 0.5, %v3077_v31 }
 0xc31   :  { %v3121_v38 = vmul.f32 0.7978846, %v3115_v32  ;;  %v3098_v29 = vmul.f32 0.044715, %v3072_v24  ;;  %v7245_v39 = vpop.f32.mrb[36].mxu1  ;;  %v3092_v4 = vmul.f32 0.5, %v3072_v24 }
 0xc32   :  { %v3105_v33 = vmul.f32 %v3099_v27, %v3077_v31  ;;  %v3087_v40 = vadd.f32 %v7245_v39, %v6684_v16  ;;  %v3081_v41 = vpop.f32.mrb[37].mxu1  ;;  %v3120_v42 = vmul.f32 0.7978846, %v3114_v35 }
 0xc33   :  { %7723 = vtanh.f32 %v3121_v38  ;;  %v3104_v43 = vmul.f32 %v3098_v29, %v3072_v24  ;;  %v3082_v44 = vadd.f32 %v6684_v16, %v3081_v41 }
 0xc34   :  { %v3111_v49 = vmul.f32 %v3105_v33, %v3077_v31  ;;  %v3101_v46 = vmul.f32 0.044715, %v3087_v40  ;;  %7725 = vtanh.f32 %v3120_v42  ;;  %v3095_v20 = vmul.f32 0.5, %v3087_v40 }
 0xc35   :  { %v3110_v47 = vmul.f32 %v3104_v43, %v3072_v24  ;;  %v3100_v48 = vmul.f32 0.044715, %v3082_v44  ;;  %v3094_v17 = vmul.f32 0.5, %v3082_v44 }
 0xc36   :  { %v3117_v50 = vadd.f32 %v3111_v49, %v3077_v31  ;;  %v3107_v51 = vmul.f32 %v3101_v46, %v3087_v40 }
 0xc37   :  { %v3116_v53 = vadd.f32 %v3110_v47, %v3072_v24  ;;  %v3106_v21 = vmul.f32 %v3100_v48, %v3082_v44 }
 0xc38   :  { %v3113_v0 = vmul.f32 %v3107_v51, %v3087_v40  ;;  %v3123_v1 = vmul.f32 0.7978846, %v3117_v50 }
 0xc39   :  { %v3112_v61 = vmul.f32 %v3106_v21, %v3082_v44  ;;  %v3122_v12 = vmul.f32 0.7978846, %v3116_v53 }
 0xc3a   :  { %v3119_v11 = vadd.f32 %v3113_v0, %v3087_v40  ;;  %7727 = vtanh.f32 %v3123_v1 }
 0xc3b   :  { %v3118_v63 = vadd.f32 %v3112_v61, %v3082_v44  ;;  %7729 = vtanh.f32 %v3122_v12 }
 0xc3c   :  { %v3125_v3 = vmul.f32 0.7978846, %v3119_v11 }
 0xc3d   :  { %v7724_v30 = vpop.eup %7723  ;;  %v3124_v25 = vmul.f32 0.7978846, %v3118_v63 }
 0xc3e   :  { %v7726_v56 = vpop.eup %7725  ;;  %v3133_v36 = vadd.f32 1.0, %v7724_v30  ;;  %7731 = vtanh.f32 %v3125_v3 }
 0xc3f   :  { %v3132_v45 = vadd.f32 1.0, %v7726_v56  ;;  %7733 = vtanh.f32 %v3124_v25 }
 0xc40   :  { %v3139_v9 = vmul.f32 %v3133_v36, %v3091_v8 }
 0xc41   :  { %v3138_v60 = vmul.f32 %v3132_v45, %v3090_v37 }
 0xc43   :  { %7262 = vmatprep.mubr.msk.f32.mxu1 %vm244_vm12, %v3138_v60 }
 0xc44   :  { %v7728_v13 = vpop.eup %7727  ;;  %7263 = vmatmul.mubr.msk.f32.vlgmr.msra.gmra.mrb[38].mxu1 %vm244_vm12, %v3139_v9 }
 0xc45   :  { %v7730_v14 = vpop.eup %7729  ;;  %v3135_v58 = vadd.f32 1.0, %v7728_v13 }
 0xc46   :  { %v3134_v15 = vadd.f32 1.0, %v7730_v14 }
 0xc47   :  { %v3141_v62 = vmul.f32 %v3135_v58, %v3093_v7 }
 0xc48   :  { %v7732_v16 = vpop.eup %7731  ;;  %v3140_v10 = vmul.f32 %v3134_v15, %v3092_v4 }
 0xc49   :  { %v7734_v57 = vpop.eup %7733  ;;  %v3137_v2 = vadd.f32 1.0, %v7732_v16 }
 0xc4a   :  { %7265 = vmatprep.mubr.msk.f32.mxu1 %vm244_vm12, %v3140_v10  ;;  %v3136_v18 = vadd.f32 1.0, %v7734_v57  ;;  %v6700_v57 = vld [vmem:[%s9333_s12 + $0x20] sm:$0xff] }
 0xc4b   :  { %7266 = vmatmul.mubr.msk.f32.gmra.mrb[40].mxu1 %vm244_vm12, %v3141_v62  ;;  %v3143_v26 = vmul.f32 %v3137_v2, %v3095_v20  ;;  %v6701_v62 = vld [vmem:[%s9333_s12 + $0x28] sm:$0xff] }
 0xc4c   :  { %v3142_v23 = vmul.f32 %v3136_v18, %v3094_v17  ;;  %v7569_v2 = vpack.c.bf16 %v6701_v62, %v6700_v57  ;;  %v6702_v17 = vld [vmem:[%s9333_s12 + $0x30] sm:$0xff]  ;;  %v6703_v18 = vld [vmem:[%s9333_s12 + $0x38] sm:$0xff]  ;;  %s7841_s12 = scalar_lea.vmem %s6585_s5, 32 }
 0xc4d   :  { %v7573_v20 = vpack.c.bf16 %v6703_v18, %v6702_v17  ;;  %p7842_p0 = scmp.ne.s32.totalorder %s6585_s5, %s7841_s12  ;;  %p7847_p2 = scmp.lt.s32.totalorder %s7841_s12, %s7841_s12 }
 0xc4e   :  { %7268 = vmatprep.mubr.msk.f32.mxu1 %vm244_vm12, %v3142_v23  ;;  %7570 = vmatprep.subr.bf16.mxu0 %v7569_v2 }
 0xc4f   :  { %7269 = vmatmul.mubr.msk.f32.gmra.mrb[42].mxu1 %vm244_vm12, %v3143_v26  ;;  %7572 = vmatpush3.bf16.msra.mxu0 %v7569_v2  ;;  %p7848_p3 = por %p7847_p2, %p7846_p1 }
 0xc50   :  { %7290 = vmatprep.mubr.msk.f32.mxu1 %vm7891_vm1, %v7890_v34  ;;  %7574 = vmatprep.subr.bf16.mxu0 %v7573_v20 }
 0xc51   :  { %p7849_p4 = pnand %p7848_p3, %p7842_p0 }
 0xc53   :  { %7576 = vmatpush3.bf16.msra.mxu0 %v7573_v20 }
 0xc54   :  { %7293 = vmatprep.subr.mxu0 %v7890_v34 }
 0xd17   :  { %v7264_v28 = vpop.f32.mrb[38].mxu1 }
 0xd18   :  { %v3249_v31 = vadd.f32 %v7264_v28, %v6691_v19  ;;  %v3243_v22 = vpop.f32.mrb[39].mxu1 }
 0xd19   :  { %v3244_v32 = vadd.f32 %v6691_v19, %v3243_v22 }
 0xd1a   :  { %v3273_v24 = vadd.f32 %v3249_v31, %v8602_v54 }
 0xd1b   :  { %v3272_v35 = vadd.f32 %v3244_v32, %v8599_v52 }
 0xd1c   :  { %v3283_v27 = vsel %vm367_vm11, %v3273_v24, 0.0 }
 0xd1d   :  { %3284 = vadd.xlane.f32.xlu0 %v3283_v27  ;;  %v3280_v38 = vsel %vm367_vm11, %v3272_v35, 0.0 }
 0xd1e   :  { %v7267_v29 = vpop.f32.mrb[40].mxu1  ;;  %3281 = vadd.xlane.f32.xlu1 %v3280_v38 }
 0xd1f   :  { %v3259_v39 = vadd.f32 %v7267_v29, %v6691_v19  ;;  %v3253_v33 = vpop.f32.mrb[41].mxu1 }
 0xd20   :  { %v3254_v40 = vadd.f32 %v6691_v19, %v3253_v33 }
 0xd21   :  { %v3275_v41 = vadd.f32 %v3259_v39, %v8614_v55 }
 0xd22   :  { %v7270_v42 = vpop.f32.mrb[42].mxu1  ;;  %v3274_v43 = vadd.f32 %v3254_v40, %v8608_v59 }
 0xd23   :  { %v3269_v44 = vadd.f32 %v7270_v42, %v6691_v19  ;;  %v3263_v49 = vpop.f32.mrb[43].mxu1  ;;  %v3289_v54 = vsel %vm367_vm11, %v3275_v41, 0.0 }
 0xd24   :  { %v3264_v52 = vadd.f32 %v6691_v19, %v3263_v49  ;;  %3290 = vadd.xlane.f32.xlu0 %v3289_v54  ;;  %v3286_v46 = vsel %vm367_vm11, %v3274_v43, 0.0 }
 0xd25   :  { %v3277_v47 = vadd.f32 %v3269_v44, %v8623_v6  ;;  %3287 = vadd.xlane.f32.xlu1 %v3286_v46  ;;  %v6698_v44 = vld [vmem:[%s9343_s22] ss:$0 sm:$0xff] }
 0xd26   :  { %v3276_v48 = vadd.f32 %v3264_v52, %v8617_v5 }
 0xd27   :  { %v3295_v50 = vsel %vm367_vm11, %v3277_v47, 0.0 }
 0xd28   :  { %3296 = vadd.xlane.f32.xlu0 %v3295_v50  ;;  %v3292_v55 = vsel %vm367_vm11, %v3276_v48, 0.0 }
 0xd29   :  { %3293 = vadd.xlane.f32.xlu1 %v3292_v55 }
 0xdaa   :  { %v3285_v59 = vpop.xlane.xlu0 %3284 }
 0xdab   :  { %v3299_v51 = vmul.f32 0.03125, %v3285_v59  ;;  %v3282_v53 = vpop.xlane.xlu1 %3281 }
 0xdac   :  { %v3298_v21 = vmul.f32 0.03125, %v3282_v53 }
 0xdad   :  { %v8678_v0 = vsub.f32 %v3273_v24, %v3299_v51 }
 0xdae   :  { %v8680_v1 = vsub.f32 %v3272_v35, %v3298_v21 }
 0xdaf   :  { %v3311_v6 = vmul.f32 %v8678_v0, %v8678_v0 }
 0xdb0   :  { %v3310_v5 = vmul.f32 %v8680_v1, %v8680_v1 }
 0xdb1   :  { %v3291_v61 = vpop.xlane.xlu0 %3290  ;;  %v3319_v12 = vsel %vm367_vm11, %v3311_v6, 0.0 }
 0xdb2   :  { %v3301_v11 = vmul.f32 0.03125, %v3291_v61  ;;  %v3288_v63 = vpop.xlane.xlu1 %3287  ;;  %3320 = vadd.xlane.f32.xlu0 %v3319_v12  ;;  %v3316_v3 = vsel %vm367_vm11, %v3310_v5, 0.0 }
 0xdb3   :  { %v3300_v30 = vmul.f32 0.03125, %v3288_v63  ;;  %3317 = vadd.xlane.f32.xlu1 %v3316_v3 }
 0xdb4   :  { %v8688_v25 = vsub.f32 %v3275_v41, %v3301_v11 }
 0xdb5   :  { %v8690_v56 = vsub.f32 %v3274_v43, %v3300_v30  ;;  %v3297_v36 = vpop.xlane.xlu0 %3296 }
 0xdb6   :  { %v3303_v37 = vmul.f32 0.03125, %v3297_v36  ;;  %v3294_v45 = vpop.xlane.xlu1 %3293  ;;  %v3313_v8 = vmul.f32 %v8688_v25, %v8688_v25 }
 0xdb7   :  { %v3302_v60 = vmul.f32 0.03125, %v3294_v45  ;;  %v3312_v9 = vmul.f32 %v8690_v56, %v8690_v56 }
 0xdb8   :  { %v8696_v13 = vsub.f32 %v3277_v47, %v3303_v37  ;;  %v3325_v14 = vsel %vm367_vm11, %v3313_v8, 0.0  ;;  %v6699_v47 = vld [vmem:[%s9344_s23] ss:$0 sm:$0xff]  ;;  %v6705_v37 = vld [vmem:[%s9334_s13 + $0x1] ss:$0 sm:$0xff] }
 0xdb9   :  { %v8699_v58 = vsub.f32 %v3276_v48, %v3302_v60  ;;  %3326 = vadd.xlane.f32.xlu0 %v3325_v14  ;;  %v3322_v4 = vsel %vm367_vm11, %v3312_v9, 0.0 }
 0xdba   :  { %3323 = vadd.xlane.f32.xlu1 %v3322_v4  ;;  %v3315_v15 = vmul.f32 %v8696_v13, %v8696_v13 }
 0xdbb   :  { %v3314_v7 = vmul.f32 %v8699_v58, %v8699_v58 }
 0xdbc   :  { %v3331_v16 = vsel %vm367_vm11, %v3315_v15, 0.0 }
 0xdbd   :  { %3332 = vadd.xlane.f32.xlu0 %v3331_v16  ;;  %v3328_v10 = vsel %vm367_vm11, %v3314_v7, 0.0 }
 0xdbe   :  { %3329 = vadd.xlane.f32.xlu1 %v3328_v10 }
 0xe3f   :  { %v3321_v23 = vpop.xlane.xlu0 %3320 }
 0xe40   :  { %v3335_v26 = vmul.f32 0.03125, %v3321_v23  ;;  %v3318_v19 = vpop.xlane.xlu1 %3317 }
 0xe41   :  { %v3334_v28 = vmul.f32 0.03125, %v3318_v19 }
 0xe42   :  { %v3341_v31 = vadd.f32 1e-06, %v3335_v26 }
 0xe43   :  { %v3340_v22 = vadd.f32 1e-06, %v3334_v28  ;;  %v8843_v28 = vld [vmem:[%s9372_s1 + $0x1] ss:$0 sm:$0xff] }
 0xe44   :  { %7735 = vrsqrt.f32 %v3341_v31 }
 0xe45   :  { %7737 = vrsqrt.f32 %v3340_v22 }
 0xe46   :  { %v3327_v32 = vpop.xlane.xlu0 %3326 }
 0xe47   :  { %v3337_v24 = vmul.f32 0.03125, %v3327_v32  ;;  %v3324_v35 = vpop.xlane.xlu1 %3323 }
 0xe48   :  { %v3336_v27 = vmul.f32 0.03125, %v3324_v35 }
 0xe49   :  { %v3343_v38 = vadd.f32 1e-06, %v3337_v24  ;;  %v8849_v24 = vld [vmem:[%s9372_s1] ss:$0 sm:$0xff] }
 0xe4a   :  { %v3342_v29 = vadd.f32 1e-06, %v3336_v27  ;;  %v3333_v39 = vpop.xlane.xlu0 %3332 }
 0xe4b   :  { %7739 = vrsqrt.f32 %v3343_v38  ;;  %v3339_v33 = vmul.f32 0.03125, %v3333_v39  ;;  %v3330_v40 = vpop.xlane.xlu1 %3329 }
 0xe4c   :  { %7741 = vrsqrt.f32 %v3342_v29  ;;  %v3338_v41 = vmul.f32 0.03125, %v3330_v40 }
 0xe4d   :  { %v3345_v42 = vadd.f32 1e-06, %v3339_v33 }
 0xe4e   :  { %v7736_v43 = vpop.eup %7735  ;;  %v3344_v49 = vadd.f32 1e-06, %v3338_v41 }
 0xe4f   :  { %v7738_v54 = vpop.eup %7737  ;;  %v3353_v52 = vmul.f32 %v7736_v43, %v8678_v0  ;;  %7743 = vrsqrt.f32 %v3345_v42  ;;  %v8857_v42 = vld [vmem:[%s9372_s1 + $0x3] ss:$0 sm:$0xff] }
 0xe50   :  { %7745 = vrsqrt.f32 %v3344_v49  ;;  %v3352_v46 = vmul.f32 %v7738_v54, %v8680_v1  ;;  %v8863_v54 = vld [vmem:[%s9372_s1 + $0x2] ss:$0 sm:$0xff] }
 0xe51   :  { %v3365_v48 = vmul.f32 %v6698_v44, %v3353_v52 }
 0xe52   :  { %v3364_v50 = vmul.f32 %v6698_v44, %v3352_v46 }
 0xe53   :  { %v8731_v51 = vadd.f32 %v6699_v47, %v3365_v48 }
 0xe54   :  { %v8729_v55 = vadd.f32 %v6699_v47, %v3364_v50  ;;  %v8870_v50 = vld [vmem:[%s9372_s1 + $0x5] ss:$0 sm:$0xff] }
 0xe55   :  { %v7740_v59 = vpop.eup %7739 }
 0xe56   :  { %v7742_v53 = vpop.eup %7741  ;;  %7279 = vmatprep.mubr.msk.f32.mxu0 %vm367_vm11, %v8729_v55  ;;  %v3355_v21 = vmul.f32 %v7740_v59, %v8688_v25 }
 0xe57   :  { %7280 = vmatmul.mubr.msk.f32.vlgmr.msra.gmra.mrb[34].mxu0 %vm367_vm11, %v8731_v51  ;;  %v3354_v0 = vmul.f32 %v7742_v53, %v8690_v56 }
 0xe58   :  { %v3367_v1 = vmul.f32 %v6698_v44, %v3355_v21 }
 0xe59   :  { %v7744_v6 = vpop.eup %7743  ;;  %v3366_v5 = vmul.f32 %v6698_v44, %v3354_v0  ;;  %v8882_v0 = vld [vmem:[%s9372_s1 + $0x4] ss:$0 sm:$0xff] }
 0xe5a   :  { %v7746_v61 = vpop.eup %7745  ;;  %v3357_v12 = vmul.f32 %v7744_v6, %v8696_v13  ;;  %v8743_v3 = vadd.f32 %v6699_v47, %v3367_v1 }
 0xe5b   :  { %v8740_v11 = vadd.f32 %v6699_v47, %v3366_v5  ;;  %v3356_v63 = vmul.f32 %v7746_v61, %v8699_v58 }
 0xe5c   :  { %v3369_v30 = vmul.f32 %v6698_v44, %v3357_v12 }
 0xe5d   :  { %7282 = vmatprep.mubr.msk.f32.mxu0 %vm367_vm11, %v8740_v11  ;;  %v3368_v25 = vmul.f32 %v6698_v44, %v3356_v63 }
 0xe5e   :  { %7283 = vmatmul.mubr.msk.f32.gmra.mrb[36].mxu0 %vm367_vm11, %v8743_v3  ;;  %v8751_v36 = vadd.f32 %v6699_v47, %v3369_v30 }
 0xe5f   :  { %v8749_v56 = vadd.f32 %v6699_v47, %v3368_v25 }
 0xe61   :  { %7285 = vmatprep.mubr.msk.f32.mxu0 %vm367_vm11, %v8749_v56 }
 0xe62   :  { %7286 = vmatmul.mubr.msk.f32.gmra.mrb[38].mxu0 %vm367_vm11, %v8751_v36 }
 0xe63   :  { %7295 = vmatprep.mubr.msk.f32.mxu0 %vm7891_vm1, %v7890_v34 }
 0xf2a   :  { %v7281_v45 = vpop.f32.mrb[34].mxu0 }
 0xf2b   :  { %v8762_v8 = vadd.f32 %v7281_v45, %v6705_v37  ;;  %v3479_v60 = vpop.f32.mrb[35].mxu0 }
 0xf2c   :  { %v8764_v9 = vadd.f32 %v6705_v37, %v3479_v60 }
 0xf2d   :  { %3591 = vrot.lane.b32.xlu0 %v8762_v8, %s7892_s28 }
 0xf2e   :  { %3514 = vrot.lane.b32.xlu1 %v8764_v9, %s7892_s28 }
 0xf31   :  { %v7284_v13 = vpop.f32.mrb[36].mxu0 }
 0xf32   :  { %v3489_v14 = vpop.f32.mrb[37].mxu0  ;;  %v8774_v7 = vadd.f32 %v7284_v13, %v6705_v37 }
 0xf33   :  { %v8770_v58 = vadd.f32 %v6705_v37, %v3489_v14 }
 0xf35   :  { %3668 = vrot.lane.b32.xlu1 %v8770_v58, %s7892_s28  ;;  %v7287_v4 = vpop.f32.mrb[38].mxu0 }
 0xf36   :  { %v3499_v15 = vpop.f32.mrb[39].mxu0  ;;  %v8782_v10 = vadd.f32 %v7287_v4, %v6705_v37 }
 0xf37   :  { %v8776_v16 = vadd.f32 %v6705_v37, %v3499_v15 }
 0xf39   :  { %3745 = vrot.lane.b32.xlu1 %v8774_v7, %s7892_s28  ;;  %3822 = vrot.lane.b32.xlu0 %v8776_v16, %s7892_s28 }
 0xf3d   :  { %3899 = vrot.lane.b32.xlu1 %v8782_v10, %s7892_s28  ;;  %4117 = vrot.lane.b32.xlu0 %v8762_v8, %s7893_s0  ;;  %s9374_s28 = sld [smem:[#allocation15_spill]] }
 0xf41   :  { %4041 = vrot.lane.b32.xlu1 %v8764_v9, %s7893_s0  ;;  %4499 = vrot.lane.b32.xlu0 %v8764_v9, %s7894_s10 }
 0xf45   :  { %4193 = vrot.lane.b32.xlu1 %v8770_v58, %s7893_s0  ;;  %4345 = vrot.lane.b32.xlu0 %v8776_v16, %s7893_s0 }
 0xf49   :  { %4269 = vrot.lane.b32.xlu1 %v8774_v7, %s7893_s0 }
 0xf4d   :  { %4421 = vrot.lane.b32.xlu1 %v8782_v10, %s7893_s0 }
 0xf51   :  { %4577 = vrot.lane.b32.xlu1 %v8762_v8, %s7894_s10 }
 0xf9f   :  { %v3592_v57 = vpop.permute.xlu0 %3591 }
 0xfa0   :  { %7294 = vmatpush3.xpose.msk.msra.mxu0 %vm644_vm2, %v3592_v57  ;;  %v3515_v62 = vpop.permute.xlu1 %3514 }
 0xfa1   :  { %7289 = vmatpush3.xpose.msk.msra.mxu1 %vm644_vm2, %v3515_v62  ;;  %7303 = vmatprep.subr.mxu0 %v7890_v34 }
 0xfa2   :  { %7298 = vmatprep.subr.mxu1 %v7890_v34 }
 0xfa3   :  { %7296 = vmatmul.mubr.msk.f32.vlgmr.msra.gmra.mrb[40].mxu0 %vm644_vm2, %v8762_v8 }
 0xfa4   :  { %7291 = vmatmul.mubr.msk.f32.vlgmr.msra.gmra.mrb[44].mxu1 %vm644_vm2, %v8764_v9  ;;  %7305 = vmatprep.mubr.msk.f32.mxu0 %vm7891_vm1, %v7890_v34 }
 0xfa5   :  { %7300 = vmatprep.mubr.msk.f32.mxu1 %vm7891_vm1, %v7890_v34 }
 0xfa7   :  { %v3669_v2 = vpop.permute.xlu1 %3668 }
 0xfa8   :  { %7299 = vmatpush3.xpose.msk.msra.mxu1 %vm644_vm2, %v3669_v2 }
 0xfa9   :  { %7308 = vmatprep.subr.mxu1 %v7890_v34 }
 0xfab   :  { %v3823_v17 = vpop.permute.xlu0 %3822  ;;  %7301 = vmatmul.mubr.msk.f32.vlgmr.msra.gmra.mrb[46].mxu1 %vm644_vm2, %v8770_v58  ;;  %v3746_v18 = vpop.permute.xlu1 %3745 }
 0xfac   :  { %7304 = vmatpush3.xpose.msk.msra.mxu0 %vm644_vm2, %v3746_v18  ;;  %7309 = vmatpush3.xpose.msk.msra.mxu1 %vm644_vm2, %v3823_v17 }
 0xfad   :  { %7310 = vmatprep.mubr.msk.f32.mxu1 %vm7891_vm1, %v7890_v34  ;;  %7313 = vmatprep.subr.mxu0 %v7890_v34 }
 0xfae   :  { %7318 = vmatprep.subr.mxu1 %v7890_v34 }
 0xfaf   :  { %7306 = vmatmul.mubr.msk.f32.vlgmr.msra.gmra.mrb[42].mxu0 %vm644_vm2, %v8774_v7  ;;  %7311 = vmatmul.mubr.msk.f32.vlgmr.msra.gmra.mrb[48].mxu1 %vm644_vm2, %v8776_v16  ;;  %v3900_v20 = vpop.permute.xlu1 %3899  ;;  %v4118_v23 = vpop.permute.xlu0 %4117 }
 0xfb0   :  { %7314 = vmatpush3.xpose.msk.msra.mxu0 %vm644_vm2, %v3900_v20  ;;  %7315 = vmatprep.mubr.msk.f32.mxu0 %vm7891_vm1, %v7890_v34 }
 0xfb1   :  { %7323 = vmatprep.subr.mxu0 %v7890_v34  ;;  %7320 = vmatprep.mubr.msk.f32.mxu1 %vm7891_vm1, %v7890_v34 }
 0xfb3   :  { %7316 = vmatmul.mubr.msk.f32.vlgmr.msra.gmra.mrb[44].mxu0 %vm644_vm2, %v8782_v10  ;;  %v4042_v26 = vpop.permute.xlu1 %4041  ;;  %v8892_v63 = vpop.permute.xlu0 %4499 }
 0xfb4   :  { %7319 = vmatpush3.msra.mxu1 %v4042_v26  ;;  %7324 = vmatpush3.msra.mxu0 %v4118_v23 }
 0xfb5   :  { %7325 = vmatprep.mubr.msk.f32.mxu0 %vm7891_vm1, %v7890_v34  ;;  %7333 = vmatprep.subr.mxu0 %v7890_v34 }
 0xfb6   :  { %7328 = vmatprep.subr.mxu1 %v7890_v34 }
 0xfb7   :  { %v8886_v5 = vpop.permute.xlu1 %4193  ;;  %v8896_v25 = vpop.permute.xlu0 %4345 }
 0xfbb   :  { %v8888_v61 = vpop.permute.xlu1 %4269 }
 0xfbf   :  { %v8890_v12 = vpop.permute.xlu1 %4421 }
 0xfc3   :  { %v8894_v30 = vpop.permute.xlu1 %4577 }
0x1076   :  { %v3663_v19 = vpop.f32.mrb[40].mxu0 }
0x1077   :  { %v3664_v31 = vadd.f32 %v8843_v28, %v3663_v19  ;;  %v3586_v22 = vpop.f32.mrb[44].mxu1  ;;  %v7297_v32 = vpop.f32.mrb[41].mxu0 }
0x1078   :  { %v3587_v35 = vadd.f32 %v8849_v24, %v3586_v22  ;;  %v7292_v27 = vpop.f32.mrb[45].mxu1 }
0x1079   :  { %v3978_v38 = vsel %vm1104_vm3, %v3664_v31, -inf }
0x107a   :  { %3979 = vmax.xlane.f32.xlu1 %v3978_v38  ;;  %v3975_v29 = vsel %vm1104_vm3, %v3587_v35, -inf }
0x107b   :  { %3976 = vmax.xlane.f32.xlu0 %v3975_v29 }
0x107e   :  { %v3740_v39 = vpop.f32.mrb[46].mxu1 }
0x107f   :  { %v7302_v33 = vpop.f32.mrb[47].mxu1  ;;  %v3741_v52 = vadd.f32 %v8863_v54, %v3740_v39 }
0x1081   :  { %v3981_v53 = vsel %vm1104_vm3, %v3741_v52, -inf }
0x1082   :  { %v3817_v40 = vpop.f32.mrb[42].mxu0  ;;  %v3894_v41 = vpop.f32.mrb[48].mxu1 }
0x1083   :  { %v3818_v43 = vadd.f32 %v8857_v42, %v3817_v40  ;;  %v7307_v44 = vpop.f32.mrb[43].mxu0  ;;  %v7312_v49 = vpop.f32.mrb[49].mxu1  ;;  %v3895_v1 = vadd.f32 %v8882_v0, %v3894_v41 }
0x1085   :  { %v3984_v46 = vsel %vm1104_vm3, %v3818_v43, -inf  ;;  %v3987_v6 = vsel %vm1104_vm3, %v3895_v1, -inf }
0x1086   :  { %3985 = vmax.xlane.f32.xlu0 %v3984_v46  ;;  %v3971_v47 = vpop.f32.mrb[44].mxu0 }
0x1087   :  { %v7317_v48 = vpop.f32.mrb[45].mxu0  ;;  %v3972_v59 = vadd.f32 %v8870_v50, %v3971_v47 }
0x1089   :  { %v3990_v21 = vsel %vm1104_vm3, %v3972_v59, -inf }
0x108a   :  { %3982 = vmax.xlane.f32.xlu0 %v3981_v53 }
0x108b   :  { %4575 = vrot.lane.b32.xlu1 %v8762_v8, %s7895_s25 }
0x108e   :  { %3991 = vmax.xlane.f32.xlu0 %v3990_v21 }
0x10a4   :  { %4497 = vrot.lane.b32.xlu0 %v8764_v9, %s7895_s25 }
0x10af   :  { %3988 = vmax.xlane.f32.xlu1 %v3987_v6 }
0x1107   :  { %v3980_v37 = vpop.xlane.xlu1 %3979 }
0x1108   :  { %v3994_v45 = vsub.f32 %v3664_v31, %v3980_v37  ;;  %v3977_v60 = vpop.xlane.xlu0 %3976 }
0x1109   :  { %v3993_v13 = vsub.f32 %v3587_v35, %v3977_v60 }
0x110a   :  { %v4001_v14 = vmul.f32 1.442695, %v3994_v45 }
0x110b   :  { %v3999_v4 = vmul.f32 1.442695, %v3993_v13  ;;  %v4576_v40 = vpop.permute.xlu1 %4575 }
0x110c   :  { %7747 = vpow2.f32 %v4001_v14 }
0x110d   :  { %7749 = vpow2.f32 %v3999_v4 }
0x1113   :  { %v3986_v15 = vpop.xlane.xlu0 %3985 }
0x1114   :  { %v3996_v57 = vsub.f32 %v3818_v43, %v3986_v15 }
0x1116   :  { %v7748_v62 = vpop.eup %7747  ;;  %v4005_v2 = vmul.f32 1.442695, %v3996_v57 }
0x1117   :  { %v7750_v17 = vpop.eup %7749  ;;  %v4014_v18 = vsel %vm1104_vm3, %v7748_v62, 0.0  ;;  %v3983_v19 = vpop.xlane.xlu0 %3982 }
0x1118   :  { %7751 = vpow2.f32 %v4005_v2  ;;  %4015 = vadd.xlane.f32.xlu0 %v4014_v18  ;;  %v4011_v20 = vsel %vm1104_vm3, %v7750_v17, 0.0  ;;  %v3995_v31 = vsub.f32 %v3741_v52, %v3983_v19 }
0x1119   :  { %4012 = vadd.xlane.f32.xlu1 %v4011_v20 }
0x111a   :  { %v4003_v22 = vmul.f32 1.442695, %v3995_v31 }
0x111b   :  { %v3992_v32 = vpop.xlane.xlu0 %3991 }
0x111c   :  { %7753 = vpow2.f32 %v4003_v22  ;;  %v3998_v35 = vsub.f32 %v3972_v59, %v3992_v32 }
0x111e   :  { %v4009_v27 = vmul.f32 1.442695, %v3998_v35 }
0x111f   :  { %v8923_v46 = vpop.permute.xlu0 %4497 }
0x1120   :  { %7755 = vpow2.f32 %v4009_v27 }
0x1122   :  { %v7752_v23 = vpop.eup %7751 }
0x1123   :  { %v4020_v26 = vsel %vm1104_vm3, %v7752_v23, 0.0 }
0x1124   :  { %4021 = vadd.xlane.f32.xlu0 %v4020_v26 }
0x1126   :  { %v7754_v38 = vpop.eup %7753 }
0x1127   :  { %v4017_v29 = vsel %vm1104_vm3, %v7754_v38, 0.0 }
0x112a   :  { %4733 = vrot.lane.b32.xlu1 %v8774_v7, %s7894_s10  ;;  %v7756_v39 = vpop.eup %7755 }
0x112b   :  { %v4026_v33 = vsel %vm1104_vm3, %v7756_v39, 0.0 }
0x113a   :  { %4655 = vrot.lane.b32.xlu0 %v8770_v58, %s7894_s10 }
0x113c   :  { %v3989_v41 = vpop.xlane.xlu1 %3988 }
0x113d   :  { %v3997_v43 = vsub.f32 %v3895_v1, %v3989_v41 }
0x113f   :  { %v4007_v44 = vmul.f32 1.442695, %v3997_v43 }
0x1141   :  { %7757 = vpow2.f32 %v4007_v44 }
0x114b   :  { %v8915_v49 = vpop.eup %7757 }
0x114c   :  { %v4023_v52 = vsel %vm1104_vm3, %v8915_v49, 0.0 }
0x114e   :  { %4018 = vadd.xlane.f32.xlu1 %v4017_v29 }
0x1159   :  { %4027 = vadd.xlane.f32.xlu0 %v4026_v33 }
0x115f   :  { %4731 = vrot.lane.b32.xlu1 %v8774_v7, %s7895_s25 }
0x116f   :  { %4653 = vrot.lane.b32.xlu0 %v8770_v58, %s7895_s25 }
0x1173   :  { %4811 = vrot.lane.b32.xlu0 %v8776_v16, %s7894_s10 }
0x1177   :  { %4809 = vrot.lane.b32.xlu0 %v8776_v16, %s7895_s25 }
0x1183   :  { %4024 = vadd.xlane.f32.xlu1 %v4023_v52 }
0x1194   :  { %4889 = vrot.lane.b32.xlu1 %v8782_v10, %s7894_s10 }
0x1198   :  { %4887 = vrot.lane.b32.xlu1 %v8782_v10, %s7895_s25 }
0x11a5   :  { %v4016_v47 = vpop.xlane.xlu0 %4015 }
0x11a6   :  { %7759 = vrcp.f32 %v4016_v47  ;;  %v4013_v48 = vpop.xlane.xlu1 %4012 }
0x11a7   :  { %7761 = vrcp.f32 %v4013_v48 }
0x11b0   :  { %v7760_v59 = vpop.eup %7759 }
0x11b1   :  { %v7762_v53 = vpop.eup %7761  ;;  %v4036_v21 = vmul.f32 %v7760_v59, %v7748_v62  ;;  %v4022_v1 = vpop.xlane.xlu0 %4021 }
0x11b2   :  { %v4035_v6 = vmul.f32 %v7762_v53, %v7750_v17  ;;  %7763 = vrcp.f32 %v4022_v1 }
0x11b3   :  { %7326 = vmatmul.mubr.msk.f32.vlgmr.msra.gmra.mrb[46].mxu0 %vm1104_vm3, %v4036_v21 }
0x11b4   :  { %7334 = vmatpush3.msra.mxu0 %v8888_v61  ;;  %7321 = vmatmul.mubr.msk.f32.vlgmr.msra.gmra.mrb[50].mxu1 %vm1104_vm3, %v4035_v6 }
0x11b5   :  { %7329 = vmatpush3.msra.mxu1 %v8886_v5  ;;  %7335 = vmatprep.mubr.msk.f32.mxu0 %vm7891_vm1, %v7890_v34  ;;  %v4734_v5 = vpop.permute.xlu1 %4733  ;;  %v4656_v60 = vpop.permute.xlu0 %4655 }
0x11b6   :  { %7343 = vmatprep.subr.mxu0 %v7890_v34  ;;  %7330 = vmatprep.mubr.msk.f32.mxu1 %vm7891_vm1, %v7890_v34 }
0x11b7   :  { %7338 = vmatprep.subr.mxu1 %v7890_v34 }
0x11bc   :  { %v7764_v37 = vpop.eup %7763 }
0x11bd   :  { %v4038_v45 = vmul.f32 %v7764_v37, %v7752_v23 }
0x11bf   :  { %7336 = vmatmul.mubr.msk.f32.vlgmr.msra.gmra.mrb[48].mxu0 %vm1104_vm3, %v4038_v45 }
0x11c0   :  { %7344 = vmatpush3.msra.mxu0 %v8890_v12  ;;  %7345 = vmatprep.mubr.msk.f32.mxu0 %vm7891_vm1, %v7890_v34 }
0x11c1   :  { %7353 = vmatprep.subr.mxu0 %v7890_v34 }
0x11db   :  { %v4019_v61 = vpop.xlane.xlu1 %4018 }
0x11dc   :  { %7765 = vrcp.f32 %v4019_v61 }
0x11e6   :  { %v7766_v13 = vpop.eup %7765  ;;  %v4028_v14 = vpop.xlane.xlu0 %4027 }
0x11e7   :  { %v4037_v4 = vmul.f32 %v7766_v13, %v7754_v38  ;;  %7767 = vrcp.f32 %v4028_v14 }
0x11e9   :  { %7331 = vmatmul.mubr.msk.f32.vlgmr.msra.gmra.mrb[52].mxu1 %vm1104_vm3, %v4037_v4 }
0x11ea   :  { %7339 = vmatpush3.msra.mxu1 %v8896_v25  ;;  %7340 = vmatprep.mubr.msk.f32.mxu1 %vm7891_vm1, %v7890_v34  ;;  %v4732_v25 = vpop.permute.xlu1 %4731  ;;  %v4654_v18 = vpop.permute.xlu0 %4653 }
0x11eb   :  { %7348 = vmatprep.subr.mxu1 %v7890_v34 }
0x11ee   :  { %v4812_v20 = vpop.permute.xlu0 %4811 }
0x11f1   :  { %v7768_v12 = vpop.eup %7767 }
0x11f2   :  { %v4040_v15 = vmul.f32 %v7768_v12, %v7756_v39 }
0x11f4   :  { %7346 = vmatmul.mubr.msk.f32.vlgmr.msra.gmra.mrb[50].mxu0 %vm1104_vm3, %v4040_v15 }
0x11f5   :  { %7354 = vmatpush3.xpose.msk.msra.mxu0 %vm644_vm2, %v8894_v30  ;;  %7355 = vmatprep.mubr.msk.f32.mxu0 %vm7891_vm1, %v7890_v34 }
0x11f6   :  { %7363 = vmatprep.subr.mxu0 %v7890_v34 }
0x11f8   :  { %7356 = vmatmul.mubr.msk.f32.vlgmr.msra.gmra.mrb[52].mxu0 %vm644_vm2, %v4576_v40 }
0x11f9   :  { %7364 = vmatpush3.xpose.msk.msra.mxu0 %vm644_vm2, %v4734_v5  ;;  %7365 = vmatprep.mubr.msk.f32.mxu0 %vm7891_vm1, %v7890_v34 }
0x11fa   :  { %7373 = vmatprep.subr.mxu0 %v7890_v34 }
0x11fc   :  { %7366 = vmatmul.mubr.msk.f32.vlgmr.msra.gmra.mrb[54].mxu0 %vm644_vm2, %v4732_v25 }
0x11fd   :  { %7375 = vmatprep.mubr.msk.f32.mxu0 %vm7891_vm1, %v7890_v34 }
0x1210   :  { %v4025_v30 = vpop.xlane.xlu1 %4024 }
0x1211   :  { %7769 = vrcp.f32 %v4025_v30 }
0x1214   :  { %v4890_v57 = vpop.permute.xlu1 %4889 }
0x1215   :  { %7374 = vmatpush3.xpose.msk.msra.mxu0 %vm644_vm2, %v4890_v57 }
0x1216   :  { %7383 = vmatprep.subr.mxu0 %v7890_v34 }
0x1218   :  { %v4888_v62 = vpop.permute.xlu1 %4887 }
0x1219   :  { %7376 = vmatmul.mubr.msk.f32.vlgmr.msra.gmra.mrb[56].mxu0 %vm644_vm2, %v4888_v62 }
0x121a   :  { %7385 = vmatprep.mubr.msk.f32.mxu0 %vm7891_vm1, %v7890_v34 }
0x121b   :  { %v7770_v2 = vpop.eup %7769 }
0x121c   :  { %v4039_v17 = vmul.f32 %v7770_v2, %v8915_v49 }
0x121e   :  { %7341 = vmatmul.mubr.msk.f32.vlgmr.msra.gmra.mrb[54].mxu1 %vm1104_vm3, %v4039_v17 }
0x121f   :  { %7349 = vmatpush3.xpose.msk.msra.mxu1 %vm644_vm2, %v8892_v63  ;;  %7350 = vmatprep.mubr.msk.f32.mxu1 %vm7891_vm1, %v7890_v34  ;;  %v4810_v63 = vpop.permute.xlu0 %4809 }
0x1220   :  { %7358 = vmatprep.subr.mxu1 %v7890_v34 }
0x1222   :  { %7351 = vmatmul.mubr.msk.f32.vlgmr.msra.gmra.mrb[56].mxu1 %vm644_vm2, %v8923_v46 }
0x1223   :  { %7359 = vmatpush3.xpose.msk.msra.mxu1 %vm644_vm2, %v4656_v60  ;;  %7360 = vmatprep.mubr.msk.f32.mxu1 %vm7891_vm1, %v7890_v34 }
0x1224   :  { %7368 = vmatprep.subr.mxu1 %v7890_v34 }
0x1226   :  { %7361 = vmatmul.mubr.msk.f32.vlgmr.msra.gmra.mrb[58].mxu1 %vm644_vm2, %v4654_v18 }
0x1227   :  { %7369 = vmatpush3.xpose.msk.msra.mxu1 %vm644_vm2, %v4812_v20  ;;  %7370 = vmatprep.mubr.msk.f32.mxu1 %vm7891_vm1, %v7890_v34 }
0x1228   :  { %7378 = vmatprep.subr.mxu1 %v7890_v34 }
0x122a   :  { %7371 = vmatmul.mubr.msk.f32.vlgmr.msra.gmra.mrb[60].mxu1 %vm644_vm2, %v4810_v63 }
0x122b   :  { %7380 = vmatprep.mubr.msk.f32.mxu1 %vm7891_vm1, %v7890_v34 }
0x1286   :  { %v8985_v23 = vpop.f32.mrb[46].mxu0 }
0x1287   :  { %v8987_v26 = vpop.f32.mrb[50].mxu1  ;;  %v7327_v19 = vpop.f32.mrb[47].mxu0 }
0x1288   :  { %v7322_v31 = vpop.f32.mrb[51].mxu1 }
0x1292   :  { %v8989_v22 = vpop.f32.mrb[48].mxu0 }
0x1293   :  { %v7337_v32 = vpop.f32.mrb[49].mxu0 }
0x12bc   :  { %v8991_v35 = vpop.f32.mrb[52].mxu1 }
0x12bd   :  { %v7332_v27 = vpop.f32.mrb[53].mxu1 }
0x12c7   :  { %v8993_v38 = vpop.f32.mrb[50].mxu0 }
0x12c8   :  { %v7347_v29 = vpop.f32.mrb[51].mxu0 }
0x12cb   :  { %v4649_v39 = vpop.f32.mrb[52].mxu0 }
0x12cc   :  { %v4650_v33 = vadd.f32 %v8843_v28, %v4649_v39  ;;  %v7357_v40 = vpop.f32.mrb[53].mxu0 }
0x12ce   :  { %v4968_v41 = vsel %vm1104_vm3, %v4650_v33, -inf }
0x12cf   :  { %4969 = vmax.xlane.f32.xlu1 %v4968_v41  ;;  %v4805_v43 = vpop.f32.mrb[54].mxu0 }
0x12d0   :  { %v7367_v44 = vpop.f32.mrb[55].mxu0  ;;  %v4806_v37 = vadd.f32 %v8857_v42, %v4805_v43 }
0x12ec   :  { %v4961_v49 = vpop.f32.mrb[56].mxu0 }
0x12ed   :  { %v7377_v52 = vpop.f32.mrb[57].mxu0  ;;  %v4962_v13 = vadd.f32 %v8870_v50, %v4961_v49 }
0x12f1   :  { %v8997_v46 = vpop.f32.mrb[54].mxu1 }
0x12f2   :  { %v7342_v47 = vpop.f32.mrb[55].mxu1 }
0x12f5   :  { %v4571_v48 = vpop.f32.mrb[56].mxu1 }
0x12f6   :  { %v4572_v59 = vadd.f32 %v8849_v24, %v4571_v48  ;;  %v7352_v53 = vpop.f32.mrb[57].mxu1  ;;  %v4974_v24 = vsel %vm1104_vm3, %v4806_v37, -inf }
0x12f8   :  { %v4965_v21 = vsel %vm1104_vm3, %v4572_v59, -inf }
0x12f9   :  { %4966 = vmax.xlane.f32.xlu0 %v4965_v21  ;;  %v4727_v1 = vpop.f32.mrb[58].mxu1 }
0x12fa   :  { %v4728_v28 = vadd.f32 %v8863_v54, %v4727_v1  ;;  %v7362_v6 = vpop.f32.mrb[59].mxu1  ;;  %v4980_v54 = vsel %vm1104_vm3, %v4962_v13, -inf }
0x12fc   :  { %v4971_v45 = vsel %vm1104_vm3, %v4728_v28, -inf }
0x12fd   :  { %4972 = vmax.xlane.f32.xlu0 %v4971_v45  ;;  %v4883_v5 = vpop.f32.mrb[60].mxu1 }
0x12fe   :  { %v4884_v61 = vadd.f32 %v8882_v0, %v4883_v5  ;;  %v7372_v60 = vpop.f32.mrb[61].mxu1 }
0x1300   :  { %v4977_v14 = vsel %vm1104_vm3, %v4884_v61, -inf }
0x1301   :  { %4975 = vmax.xlane.f32.xlu0 %v4974_v24  ;;  %4978 = vmax.xlane.f32.xlu1 %v4977_v14 }
0x1305   :  { %4981 = vmax.xlane.f32.xlu0 %v4980_v54 }
0x1312   :  { %5031 = vrot.lane.b32.xlu1 %v8764_v9, %s7896_s29 }
0x1316   :  { %5183 = vrot.lane.b32.xlu1 %v8770_v58, %s7896_s29 }
0x131a   :  { %5259 = vrot.lane.b32.xlu1 %v8774_v7, %s7896_s29 }
0x131b   :  { %5107 = vrot.lane.b32.xlu0 %v8762_v8, %s7896_s29 }
0x135c   :  { %v4970_v42 = vpop.xlane.xlu1 %4969 }
0x135d   :  { %v4984_v50 = vsub.f32 %v4650_v33, %v4970_v42 }
0x135f   :  { %v4991_v0 = vmul.f32 1.442695, %v4984_v50 }
0x1361   :  { %7771 = vpow2.f32 %v4991_v0 }
0x136b   :  { %v7772_v4 = vpop.eup %7771 }
0x136c   :  { %v5004_v12 = vsel %vm1104_vm3, %v7772_v4, 0.0 }
0x136d   :  { %5005 = vadd.xlane.f32.xlu0 %v5004_v12  ;;  %v6715_v12 = vld [vmem:[%s9335_s14 + $0x38] sm:$0xff] }
0x1386   :  { %v4967_v15 = vpop.xlane.xlu0 %4966 }
0x1387   :  { %v4983_v25 = vsub.f32 %v4572_v59, %v4967_v15 }
0x1389   :  { %v4989_v9 = vmul.f32 1.442695, %v4983_v25  ;;  %v6712_v25 = vld [vmem:[%s9335_s14 + $0x20] sm:$0xff] }
0x138a   :  { %v4973_v30 = vpop.xlane.xlu0 %4972 }
0x138b   :  { %7773 = vpow2.f32 %v4989_v9  ;;  %v4985_v58 = vsub.f32 %v4728_v28, %v4973_v30  ;;  %v6713_v9 = vld [vmem:[%s9335_s14 + $0x28] sm:$0xff] }
0x138c   :  { %v7581_v30 = vpack.c.bf16 %v6713_v9, %v6712_v25 }
0x138d   :  { %v4993_v57 = vmul.f32 1.442695, %v4985_v58 }
0x138e   :  { %v4976_v62 = vpop.xlane.xlu0 %4975  ;;  %v4979_v7 = vpop.xlane.xlu1 %4978 }
0x138f   :  { %7775 = vpow2.f32 %v4993_v57  ;;  %v4986_v2 = vsub.f32 %v4806_v37, %v4976_v62  ;;  %v4987_v8 = vsub.f32 %v4884_v61, %v4979_v7 }
0x1391   :  { %v4995_v17 = vmul.f32 1.442695, %v4986_v2  ;;  %v4997_v18 = vmul.f32 1.442695, %v4987_v8 }
0x1392   :  { %v4982_v20 = vpop.xlane.xlu0 %4981  ;;  %v5032_v63 = vpop.permute.xlu1 %5031 }
0x1393   :  { %7777 = vpow2.f32 %v4995_v17  ;;  %v4988_v19 = vsub.f32 %v4962_v13, %v4982_v20  ;;  %7379 = vmatpush3.msra.mxu1 %v5032_v63 }
0x1394   :  { %7779 = vpow2.f32 %v4997_v18  ;;  %7388 = vmatprep.subr.mxu1 %v7890_v34 }
0x1395   :  { %v7774_v31 = vpop.eup %7773  ;;  %v4999_v32 = vmul.f32 1.442695, %v4988_v19 }
0x1396   :  { %v5108_v27 = vpop.permute.xlu0 %5107  ;;  %v5001_v29 = vsel %vm1104_vm3, %v7774_v31, 0.0  ;;  %v5184_v48 = vpop.permute.xlu1 %5183 }
0x1397   :  { %7781 = vpow2.f32 %v4999_v32  ;;  %5002 = vadd.xlane.f32.xlu1 %v5001_v29  ;;  %7384 = vmatpush3.msra.mxu0 %v5108_v27  ;;  %v6765_v32 = vld [vmem:[%s9336_s15 + $0x1] ss:$0 sm:$0xff]  ;;  %s9375_s15 = sld [smem:[#allocation14_spill]] }
0x1398   :  { %7393 = vmatprep.subr.mxu0 %v7890_v34 }
0x1399   :  { %v7776_v39 = vpop.eup %7775 }
0x139a   :  { %v5007_v33 = vsel %vm1104_vm3, %v7776_v39, 0.0  ;;  %v5260_v21 = vpop.permute.xlu1 %5259 }
0x139b   :  { %5008 = vadd.xlane.f32.xlu1 %v5007_v33 }
0x139d   :  { %v7778_v40 = vpop.eup %7777 }
0x139e   :  { %v7780_v41 = vpop.eup %7779  ;;  %v5010_v43 = vsel %vm1104_vm3, %v7778_v40, 0.0 }
0x139f   :  { %5011 = vadd.xlane.f32.xlu0 %v5010_v43  ;;  %v5013_v44 = vsel %vm1104_vm3, %v7780_v41, 0.0 }
0x13a0   :  { %5014 = vadd.xlane.f32.xlu1 %v5013_v44 }
0x13a1   :  { %v7782_v49 = vpop.eup %7781 }
0x13a2   :  { %v5016_v52 = vsel %vm1104_vm3, %v7782_v49, 0.0 }
0x13a3   :  { %5017 = vadd.xlane.f32.xlu0 %v5016_v52 }
0x13b1   :  { %5411 = vrot.lane.b32.xlu1 %v8782_v10, %s7896_s29 }
0x13b9   :  { %5335 = vrot.lane.b32.xlu0 %v8776_v16, %s7896_s29 }
0x13fa   :  { %v5006_v47 = vpop.xlane.xlu0 %5005 }
0x13fb   :  { %7783 = vrcp.f32 %v5006_v47 }
0x1405   :  { %v7784_v59 = vpop.eup %7783 }
0x1406   :  { %v5026_v53 = vmul.f32 %v7784_v59, %v7772_v4  ;;  %v6714_v4 = vld [vmem:[%s9335_s14 + $0x30] sm:$0xff] }
0x1407   :  { %v7577_v15 = vpack.c.bf16 %v6715_v12, %v6714_v4 }
0x1408   :  { %7386 = vmatmul.mubr.msk.f32.vlgmr.msra.gmra.mrb[58].mxu0 %vm1104_vm3, %v5026_v53 }
0x1409   :  { %7394 = vmatpush3.msra.mxu0 %v5260_v21  ;;  %7395 = vmatprep.mubr.msk.f32.mxu0 %vm7891_vm1, %v7890_v34 }
0x140a   :  { %7403 = vmatprep.subr.mxu0 %v7890_v34 }
0x1424   :  { %v5003_v1 = vpop.xlane.xlu1 %5002 }
0x1425   :  { %7785 = vrcp.f32 %v5003_v1 }
0x1428   :  { %v5009_v10 = vpop.xlane.xlu1 %5008 }
0x1429   :  { %7787 = vrcp.f32 %v5009_v10 }
0x142c   :  { %v5012_v28 = vpop.xlane.xlu0 %5011 }
0x142d   :  { %7789 = vrcp.f32 %v5012_v28  ;;  %v5015_v16 = vpop.xlane.xlu1 %5014 }
0x142e   :  { %7791 = vrcp.f32 %v5015_v16 }
0x142f   :  { %v7786_v6 = vpop.eup %7785 }
0x1430   :  { %v5025_v37 = vmul.f32 %v7786_v6, %v7774_v31  ;;  %v5018_v45 = vpop.xlane.xlu0 %5017 }
0x1431   :  { %7793 = vrcp.f32 %v5018_v45  ;;  %v5412_v42 = vpop.permute.xlu1 %5411 }
0x1432   :  { %7381 = vmatmul.mubr.msk.f32.vlgmr.msra.gmra.mrb[62].mxu1 %vm1104_vm3, %v5025_v37 }
0x1433   :  { %v7788_v5 = vpop.eup %7787  ;;  %7389 = vmatpush3.msra.mxu1 %v5184_v48  ;;  %7390 = vmatprep.mubr.msk.f32.mxu1 %vm7891_vm1, %v7890_v34 }
0x1434   :  { %v5027_v61 = vmul.f32 %v7788_v5, %v7776_v39  ;;  %v5336_v60 = vpop.permute.xlu0 %5335  ;;  %7398 = vmatprep.subr.mxu1 %v7890_v34 }
0x1436   :  { %7391 = vmatmul.mubr.msk.f32.vlgmr.msra.gmra.mrb[64].mxu1 %vm1104_vm3, %v5027_v61 }
0x1437   :  { %v7790_v13 = vpop.eup %7789  ;;  %7399 = vmatpush3.msra.mxu1 %v5336_v60  ;;  %7400 = vmatprep.mubr.msk.f32.mxu1 %vm7891_vm1, %v7890_v34 }
0x1438   :  { %v7792_v24 = vpop.eup %7791  ;;  %v5028_v14 = vmul.f32 %v7790_v13, %v7778_v40  ;;  %7578 = vmatprep.subr.bf16.mxu1 %v7577_v15 }
0x1439   :  { %v5029_v54 = vmul.f32 %v7792_v24, %v7780_v41 }
0x143a   :  { %7396 = vmatmul.mubr.msk.f32.vlgmr.msra.gmra.mrb[60].mxu0 %vm1104_vm3, %v5028_v14 }
0x143b   :  { %v7794_v50 = vpop.eup %7793  ;;  %7401 = vmatmul.mubr.msk.f32.vlgmr.msra.gmra.mrb[66].mxu1 %vm1104_vm3, %v5029_v54  ;;  %7404 = vmatpush3.msra.mxu0 %v5412_v42 }
0x143c   :  { %v5030_v0 = vmul.f32 %v7794_v50, %v7782_v49  ;;  %7405 = vmatprep.mubr.msk.f32.mxu0 %vm7891_vm1, %v7890_v34  ;;  %7580 = vmatpush3.bf16.msra.mxu1 %v7577_v15 }
0x143d   :  { %7582 = vmatprep.subr.bf16.mxu1 %v7581_v30 }
0x143e   :  { %7406 = vmatmul.mubr.msk.f32.vlgmr.msra.gmra.mrb[62].mxu0 %vm1104_vm3, %v5030_v0 }
0x14db   :  { %v5179_v58 = vpop.f32.mrb[58].mxu0 }
0x14dc   :  { %v7387_v57 = vpop.f32.mrb[59].mxu0 }
0x1505   :  { %v5103_v62 = vpop.f32.mrb[62].mxu1 }
0x1506   :  { %v7382_v7 = vpop.f32.mrb[63].mxu1  ;;  %7412 = vmatprep.mubr.msk.f32.mxu1 %vm644_vm2, %v5103_v62 }
0x1507   :  { %7413 = vmatmul.mubr.msk.f32.vlgmr.msra.gmra.mrb[68].mxu1 %vm644_vm2, %v5179_v58 }
0x1508   :  { %7584 = vmatpush3.bf16.msra.mxu1 %v7581_v30 }
0x1509   :  { %v5255_v2 = vpop.f32.mrb[64].mxu1 }
0x150a   :  { %v7392_v8 = vpop.f32.mrb[65].mxu1  ;;  %7415 = vmatprep.mubr.msk.f32.mxu1 %vm644_vm2, %v5255_v2  ;;  %v6770_v2 = vld [vmem:[%s9339_s18 + $0x20] sm:$0xff] }
0x150b   :  { %v6771_v8 = vld [vmem:[%s9339_s18 + $0x28] sm:$0xff] }
0x150d   :  { %v5331_v17 = vpop.f32.mrb[60].mxu0 }
0x150e   :  { %v5407_v18 = vpop.f32.mrb[66].mxu1  ;;  %v7397_v20 = vpop.f32.mrb[61].mxu0  ;;  %7416 = vmatmul.mubr.msk.f32.gmra.mrb[70].mxu1 %vm644_vm2, %v5331_v17  ;;  %v7585_v17 = vpack.c.bf16 %v6771_v8, %v6770_v2 }
0x150f   :  { %v7402_v63 = vpop.f32.mrb[67].mxu1  ;;  %7418 = vmatprep.mubr.msk.f32.mxu1 %vm644_vm2, %v5407_v18  ;;  %v6772_v18 = vld [vmem:[%s9339_s18 + $0x30] sm:$0xff]  ;;  %v6773_v20 = vld [vmem:[%s9339_s18 + $0x38] sm:$0xff] }
0x1510   :  { %7586 = vmatprep.subr.bf16.mxu0 %v7585_v17  ;;  %v7589_v63 = vpack.c.bf16 %v6773_v20, %v6772_v18 }
0x1511   :  { %v5483_v19 = vpop.f32.mrb[62].mxu0  ;;  %7588 = vmatpush3.bf16.msra.mxu0 %v7585_v17 }
0x1512   :  { %v7407_v31 = vpop.f32.mrb[63].mxu0  ;;  %7419 = vmatmul.mubr.msk.f32.gmra.mrb[72].mxu1 %vm644_vm2, %v5483_v19  ;;  %7590 = vmatprep.subr.bf16.mxu0 %v7589_v63 }
0x1513   :  { %7425 = vmatprep.mubr.msk.f32.mxu1 %vm644_vm2, %v8987_v26 }
0x1515   :  { %7592 = vmatpush3.bf16.msra.mxu0 %v7589_v63 }
0x1516   :  { %7426 = vmatmul.mubr.msk.f32.vlgmr.msra.gmra.mrb[68].mxu1 %vm644_vm2, %v8985_v23 }
0x1517   :  { %7428 = vmatprep.mubr.msk.f32.mxu1 %vm644_vm2, %v8991_v35 }
0x151a   :  { %7429 = vmatmul.mubr.msk.f32.gmra.mrb[70].mxu1 %vm644_vm2, %v8989_v22 }
0x151b   :  { %7431 = vmatprep.mubr.msk.f32.mxu1 %vm644_vm2, %v8997_v46 }
0x151e   :  { %7432 = vmatmul.mubr.msk.f32.gmra.mrb[72].mxu1 %vm644_vm2, %v8993_v38 }
0x15e9   :  { %v7427_v26 = vpop.f32.mrb[68].mxu1 }
0x15ea   :  { %v5722_v27 = vadd.f32 %v7427_v26, %v6765_v32  ;;  %v5684_v29 = vpop.f32.mrb[69].mxu1 }
0x15eb   :  { %v5721_v23 = vadd.f32 %v6765_v32, %v5684_v29 }
0x15ec   :  { %v5728_v39 = vadd.f32 %v5722_v27, %v8731_v51 }
0x15ed   :  { %v5727_v35 = vadd.f32 %v5721_v23, %v8729_v55  ;;  %v7430_v33 = vpop.f32.mrb[70].mxu1 }
0x15ee   :  { %v5694_v22 = vpop.f32.mrb[71].mxu1  ;;  %v5740_v40 = vsel %vm367_vm11, %v5728_v39, 0.0  ;;  %v5724_v46 = vadd.f32 %v7430_v33, %v6765_v32 }
0x15ef   :  { %v5723_v41 = vadd.f32 %v6765_v32, %v5694_v22  ;;  %5741 = vadd.xlane.f32.xlu1 %v5740_v40  ;;  %v5737_v38 = vsel %vm367_vm11, %v5727_v35, 0.0 }
0x15f0   :  { %5738 = vadd.xlane.f32.xlu0 %v5737_v38  ;;  %v5730_v52 = vadd.f32 %v5724_v46, %v8743_v3 }
0x15f1   :  { %v5729_v43 = vadd.f32 %v5723_v41, %v8740_v11  ;;  %v7433_v44 = vpop.f32.mrb[72].mxu1 }
0x15f2   :  { %v5704_v49 = vpop.f32.mrb[73].mxu1  ;;  %v5726_v47 = vadd.f32 %v7433_v44, %v6765_v32  ;;  %v5746_v53 = vsel %vm367_vm11, %v5730_v52, 0.0 }
0x15f3   :  { %v5725_v51 = vadd.f32 %v6765_v32, %v5704_v49  ;;  %v5743_v55 = vsel %vm367_vm11, %v5729_v43, 0.0 }
0x15f4   :  { %5744 = vadd.xlane.f32.xlu0 %v5743_v55  ;;  %v5732_v59 = vadd.f32 %v5726_v47, %v8751_v36 }
0x15f5   :  { %v5731_v48 = vadd.f32 %v5725_v51, %v8749_v56 }
0x15f6   :  { %v5752_v11 = vsel %vm367_vm11, %v5732_v59, 0.0 }
0x15f7   :  { %v5749_v21 = vsel %vm367_vm11, %v5731_v48, 0.0 }
0x15f8   :  { %5747 = vadd.xlane.f32.xlu0 %v5746_v53  ;;  %5750 = vadd.xlane.f32.xlu1 %v5749_v21 }
0x15fc   :  { %5753 = vadd.xlane.f32.xlu0 %v5752_v11 }
0x167c   :  { %v5742_v1 = vpop.xlane.xlu1 %5741 }
0x167d   :  { %v5756_v3 = vmul.f32 0.03125, %v5742_v1  ;;  %v5739_v10 = vpop.xlane.xlu0 %5738 }
0x167e   :  { %v5755_v28 = vmul.f32 0.03125, %v5739_v10 }
0x167f   :  { %v9090_v16 = vsub.f32 %v5728_v39, %v5756_v3 }
0x1680   :  { %v9092_v6 = vsub.f32 %v5727_v35, %v5755_v28 }
0x1681   :  { %v5745_v56 = vpop.xlane.xlu0 %5744  ;;  %v5768_v36 = vmul.f32 %v9090_v16, %v9090_v16 }
0x1682   :  { %v5757_v37 = vmul.f32 0.03125, %v5745_v56  ;;  %v5767_v45 = vmul.f32 %v9092_v6, %v9092_v6 }
0x1683   :  { %v5776_v5 = vsel %vm367_vm11, %v5768_v36, 0.0 }
0x1684   :  { %v9099_v61 = vsub.f32 %v5729_v43, %v5757_v37  ;;  %5777 = vadd.xlane.f32.xlu0 %v5776_v5  ;;  %v5773_v60 = vsel %vm367_vm11, %v5767_v45, 0.0 }
0x1685   :  { %v5748_v13 = vpop.xlane.xlu0 %5747  ;;  %5774 = vadd.xlane.f32.xlu1 %v5773_v60  ;;  %v5751_v24 = vpop.xlane.xlu1 %5750 }
0x1686   :  { %v5758_v14 = vmul.f32 0.03125, %v5748_v13  ;;  %v5759_v54 = vmul.f32 0.03125, %v5751_v24  ;;  %v5769_v42 = vmul.f32 %v9099_v61, %v9099_v61 }
0x1688   :  { %v9104_v50 = vsub.f32 %v5730_v52, %v5758_v14  ;;  %v9106_v0 = vsub.f32 %v5731_v48, %v5759_v54  ;;  %v5779_v4 = vsel %vm367_vm11, %v5769_v42, 0.0  ;;  %v6768_v52 = vld [vmem:[%s9337_s16 + $0x1] ss:$0 sm:$0xff] }
0x1689   :  { %v5754_v12 = vpop.xlane.xlu0 %5753  ;;  %5780 = vadd.xlane.f32.xlu1 %v5779_v4  ;;  %v6782_v42 = vld [vmem:[%s9341_s20 + $0x40] sm:$0xff]  ;;  %v6784_v4 = vld [vmem:[%s9341_s20 + $0x50] sm:$0xff] }
0x168a   :  { %v5760_v15 = vmul.f32 0.03125, %v5754_v12  ;;  %v5770_v25 = vmul.f32 %v9104_v50, %v9104_v50  ;;  %v5771_v9 = vmul.f32 %v9106_v0, %v9106_v0  ;;  %v6785_v12 = vld [vmem:[%s9341_s20 + $0x58] sm:$0xff] }
0x168c   :  { %v9113_v30 = vsub.f32 %v5732_v59, %v5760_v15  ;;  %v5782_v58 = vsel %vm367_vm11, %v5770_v25, 0.0  ;;  %v5785_v57 = vsel %vm367_vm11, %v5771_v9, 0.0  ;;  %v6769_v59 = vld [vmem:[%s9338_s17 + $0x1] ss:$0 sm:$0xff]  ;;  %v7597_v15 = vpack.c.bf16 %v6785_v12, %v6784_v4  ;;  %v6787_v9 = vld [vmem:[%s9341_s20 + $0x68] sm:$0xff] }
0x168d   :  { %5783 = vadd.xlane.f32.xlu0 %v5782_v58  ;;  %5786 = vadd.xlane.f32.xlu1 %v5785_v57  ;;  %v6786_v25 = vld [vmem:[%s9341_s20 + $0x60] sm:$0xff]  ;;  %v6788_v58 = vld [vmem:[%s9341_s20 + $0x70] sm:$0xff]  ;;  %v6789_v57 = vld [vmem:[%s9341_s20 + $0x78] sm:$0xff] }
0x168e   :  { %v5772_v62 = vmul.f32 %v9113_v30, %v9113_v30 }
0x1690   :  { %v5788_v7 = vsel %vm367_vm11, %v5772_v62, 0.0  ;;  %v7605_v62 = vpack.c.bf16 %v6789_v57, %v6788_v58 }
0x1691   :  { %5789 = vadd.xlane.f32.xlu0 %v5788_v7  ;;  %v6775_v7 = vld [vmem:[%s9340_s19 + $0x1] ss:$0 sm:$0xff] }
0x1711   :  { %v5778_v19 = vpop.xlane.xlu0 %5777 }
0x1712   :  { %v5792_v31 = vmul.f32 0.03125, %v5778_v19  ;;  %v5775_v32 = vpop.xlane.xlu1 %5774 }
0x1713   :  { %v5791_v26 = vmul.f32 0.03125, %v5775_v32 }
0x1714   :  { %v5798_v27 = vadd.f32 1e-06, %v5792_v31 }
0x1715   :  { %v5797_v29 = vadd.f32 1e-06, %v5791_v26 }
0x1716   :  { %7795 = vrsqrt.f32 %v5798_v27  ;;  %v5781_v23 = vpop.xlane.xlu1 %5780 }
0x1717   :  { %7797 = vrsqrt.f32 %v5797_v29  ;;  %v5793_v39 = vmul.f32 0.03125, %v5781_v23 }
0x1719   :  { %v5799_v35 = vadd.f32 1e-06, %v5793_v39 }
0x171a   :  { %v5784_v33 = vpop.xlane.xlu0 %5783  ;;  %v5787_v22 = vpop.xlane.xlu1 %5786 }
0x171b   :  { %7799 = vrsqrt.f32 %v5799_v35  ;;  %v5794_v40 = vmul.f32 0.03125, %v5784_v33  ;;  %v5795_v46 = vmul.f32 0.03125, %v5787_v22 }
0x171d   :  { %v5800_v41 = vadd.f32 1e-06, %v5794_v40  ;;  %v5801_v38 = vadd.f32 1e-06, %v5795_v46 }
0x171e   :  { %v5790_v43 = vpop.xlane.xlu0 %5789 }
0x171f   :  { %7801 = vrsqrt.f32 %v5800_v41  ;;  %v5796_v44 = vmul.f32 0.03125, %v5790_v43 }
0x1720   :  { %v7796_v49 = vpop.eup %7795  ;;  %7803 = vrsqrt.f32 %v5801_v38 }
0x1721   :  { %v7798_v47 = vpop.eup %7797  ;;  %v5810_v51 = vmul.f32 %v7796_v49, %v9090_v16  ;;  %v5802_v55 = vadd.f32 1e-06, %v5796_v44 }
0x1722   :  { %v5809_v48 = vmul.f32 %v7798_v47, %v9092_v6 }
0x1723   :  { %7805 = vrsqrt.f32 %v5802_v55  ;;  %v5822_v53 = vmul.f32 %v6768_v52, %v5810_v51 }
0x1724   :  { %v5821_v21 = vmul.f32 %v6768_v52, %v5809_v48 }
0x1725   :  { %v7800_v11 = vpop.eup %7799  ;;  %v9143_v10 = vadd.f32 %v6769_v59, %v5822_v53 }
0x1726   :  { %v9140_v1 = vadd.f32 %v6769_v59, %v5821_v21  ;;  %v5811_v3 = vmul.f32 %v7800_v11, %v9099_v61 }
0x1728   :  { %7442 = vmatprep.mubr.msk.f32.mxu0 %vm367_vm11, %v9140_v1  ;;  %v5823_v28 = vmul.f32 %v6768_v52, %v5811_v3 }
0x1729   :  { %v7802_v16 = vpop.eup %7801  ;;  %7443 = vmatmul.mubr.msk.f32.vlgmr.msra.gmra.mrb[64].mxu0 %vm367_vm11, %v9143_v10 }
0x172a   :  { %v7804_v6 = vpop.eup %7803  ;;  %v9149_v56 = vadd.f32 %v6769_v59, %v5823_v28  ;;  %v5812_v36 = vmul.f32 %v7802_v16, %v9104_v50  ;;  %v6783_v50 = vld [vmem:[%s9341_s20 + $0x48] sm:$0xff] }
0x172b   :  { %v5813_v37 = vmul.f32 %v7804_v6, %v9106_v0  ;;  %v7593_v0 = vpack.c.bf16 %v6783_v50, %v6782_v42 }
0x172c   :  { %7445 = vmatprep.mubr.msk.f32.mxu0 %vm367_vm11, %v9149_v56  ;;  %v5824_v45 = vmul.f32 %v6768_v52, %v5812_v36 }
0x172d   :  { %v7806_v5 = vpop.eup %7805  ;;  %v5825_v61 = vmul.f32 %v6768_v52, %v5813_v37  ;;  %7594 = vmatprep.subr.bf16.mxu0 %v7593_v0 }
0x172e   :  { %v9155_v60 = vadd.f32 %v6769_v59, %v5824_v45  ;;  %v5814_v13 = vmul.f32 %v7806_v5, %v9113_v30  ;;  %7596 = vmatpush3.bf16.msra.mxu0 %v7593_v0  ;;  %v7601_v30 = vpack.c.bf16 %v6787_v9, %v6786_v25 }
0x172f   :  { %v9158_v24 = vadd.f32 %v6769_v59, %v5825_v61  ;;  %7598 = vmatprep.subr.bf16.mxu0 %v7597_v15 }
0x1730   :  { %7446 = vmatmul.mubr.msk.f32.gmra.mrb[66].mxu0 %vm367_vm11, %v9155_v60  ;;  %v5826_v14 = vmul.f32 %v6768_v52, %v5814_v13 }
0x1731   :  { %7448 = vmatprep.mubr.msk.f32.mxu0 %vm367_vm11, %v9158_v24 }
0x1732   :  { %v9164_v54 = vadd.f32 %v6769_v59, %v5826_v14  ;;  %7600 = vmatpush3.bf16.msra.mxu0 %v7597_v15 }
0x1733   :  { %7602 = vmatprep.subr.bf16.mxu0 %v7601_v30 }
0x1734   :  { %7449 = vmatmul.mubr.msk.f32.gmra.mrb[68].mxu0 %vm367_vm11, %v9164_v54 }
0x1736   :  { %7604 = vmatpush3.bf16.msra.mxu0 %v7601_v30 }
0x1737   :  { %7606 = vmatprep.subr.bf16.mxu0 %v7605_v62 }
0x173a   :  { %7608 = vmatpush3.bf16.msra.mxu0 %v7605_v62 }
0x17fc   :  { %v7444_v2 = vpop.f32.mrb[64].mxu0 }
0x17fd   :  { %v5942_v8 = vadd.f32 %v7444_v2, %v6775_v7  ;;  %v5936_v17 = vpop.f32.mrb[65].mxu0 }
0x17fe   :  { %v5937_v18 = vadd.f32 %v6775_v7, %v5936_v17 }
0x17ff   :  { %v5972_v20 = vmul.f32 0.044715, %v5942_v8  ;;  %v5966_v4 = vmul.f32 0.5, %v5942_v8 }
0x1800   :  { %v5971_v63 = vmul.f32 0.044715, %v5937_v18  ;;  %v5965_v50 = vmul.f32 0.5, %v5937_v18 }
0x1801   :  { %v5978_v19 = vmul.f32 %v5972_v20, %v5942_v8 }
0x1802   :  { %v5977_v31 = vmul.f32 %v5971_v63, %v5937_v18 }
0x1803   :  { %v5984_v32 = vmul.f32 %v5978_v19, %v5942_v8  ;;  %v7447_v26 = vpop.f32.mrb[66].mxu0 }
0x1804   :  { %v5983_v27 = vmul.f32 %v5977_v31, %v5937_v18  ;;  %v5952_v29 = vadd.f32 %v7447_v26, %v6775_v7  ;;  %v5946_v23 = vpop.f32.mrb[67].mxu0  ;;  %v6791_v26 = vld [vmem:[%s9342_s21 + $0x1] ss:$0 sm:$0xff] }
0x1805   :  { %v5990_v39 = vadd.f32 %v5984_v32, %v5942_v8  ;;  %v5947_v35 = vadd.f32 %v6775_v7, %v5946_v23 }
0x1806   :  { %v5989_v33 = vadd.f32 %v5983_v27, %v5937_v18  ;;  %v5974_v22 = vmul.f32 0.044715, %v5952_v29  ;;  %v5968_v62 = vmul.f32 0.5, %v5952_v29 }
0x1807   :  { %v5996_v40 = vmul.f32 0.7978846, %v5990_v39  ;;  %v5973_v46 = vmul.f32 0.044715, %v5947_v35  ;;  %v7450_v41 = vpop.f32.mrb[68].mxu0  ;;  %v5967_v58 = vmul.f32 0.5, %v5947_v35 }
0x1808   :  { %v5980_v38 = vmul.f32 %v5974_v22, %v5952_v29  ;;  %v5962_v43 = vadd.f32 %v7450_v41, %v6775_v7  ;;  %v5956_v44 = vpop.f32.mrb[69].mxu0  ;;  %v5995_v49 = vmul.f32 0.7978846, %v5989_v33 }
0x1809   :  { %7807 = vtanh.f32 %v5996_v40  ;;  %v5979_v52 = vmul.f32 %v5973_v46, %v5947_v35  ;;  %v5957_v47 = vadd.f32 %v6775_v7, %v5956_v44 }
0x180a   :  { %v5986_v51 = vmul.f32 %v5980_v38, %v5952_v29  ;;  %v5976_v55 = vmul.f32 0.044715, %v5962_v43  ;;  %7809 = vtanh.f32 %v5995_v49  ;;  %v5970_v19 = vmul.f32 0.5, %v5962_v43 }
0x180b   :  { %v5985_v48 = vmul.f32 %v5979_v52, %v5947_v35  ;;  %v5975_v59 = vmul.f32 0.044715, %v5957_v47  ;;  %v5969_v8 = vmul.f32 0.5, %v5957_v47 }
0x180c   :  { %v5992_v53 = vadd.f32 %v5986_v51, %v5952_v29  ;;  %v5982_v21 = vmul.f32 %v5976_v55, %v5962_v43 }
0x180d   :  { %v5991_v11 = vadd.f32 %v5985_v48, %v5947_v35  ;;  %v5981_v3 = vmul.f32 %v5975_v59, %v5957_v47 }
0x180e   :  { %v5988_v28 = vmul.f32 %v5982_v21, %v5962_v43  ;;  %v5998_v16 = vmul.f32 0.7978846, %v5992_v53 }
0x180f   :  { %v5987_v6 = vmul.f32 %v5981_v3, %v5957_v47  ;;  %v5997_v36 = vmul.f32 0.7978846, %v5991_v11 }
0x1810   :  { %v5994_v37 = vadd.f32 %v5988_v28, %v5962_v43  ;;  %7811 = vtanh.f32 %v5998_v16 }
0x1811   :  { %v5993_v45 = vadd.f32 %v5987_v6, %v5957_v47  ;;  %7813 = vtanh.f32 %v5997_v36 }
0x1812   :  { %v6000_v5 = vmul.f32 0.7978846, %v5994_v37 }
0x1813   :  { %v7808_v61 = vpop.eup %7807  ;;  %v5999_v13 = vmul.f32 0.7978846, %v5993_v45 }
0x1814   :  { %v7810_v14 = vpop.eup %7809  ;;  %v6008_v42 = vadd.f32 1.0, %v7808_v61  ;;  %7815 = vtanh.f32 %v6000_v5 }
0x1815   :  { %v6007_v0 = vadd.f32 1.0, %v7810_v14  ;;  %7817 = vtanh.f32 %v5999_v13 }
0x1816   :  { %v6014_v15 = vmul.f32 %v6008_v42, %v5966_v4 }
0x1817   :  { %v6013_v12 = vmul.f32 %v6007_v0, %v5965_v50 }
0x1819   :  { %7467 = vmatprep.mubr.msk.f32.mxu0 %vm244_vm12, %v6013_v12 }
0x181a   :  { %v7812_v25 = vpop.eup %7811  ;;  %7468 = vmatmul.mubr.msk.f32.vlgmr.msra.gmra.mrb[70].mxu0 %vm244_vm12, %v6014_v15 }
0x181b   :  { %v7814_v9 = vpop.eup %7813  ;;  %v6010_v30 = vadd.f32 1.0, %v7812_v25 }
0x181c   :  { %v6009_v57 = vadd.f32 1.0, %v7814_v9 }
0x181d   :  { %v6016_v20 = vmul.f32 %v6010_v30, %v5968_v62 }
0x181e   :  { %v7816_v7 = vpop.eup %7815  ;;  %v6015_v2 = vmul.f32 %v6009_v57, %v5967_v58 }
0x181f   :  { %v7818_v17 = vpop.eup %7817  ;;  %v6012_v18 = vadd.f32 1.0, %v7816_v7 }
0x1820   :  { %7470 = vmatprep.mubr.msk.f32.mxu0 %vm244_vm12, %v6015_v2  ;;  %v6011_v63 = vadd.f32 1.0, %v7818_v17  ;;  %v6261_v17 = vld [vmem:[%s9345_s24] sm:$0xff] }
0x1821   :  { %7471 = vmatmul.mubr.msk.f32.gmra.mrb[72].mxu0 %vm244_vm12, %v6016_v20  ;;  %v6018_v32 = vmul.f32 %v6012_v18, %v5970_v19  ;;  %v6262_v20 = vld [vmem:[%s9345_s24 + $0x8] sm:$0xff] }
0x1822   :  { %v6017_v31 = vmul.f32 %v6011_v63, %v5969_v8  ;;  %v7609_v18 = vpack.c.bf16 %v6262_v20, %v6261_v17  ;;  %v6263_v8 = vld [vmem:[%s9345_s24 + $0x10] sm:$0xff]  ;;  %v6264_v63 = vld [vmem:[%s9345_s24 + $0x18] sm:$0xff]  ;;  %v6461_v20 = vld [vmem:[%s9374_s28] sm:$0x3f] }
0x1823   :  { %v7613_v19 = vpack.c.bf16 %v6264_v63, %v6263_v8  ;;  %v6460_v63 = vld [vmem:[%s9375_s15] sm:$0x3] }
0x1824   :  { %7473 = vmatprep.mubr.msk.f32.mxu0 %vm244_vm12, %v6017_v31  ;;  %7610 = vmatprep.subr.bf16.mxu1 %v7609_v18 }
0x1825   :  { %7474 = vmatmul.mubr.msk.f32.gmra.mrb[74].mxu0 %vm244_vm12, %v6018_v32  ;;  %7612 = vmatpush3.bf16.msra.mxu1 %v7609_v18  ;;  %vm6386_vm12 = vcmask 392192  }
0x1826   :  { %7505 = vmatprep.mubr.msk.f32.mxu0 %vm7891_vm1, %v7890_v34  ;;  %7614 = vmatprep.subr.bf16.mxu1 %v7613_v19 }
0x1829   :  { %7616 = vmatpush3.bf16.msra.mxu1 %v7613_v19 }
0x182a   :  { %7508 = vmatprep.subr.mxu1 %v7890_v34 }
0x18ed   :  { %v7469_v27 = vpop.f32.mrb[70].mxu0 }
0x18ee   :  { %v6126_v29 = vadd.f32 %v7469_v27, %v6791_v26  ;;  %v6120_v23 = vpop.f32.mrb[71].mxu0 }
0x18ef   :  { %v6121_v39 = vadd.f32 %v6791_v26, %v6120_v23 }
0x18f0   :  { %v6150_v35 = vadd.f32 %v6126_v29, %v9143_v10 }
0x18f1   :  { %v6149_v33 = vadd.f32 %v6121_v39, %v9140_v1 }
0x18f2   :  { %v6162_v22 = vsel %vm367_vm11, %v6150_v35, 0.0 }
0x18f3   :  { %6163 = vadd.xlane.f32.xlu0 %v6162_v22  ;;  %v6159_v40 = vsel %vm367_vm11, %v6149_v33, 0.0 }
0x18f4   :  { %v7472_v46 = vpop.f32.mrb[72].mxu0  ;;  %6160 = vadd.xlane.f32.xlu1 %v6159_v40 }
0x18f5   :  { %v6136_v41 = vadd.f32 %v7472_v46, %v6791_v26  ;;  %v6130_v38 = vpop.f32.mrb[73].mxu0 }
0x18f6   :  { %v6131_v43 = vadd.f32 %v6791_v26, %v6130_v38 }
0x18f7   :  { %v6152_v44 = vadd.f32 %v6136_v41, %v9155_v60 }
0x18f8   :  { %v6151_v49 = vadd.f32 %v6131_v43, %v9149_v56  ;;  %v7475_v52 = vpop.f32.mrb[74].mxu0 }
0x18f9   :  { %v6146_v47 = vadd.f32 %v7475_v52, %v6791_v26  ;;  %v6140_v51 = vpop.f32.mrb[75].mxu0  ;;  %v6168_v10 = vsel %vm367_vm11, %v6152_v44, 0.0 }
0x18fa   :  { %v6141_v1 = vadd.f32 %v6791_v26, %v6140_v51  ;;  %6169 = vadd.xlane.f32.xlu0 %v6168_v10  ;;  %v6165_v55 = vsel %vm367_vm11, %v6151_v49, 0.0 }
0x18fb   :  { %v6154_v48 = vadd.f32 %v6146_v47, %v9164_v54  ;;  %6166 = vadd.xlane.f32.xlu1 %v6165_v55  ;;  %v6800_v47 = vld [vmem:[%s9343_s22 + $0x1] ss:$0 sm:$0xff] }
0x18fc   :  { %v6153_v59 = vadd.f32 %v6141_v1, %v9158_v24 }
0x18fd   :  { %v6174_v53 = vsel %vm367_vm11, %v6154_v48, 0.0 }
0x18fe   :  { %6175 = vadd.xlane.f32.xlu0 %v6174_v53  ;;  %v6171_v60 = vsel %vm367_vm11, %v6153_v59, 0.0 }
0x18ff   :  { %6172 = vadd.xlane.f32.xlu1 %v6171_v60 }
0x1980   :  { %v6164_v56 = vpop.xlane.xlu0 %6163 }
0x1981   :  { %v6178_v21 = vmul.f32 0.03125, %v6164_v56  ;;  %v6161_v11 = vpop.xlane.xlu1 %6160 }
0x1982   :  { %v6177_v3 = vmul.f32 0.03125, %v6161_v11 }
0x1983   :  { %v9218_v28 = vsub.f32 %v6150_v35, %v6178_v21 }
0x1984   :  { %v9220_v16 = vsub.f32 %v6149_v33, %v6177_v3 }
0x1985   :  { %v6190_v54 = vmul.f32 %v9218_v28, %v9218_v28 }
0x1986   :  { %v6189_v24 = vmul.f32 %v9220_v16, %v9220_v16 }
0x1987   :  { %v6170_v6 = vpop.xlane.xlu0 %6169  ;;  %v6198_v36 = vsel %vm367_vm11, %v6190_v54, 0.0 }
0x1988   :  { %v6180_v37 = vmul.f32 0.03125, %v6170_v6  ;;  %6199 = vadd.xlane.f32.xlu0 %v6198_v36  ;;  %v6167_v45 = vpop.xlane.xlu1 %6166  ;;  %v6195_v5 = vsel %vm367_vm11, %v6189_v24, 0.0 }
0x1989   :  { %v6179_v61 = vmul.f32 0.03125, %v6167_v45  ;;  %6196 = vadd.xlane.f32.xlu1 %v6195_v5 }
0x198a   :  { %v9228_v13 = vsub.f32 %v6152_v44, %v6180_v37 }
0x198b   :  { %v9230_v14 = vsub.f32 %v6151_v49, %v6179_v61  ;;  %v6176_v42 = vpop.xlane.xlu0 %6175 }
0x198c   :  { %v6182_v50 = vmul.f32 0.03125, %v6176_v42  ;;  %v6173_v0 = vpop.xlane.xlu1 %6172  ;;  %v6192_v4 = vmul.f32 %v9228_v13, %v9228_v13 }
0x198d   :  { %v6181_v12 = vmul.f32 0.03125, %v6173_v0  ;;  %v6191_v15 = vmul.f32 %v9230_v14, %v9230_v14 }
0x198e   :  { %v9236_v25 = vsub.f32 %v6154_v48, %v6182_v50  ;;  %v6204_v9 = vsel %vm367_vm11, %v6192_v4, 0.0  ;;  %v6801_v48 = vld [vmem:[%s9344_s23 + $0x1] ss:$0 sm:$0xff] }
0x198f   :  { %v9239_v30 = vsub.f32 %v6153_v59, %v6181_v12  ;;  %6205 = vadd.xlane.f32.xlu0 %v6204_v9  ;;  %v6201_v58 = vsel %vm367_vm11, %v6191_v15, 0.0 }
0x1990   :  { %6202 = vadd.xlane.f32.xlu1 %v6201_v58  ;;  %v6194_v57 = vmul.f32 %v9236_v25, %v9236_v25 }
0x1991   :  { %v6193_v62 = vmul.f32 %v9239_v30, %v9239_v30 }
0x1992   :  { %v6210_v7 = vsel %vm367_vm11, %v6194_v57, 0.0 }
0x1993   :  { %6211 = vadd.xlane.f32.xlu0 %v6210_v7  ;;  %v6207_v2 = vsel %vm367_vm11, %v6193_v62, 0.0  ;;  %v6808_v62 = vld [vmem:[#allocation2] ss:$0 sm:$0xff] }
0x1994   :  { %6208 = vadd.xlane.f32.xlu1 %v6207_v2 }
0x1a15   :  { %v6200_v31 = vpop.xlane.xlu0 %6199 }
0x1a16   :  { %v6214_v32 = vmul.f32 0.03125, %v6200_v31  ;;  %v6197_v26 = vpop.xlane.xlu1 %6196 }
0x1a17   :  { %v6213_v27 = vmul.f32 0.03125, %v6197_v26 }
0x1a18   :  { %v6220_v29 = vadd.f32 1e-06, %v6214_v32 }
0x1a19   :  { %v6219_v23 = vadd.f32 1e-06, %v6213_v27 }
0x1a1a   :  { %7819 = vrsqrt.f32 %v6220_v29 }
0x1a1b   :  { %7821 = vrsqrt.f32 %v6219_v23 }
0x1a1c   :  { %v6206_v39 = vpop.xlane.xlu0 %6205 }
0x1a1d   :  { %v6216_v35 = vmul.f32 0.03125, %v6206_v39  ;;  %v6203_v33 = vpop.xlane.xlu1 %6202 }
0x1a1e   :  { %v6215_v22 = vmul.f32 0.03125, %v6203_v33 }
0x1a1f   :  { %v6222_v40 = vadd.f32 1e-06, %v6216_v35 }
0x1a20   :  { %v6221_v46 = vadd.f32 1e-06, %v6215_v22  ;;  %v6212_v41 = vpop.xlane.xlu0 %6211 }
0x1a21   :  { %7823 = vrsqrt.f32 %v6222_v40  ;;  %v6218_v38 = vmul.f32 0.03125, %v6212_v41  ;;  %v6209_v43 = vpop.xlane.xlu1 %6208 }
0x1a22   :  { %7825 = vrsqrt.f32 %v6221_v46  ;;  %v6217_v44 = vmul.f32 0.03125, %v6209_v43  ;;  %v6561_v46 = vld [vmem:[%s9376_s30] sm:$0x3] }
0x1a23   :  { %v6224_v49 = vadd.f32 1e-06, %v6218_v38 }
0x1a24   :  { %v7820_v52 = vpop.eup %7819  ;;  %v6223_v51 = vadd.f32 1e-06, %v6217_v44 }
0x1a25   :  { %v7822_v10 = vpop.eup %7821  ;;  %v6232_v1 = vmul.f32 %v7820_v52, %v9218_v28  ;;  %7827 = vrsqrt.f32 %v6224_v49 }
0x1a26   :  { %7829 = vrsqrt.f32 %v6223_v51  ;;  %v6231_v55 = vmul.f32 %v7822_v10, %v9220_v16 }
0x1a27   :  { %v6244_v59 = vmul.f32 %v6800_v47, %v6232_v1 }
0x1a28   :  { %v6243_v53 = vmul.f32 %v6800_v47, %v6231_v55 }
0x1a29   :  { %v6256_v21 = vadd.f32 %v6801_v48, %v6244_v59 }
0x1a2a   :  { %v6255_v60 = vadd.f32 %v6801_v48, %v6243_v53 }
0x1a2b   :  { %v7824_v56 = vpop.eup %7823 }
0x1a2c   :  { %v7826_v11 = vpop.eup %7825  ;;  %7484 = vmatprep.mubr.msk.f32.mxu1 %vm367_vm11, %v6255_v60  ;;  %v6234_v3 = vmul.f32 %v7824_v56, %v9228_v13 }
0x1a2d   :  { %7485 = vmatmul.mubr.msk.f32.vlgmr.msra.gmra.mrb[74].mxu1 %vm367_vm11, %v6256_v21  ;;  %v6233_v28 = vmul.f32 %v7826_v11, %v9230_v14  ;;  %v7897_v14 = vmov 0.0|0.0  }
0x1a2e   :  { %v6246_v54 = vmul.f32 %v6800_v47, %v6234_v3  ;;  %7617 = vmatprep.subr.bf16.mxu0 %v7897_v14 }
0x1a2f   :  { %v7828_v16 = vpop.eup %7827  ;;  %v6245_v24 = vmul.f32 %v6800_v47, %v6233_v28 }
0x1a30   :  { %v7830_v6 = vpop.eup %7829  ;;  %v6236_v36 = vmul.f32 %v7828_v16, %v9236_v25  ;;  %v6258_v5 = vadd.f32 %v6801_v48, %v6246_v54 }
0x1a31   :  { %v6257_v37 = vadd.f32 %v6801_v48, %v6245_v24  ;;  %v6235_v45 = vmul.f32 %v7830_v6, %v9239_v30 }
0x1a32   :  { %v6248_v61 = vmul.f32 %v6800_v47, %v6236_v36 }
0x1a33   :  { %7487 = vmatprep.mubr.msk.f32.mxu1 %vm367_vm11, %v6257_v37  ;;  %v6247_v42 = vmul.f32 %v6800_v47, %v6235_v45 }
0x1a34   :  { %7488 = vmatmul.mubr.msk.f32.gmra.mrb[76].mxu1 %vm367_vm11, %v6258_v5  ;;  %v6260_v50 = vadd.f32 %v6801_v48, %v6248_v61 }
0x1a35   :  { %v6259_v13 = vadd.f32 %v6801_v48, %v6247_v42 }
0x1a37   :  { %7490 = vmatprep.mubr.msk.f32.mxu1 %vm367_vm11, %v6259_v13 }
0x1a38   :  { %7491 = vmatmul.mubr.msk.f32.gmra.mrb[78].mxu1 %vm367_vm11, %v6260_v50 }
0x1a39   :  { %7510 = vmatprep.mubr.msk.f32.mxu1 %vm7891_vm1, %v7890_v34  ;;  %v6378_v34 = vld [vmem:[%s9373_s3] sm:$0x3f] }
0x1b00   :  { %v7486_v0 = vpop.f32.mrb[74].mxu1 }
0x1b01   :  { %v6349_v4 = vpop.f32.mrb[75].mxu1 }
0x1b02   :  { %v7618_v12 = vpack.c.bf16 %v7486_v0, %v6349_v4 }
0x1b04   :  { %7619 = vmatpush3.bf16.msra.mxu0 %v7618_v12 }
0x1b05   :  { %7620 = vmatprep.subr.bf16.mxu0 %v7897_v14 }
0x1b07   :  { %v7489_v15 = vpop.f32.mrb[76].mxu1 }
0x1b08   :  { %v6359_v25 = vpop.f32.mrb[77].mxu1 }
0x1b09   :  { %v7621_v9 = vpack.c.bf16 %v7489_v15, %v6359_v25 }
0x1b0b   :  { %v7492_v30 = vpop.f32.mrb[78].mxu1  ;;  %7622 = vmatpush3.bf16.msra.mxu0 %v7621_v9 }
0x1b0c   :  { %v6369_v58 = vpop.f32.mrb[79].mxu1  ;;  %7623 = vmatprep.subr.bf16.mxu0 %v7897_v14 }
0x1b0d   :  { %v7624_v57 = vpack.c.bf16 %v7492_v30, %v6369_v58 }
0x1b0f   :  { %7625 = vmatpush3.bf16.msra.mxu0 %v7624_v57 }
0x1b12   :  { %7506 = vmatmul.mubr.msk.f32.vlgmr.msra.gmra.mrb[76].mxu0 %vm6386_vm12, %v6378_v34 }
0x1be5   :  { %v6456_v7 = vpop.f32.mrb[76].mxu0 }
0x1be6   :  { %v6457_v2 = vadd.f32 %v6808_v62, %v6456_v7  ;;  %v7507_v17 = vpop.f32.mrb[77].mxu0 }
0x1be8   :  { %6464 = vperm.xlu1 %7650, %v6457_v2  }
0x1c67   :  { %v6465_v18 = vpop.permute.xlu1 %6464 }
0x1c68   :  { %v6467_v8 = vmul.f32 %v6465_v18, %v6461_v20 }
0x1c6a   :  { %7509 = vmatpush3.msk.msra.mxu1 %vm6472_vm4, %v6467_v8 }
0x1c6b   :  { %7511 = vmatmul.mubr.msk.f32.vlgmr.msra.gmra.mrb[80].mxu1 %vm6468_vm5, %v6460_v63 }
0x1d3e   :  { %v6542_v19 = vpop.f32.mrb[80].mxu1 }
0x1d3f   :  { %v6548_v31 = vsel %vm6546_vm6, %v6542_v19, -inf  ;;  %6547 = vst.msk [vmem:[#allocation3] sm:$0x3] %vm6546_vm6, %v6542_v19  ;;  %v7512_v32 = vpop.f32.mrb[81].mxu1 }
0x1d40   :  { %6549 = vmax.xlane.f32.xlu0 %v6548_v31 }
0x1dcd   :  { %v6550_v26 = vpop.xlane.xlu0 %6549 }
0x1dce   :  { %v6551_v27 = vsub.f32 %v6542_v19, %v6550_v26 }
0x1dd0   :  { %v6552_v29 = vmul.f32 1.442695, %v6551_v27 }
0x1dd2   :  { %7831 = vpow2.f32 %v6552_v29 }
0x1ddc   :  { %v7832_v23 = vpop.eup %7831 }
0x1ddd   :  { %v6554_v39 = vsel %vm6546_vm6, %v7832_v23, 0.0 }
0x1dde   :  { %6555 = vadd.xlane.f32.xlu0 %v6554_v39 }
0x1e6b   :  { %v6556_v35 = vpop.xlane.xlu0 %6555 }
0x1e6c   :  { %7833 = vlog2.f32 %v6556_v35 }
0x1e76   :  { %v7834_v33 = vpop.eup %7833 }
0x1e77   :  { %v6558_v22 = vmul.f32 0.6931472, %v7834_v33 }
0x1e79   :  { %v6559_v40 = vadd.f32 %v6558_v22, %v6550_v26 }
0x1e7b   :  { %v6560_v41 = vsub.f32 %v6542_v19, %v6559_v40 }
0x1e7d   :  { %v6562_v38 = vmul.f32 %v6561_v46, %v6560_v41 }
0x1e7f   :  { %v6563_v43 = vsel %vm6546_vm6, %v6562_v38, 0.0 }
0x1e80   :  { %6564 = vadd.xlane.f32.xlu0 %v6563_v43 }
0x1e81   :  { %7852 = shalt.err (!%p7849_p4)
}
0x1e82   :  { %s7853_s21 = scalar_lea.hbm %s9347_s26, 32 }
0x1e83   :  { %p7854_p5 = scmp.ne.s32.totalorder %s9347_s26, %s7853_s21  ;;  %p7857_p6 = scmp.lt.u32.totalorder %s7853_s21, %s9347_s26 }
0x1e85   :  { %p7859_p7 = pnand %p7857_p6, %p7854_p5 }
0x1e87   :  { %7862 = shalt.err (!%p7859_p7)
}
0x1e88   :  { %6587 = dma.vmem_to_hbm [thread:$0]  %s6585_s5, 32, %s9347_s26, [#allocation4]   ;;  %vm6567_vm7 = vcmask 1041408   ;;  %vm6576_vm8 = vcmask 0  }
0x1e89   :  { %s7899_s17 = smov [#allocation5]  }
0x1e8a   :  { %s6594_s24 = sshll.u32 %s7899_s17, 4  ;;  %s6595_s24 = int_to_ptr.vmem [resolvable:$true] %s6594_s24 }
0x1e8b   :  { %s7863_s1 = scalar_lea.vmem %s6595_s24, 16  ;;  %s7867_s25 = scalar_lea.vmem %s6595_s24, 32 }
0x1e8c   :  { %p7864_p8 = scmp.ne.s32.totalorder %s6595_s24, %s7863_s1  ;;  %p7868_p9 = scmp.lt.s32.totalorder %s6595_s24, %s6595_s24 }
0x1e8d   :  { %p7869_p10 = scmp.lt.s32.totalorder %s7867_s25, %s7863_s1 }
0x1e8f   :  { %p7870_p11 = por %p7869_p10, %p7868_p9 }
0x1e91   :  { %p7871_p12 = pnand %p7870_p11, %p7864_p8 }
0x1f0d   :  { %v6565_v44 = vpop.xlane.xlu0 %6564 }
0x1f0e   :  { %v6566_v49 = vsub.f32 0.0, %v6565_v44 }
0x1f10   :  { %v6568_v52 = vsel %vm6567_vm7, %v6566_v49, 0.0 }
0x1f11   :  { %v6569_v47 = vrot.slane %v6568_v52, 4 }
0x1f13   :  { %v6570_v51 = vadd.f32 %v6569_v47, %v6568_v52 }
0x1f15   :  { %v6571_v10 = vrot.slane %v6570_v51, 2 }
0x1f17   :  { %v6572_v1 = vadd.f32 %v6571_v10, %v6570_v51 }
0x1f19   :  { %v6573_v55 = vrot.slane %v6572_v1, 1 }
0x1f1b   :  { %v6574_v48 = vadd.f32 %v6573_v55, %v6572_v1 }
0x1f1d   :  { %v6575_v59 = vmul.f32 0.5, %v6574_v48 }
0x1f1f   :  { %6577 = vst.msk [vmem:[#allocation5] sm:$0x1] %vm6576_vm8, %v6575_v59 }
0x1f20   :  { %7874 = shalt.err (!%p7871_p12)
}
0x1f21   :  { %s7875_s22 = scalar_lea.hbm %s9348_s27, 16 }
0x1f22   :  { %p7876_p13 = scmp.ne.s32.totalorder %s9348_s27, %s7875_s22  ;;  %p7879_p0 = scmp.lt.u32.totalorder %s7875_s22, %s9348_s27 }
0x1f24   :  { %p7881_p1 = pnand %p7879_p0, %p7876_p13 }
0x1f26   :  { %7884 = shalt.err (!%p7881_p1)
}
0x1f27   :  { %6597 = dma.vmem_to_hbm [thread:$0]  %s6595_s24, 16, %s9348_s27, [#allocation6]  }
0x1f28   :  { %7885 = dma.done.wait [#allocation4], 32  }
0x1f29   :  { %7886 = vsyncadd [#allocation4], 4294967264 }
0x1f2a   :  { %7887 = dma.done.wait [#allocation6], 16  }
0x1f2b   :  { %7888 = vsyncadd [#allocation6], 4294967280 }
0x1f2c   :  { %6604 = vsyncpa [#allocation4], 1 }
0x1f2d   :  { %6605 = vsyncpa [#allocation6], 1 }

</bundles_post_ra>
